<compile_context>
chip_gen: v7x
topology: tpu7x:2x2x1
jax: 0.10.0
libtpu: 0.0.40
codegen_flags: <defaults>
</compile_context>

<pallas_src>
import functools

import jax
import jax.numpy as jnp
from jax import lax
from jax.experimental import pallas as pl
from jax.experimental.pallas import tpu as pltpu


# ------------------------- Pallas kernels -------------------------

def _ca_and_stats_kernel(x_ref, w1_ref, w2_ref, ca_ref, stats_ref):
    """Per-batch channel attention + channel-wise stats of (x * ca).

    x_ref:     (1, C, HW)  input slab (channels on sublanes, pixels on lanes)
    w1_ref:    (CR, C)     first 1x1-conv weight  (C -> C/r, no bias)
    w2_ref:    (C, CR)     second 1x1-conv weight (C/r -> C, no bias)
    ca_ref:    (1, C, 1)   sigmoid channel attention      (output)
    stats_ref: (1, 2, HW)  [max_c(x*ca); mean_c(x*ca)]    (output)
    """
    x = x_ref[0]                                            # (C, HW)
    c, hw = x.shape

    # AdaptiveMaxPool2d(1) / AdaptiveAvgPool2d(1): reduce over lanes (spatial).
    mx = jnp.max(x, axis=1, keepdims=True)                  # (C, 1)
    av = jnp.sum(x, axis=1, keepdims=True) * (1.0 / hw)     # (C, 1)

    w1 = w1_ref[...]                                        # (CR, C)
    w2 = w2_ref[...]                                        # (C, CR)

    def shared_mlp(v):                                      # (C, 1) -> (C, 1)
        h = jnp.dot(w1, v, preferred_element_type=jnp.float32)   # (CR, 1)
        h = jnp.maximum(h, 0.0)                                  # ReLU
        return jnp.dot(w2, h, preferred_element_type=jnp.float32)

    ca = jax.nn.sigmoid(shared_mlp(mx) + shared_mlp(av))    # (C, 1)
    ca_ref[0] = ca

    # Apply channel attention in VMEM (never hits HBM) and reduce over the
    # channel (sublane) axis for the spatial-attention branch.
    o1 = x * ca                                             # (C, HW)
    smax = jnp.max(o1, axis=0, keepdims=True)               # (1, HW)
    smean = jnp.sum(o1, axis=0, keepdims=True) * (1.0 / c)  # (1, HW)
    stats_ref[0] = jnp.concatenate([smax, smean], axis=0)   # (2, HW)


def _spatial_attn_kernel(pad_ref, w_ref, b_ref, sa_ref, *, ks, out_h, out_w):
    """(2 -> 1) KxK 'same' conv + sigmoid on the tiny pooled-stats map.

    pad_ref: (1, 2, H+ks-1, W+ks-1)  zero-padded [max; mean] map
    w_ref:   SMEM (2*ks*ks,)         conv weight, (c, kh, kw) order
    b_ref:   SMEM (1,)               conv bias
    sa_ref:  (1, H, W)               sigmoid spatial attention (output)
    """
    padded = pad_ref[0]                                     # (2, Hp, Wp)
    acc = jnp.full((out_h, out_w), b_ref[0], dtype=jnp.float32)
    # Unrolled tap accumulation: 2 * ks * ks static slice-multiplies in VMEM.
    for c in range(2):
        for kh in range(ks):
            for kw in range(ks):
                w_tap = w_ref[c * ks * ks + kh * ks + kw]   # SMEM scalar
                acc = acc + w_tap * padded[c, kh:kh + out_h, kw:kw + out_w]
    sa_ref[0] = jax.nn.sigmoid(acc)


def _apply_attn_kernel(x_ref, ca_ref, sa_ref, o_ref):
    """out = (x * ca) * sa + x, lane-dense over (C, HW)."""
    x = x_ref[0]                                            # (C, HW)
    o1 = x * ca_ref[0]                                      # (C, HW) * (C, 1)
    o_ref[0] = o1 * sa_ref[0] + x                           # * (1, HW) + residual


# ------------------------- Wrapper -------------------------

def cbam_forward(x, ca_w1, ca_w2, sa_w, sa_b, *, sa_kernel_size=7):
    """x: (N, C, H, W) f32.  ca_w1: (C//r, C, 1, 1), ca_w2: (C, C//r, 1, 1),
    sa_w: (1, 2, K, K), sa_b: (1,).  Returns (N, C, H, W) f32."""
    N, C, H, W = x.shape
    CR = ca_w1.shape[0]
    KS = sa_kernel_size
    P = KS // 2
    HW = H * W
    assert HW % 128 == 0 and C % 8 == 0, "pick H*W multiple of 128 and C multiple of 8"

    xf = x.reshape(N, C, HW).astype(jnp.float32)            # free: NCHW kept
    w1m = ca_w1.reshape(CR, C).astype(jnp.float32)
    w2m = ca_w2.reshape(C, CR).astype(jnp.float32)
    wsa_flat = sa_w.reshape(2 * KS * KS).astype(jnp.float32)  # (c, kh, kw) order
    bsa = sa_b.reshape(1).astype(jnp.float32)

    # --- Kernel 1: channel attention + channel-wise stats of x*ca (fused) ---
    ca, stats = pl.pallas_call(
        _ca_and_stats_kernel,
        out_shape=(
            jax.ShapeDtypeStruct((N, C, 1), jnp.float32),
            jax.ShapeDtypeStruct((N, 2, HW), jnp.float32),
        ),
        grid_spec=pltpu.PrefetchScalarGridSpec(
            num_scalar_prefetch=0,
            grid=(N,),
            in_specs=[
                pl.BlockSpec((1, C, HW), lambda n: (n, 0, 0)),
                pl.BlockSpec((CR, C), lambda n: (0, 0)),
                pl.BlockSpec((C, CR), lambda n: (0, 0)),
            ],
            out_specs=(
                pl.BlockSpec((1, C, 1), lambda n: (n, 0, 0)),
                pl.BlockSpec((1, 2, HW), lambda n: (n, 0, 0)),
            ),
        ),
        compiler_params=pltpu.CompilerParams(dimension_semantics=("parallel",)),
    )(xf, w1m, w2m)

    # Zero-pad the tiny 2-channel stats map for the 'same' conv (glue, ~KB).
    stats_pad = jnp.pad(stats.reshape(N, 2, H, W), ((0, 0), (0, 0), (P, P), (P, P)))
    HP, WP = H + 2 * P, W + 2 * P

    # --- Kernel 2: spatial attention conv + sigmoid ---
    sa = pl.pallas_call(
        functools.partial(_spatial_attn_kernel, ks=KS, out_h=H, out_w=W),
        out_shape=jax.ShapeDtypeStruct((N, H, W), jnp.float32),
        grid_spec=pltpu.PrefetchScalarGridSpec(
            num_scalar_prefetch=0,
            grid=(N,),
            in_specs=[
                pl.BlockSpec((1, 2, HP, WP), lambda n: (n, 0, 0, 0)),
                pl.BlockSpec(memory_space=pltpu.MemorySpace.SMEM),
                pl.BlockSpec(memory_space=pltpu.MemorySpace.SMEM),
            ],
            out_specs=pl.BlockSpec((1, H, W), lambda n: (n, 0, 0)),
        ),
        compiler_params=pltpu.CompilerParams(dimension_semantics=("parallel",)),
    )(stats_pad, wsa_flat, bsa)

    saf = sa.reshape(N, 1, HW)

    # --- Kernel 3: out = (x * ca) * sa + x, one lane-dense pass ---
    out_f = pl.pallas_call(
        _apply_attn_kernel,
        out_shape=jax.ShapeDtypeStruct((N, C, HW), jnp.float32),
        grid_spec=pltpu.PrefetchScalarGridSpec(
            num_scalar_prefetch=0,
            grid=(N,),
            in_specs=[
                pl.BlockSpec((1, C, HW), lambda n: (n, 0, 0)),
                pl.BlockSpec((1, C, 1), lambda n: (n, 0, 0)),
                pl.BlockSpec((1, 1, HW), lambda n: (n, 0, 0)),
            ],
            out_specs=pl.BlockSpec((1, C, HW), lambda n: (n, 0, 0)),
        ),
        compiler_params=pltpu.CompilerParams(dimension_semantics=("parallel",)),
    )(xf, ca, saf)

    return out_f.reshape(N, C, H, W)


# ------------------------- Pure-JAX reference -------------------------

def cbam_reference(x, ca_w1, ca_w2, sa_w, sa_b, *, sa_kernel_size=7):
    N, C, H, W = x.shape
    CR = ca_w1.shape[0]
    KS = sa_kernel_size
    w1m = ca_w1.reshape(CR, C)
    w2m = ca_w2.reshape(C, CR)

    mx = jnp.max(x, axis=(2, 3))                              # (N, C)
    av = jnp.mean(x, axis=(2, 3))                             # (N, C)

    def mlp(v):                                               # (N, C) -> (N, C)
        h = jnp.maximum(v @ w1m.T, 0.0)
        return h @ w2m.T

    ca = jax.nn.sigmoid(mlp(mx) + mlp(av))[:, :, None, None]  # (N, C, 1, 1)
    o1 = x * ca

    smax = jnp.max(o1, axis=1, keepdims=True)
    smean = jnp.mean(o1, axis=1, keepdims=True)
    smap = jnp.concatenate([smax, smean], axis=1)             # (N, 2, H, W)
    conv = lax.conv_general_dilated(
        smap, sa_w, window_strides=(1, 1),
        padding=[(KS // 2, KS // 2), (KS // 2, KS // 2)],
        dimension_numbers=("NCHW", "OIHW", "NCHW"),
    ) + sa_b.reshape(1, 1, 1, 1)
    sa = jax.nn.sigmoid(conv)                                 # (N, 1, H, W)
    return o1 * sa + x


# ------------------------- Main -------------------------

if __name__ == "__main__":
    key = jax.random.PRNGKey(0)
    # Small shapes consistent with CBAMBlock: channel must be >= reduction.
    N, C, H, W = 2, 128, 16, 16
    reduction = 16
    CR = C // reduction
    # SpatialAttention's own default kernel size (7). The wrapper handles any
    # odd size; CBAMBlock's default 49 would just unroll 4802 taps.
    KS = 7

    k_x, k_w1, k_w2, k_ws, k_bs = jax.random.split(key, 5)
    x = jax.random.normal(k_x, (N, C, H, W), dtype=jnp.float32)
    # Deterministic small random init (init_weights is not part of forward).
    ca_w1 = 0.1 * jax.random.normal(k_w1, (CR, C, 1, 1), jnp.float32)
    ca_w2 = 0.1 * jax.random.normal(k_w2, (C, CR, 1, 1), jnp.float32)
    sa_w = 0.1 * jax.random.normal(k_ws, (1, 2, KS, KS), jnp.float32)
    sa_b = jax.random.uniform(k_bs, (1,), jnp.float32, -0.1, 0.1)

    cbam = jax.jit(functools.partial(cbam_forward, sa_kernel_size=KS))
    out = jax.block_until_ready(cbam(x, ca_w1, ca_w2, sa_w, sa_b))

    ref = cbam_reference(x, ca_w1, ca_w2, sa_w, sa_b, sa_kernel_size=KS)
    assert out.shape == x.shape
    max_err = float(jnp.max(jnp.abs(out - ref)))
    # Tolerance covers MXU-vs-XLA f32 dot / transcendental differences on HW.
    assert max_err < 1e-3, f"max abs error {max_err}"

    print("KERNEL_OK")
</pallas_src>

<mosaic_0001>
module attributes {stable_mosaic.version = 11 : i64} {
  func.func @_ca_and_stats_kernel(%arg0: i32, %arg1: memref<1x128x256xf32, #tpu.memory_space<vmem>>, %arg2: memref<8x128xf32, #tpu.memory_space<vmem>>, %arg3: memref<128x8xf32, #tpu.memory_space<vmem>>, %arg4: memref<1x128x1xf32, #tpu.memory_space<vmem>>, %arg5: memref<1x2x256xf32, #tpu.memory_space<vmem>>) attributes {dimension_semantics = [#tpu.dimension_semantics<parallel>], iteration_bounds = array<i64: 2>, scalar_prefetch = 0 : i64, scratch_operands = 0 : i64, tpu.core_type = #tpu.core_type<tc>, window_params = [{transform_indices = @transform_0, window_bounds = array<i64: 1, 128, 256>}, {pipeline_mode = #tpu.pipeline_mode<synchronous>, transform_indices = @transform_1, window_bounds = array<i64: 8, 128>}, {pipeline_mode = #tpu.pipeline_mode<synchronous>, transform_indices = @transform_2, window_bounds = array<i64: 128, 8>}, {transform_indices = @transform_3, window_bounds = array<i64: 1, 128, 1>}, {transform_indices = @transform_4, window_bounds = array<i64: 1, 2, 256>}]} {
    %c0 = arith.constant 0 : index
    %c0_0 = arith.constant 0 : index
    %c0_1 = arith.constant 0 : index
    %0 = vector.load %arg1[%c0, %c0_0, %c0_1] : memref<1x128x256xf32, #tpu.memory_space<vmem>>, vector<1x128x256xf32>
    %1 = vector.shape_cast %0 : vector<1x128x256xf32> to vector<128x256xf32>
    %cst = arith.constant dense<0xFF800000> : vector<128xf32>
    %2 = vector.multi_reduction <maximumf>, %1, %cst [1] : vector<128x256xf32> to vector<128xf32>
    %3 = vector.shape_cast %2 : vector<128xf32> to vector<128x1xf32>
    %cst_2 = arith.constant dense<0.000000e+00> : vector<128xf32>
    %4 = vector.multi_reduction <add>, %1, %cst_2 [1] : vector<128x256xf32> to vector<128xf32>
    %5 = vector.shape_cast %4 : vector<128xf32> to vector<128x1xf32>
    %cst_3 = arith.constant 3.906250e-03 : f32
    %6 = vector.broadcast %cst_3 : f32 to vector<128x1xf32>
    %7 = arith.mulf %5, %6 : vector<128x1xf32>
    %c0_4 = arith.constant 0 : index
    %c0_5 = arith.constant 0 : index
    %8 = vector.load %arg2[%c0_4, %c0_5] : memref<8x128xf32, #tpu.memory_space<vmem>>, vector<8x128xf32>
    %c0_6 = arith.constant 0 : index
    %c0_7 = arith.constant 0 : index
    %9 = vector.load %arg3[%c0_6, %c0_7] : memref<128x8xf32, #tpu.memory_space<vmem>>, vector<128x8xf32>
    %cst_8 = arith.constant dense<0.000000e+00> : vector<8x1xf32>
    %10 = tpu.matmul %8, %3, %cst_8 {dimension_numbers = #tpu.dot_dimension_numbers<[1], [0], [0], [1], [0, 0, 1, 1], [], []>} : vector<8x128xf32>, vector<128x1xf32>, vector<8x1xf32> -> vector<8x1xf32>
    %cst_9 = arith.constant 0.000000e+00 : f32
    %11 = vector.broadcast %cst_9 : f32 to vector<8x1xf32>
    %12 = arith.maximumf %10, %11 : vector<8x1xf32>
    %cst_10 = arith.constant dense<0.000000e+00> : vector<128x1xf32>
    %13 = tpu.matmul %9, %12, %cst_10 {dimension_numbers = #tpu.dot_dimension_numbers<[1], [0], [0], [1], [0, 0, 1, 1], [], []>} : vector<128x8xf32>, vector<8x1xf32>, vector<128x1xf32> -> vector<128x1xf32>
    %cst_11 = arith.constant dense<0.000000e+00> : vector<8x1xf32>
    %14 = tpu.matmul %8, %7, %cst_11 {dimension_numbers = #tpu.dot_dimension_numbers<[1], [0], [0], [1], [0, 0, 1, 1], [], []>} : vector<8x128xf32>, vector<128x1xf32>, vector<8x1xf32> -> vector<8x1xf32>
    %cst_12 = arith.constant 0.000000e+00 : f32
    %15 = vector.broadcast %cst_12 : f32 to vector<8x1xf32>
    %16 = arith.maximumf %14, %15 : vector<8x1xf32>
    %cst_13 = arith.constant dense<0.000000e+00> : vector<128x1xf32>
    %17 = tpu.matmul %9, %16, %cst_13 {dimension_numbers = #tpu.dot_dimension_numbers<[1], [0], [0], [1], [0, 0, 1, 1], [], []>} : vector<128x8xf32>, vector<8x1xf32>, vector<128x1xf32> -> vector<128x1xf32>
    %18 = arith.addf %13, %17 : vector<128x1xf32>
    %19 = arith.negf %18 : vector<128x1xf32>
    %20 = math.exp %19 : vector<128x1xf32>
    %cst_14 = arith.constant 1.000000e+00 : f32
    %21 = vector.broadcast %cst_14 : f32 to vector<128x1xf32>
    %22 = arith.addf %21, %20 : vector<128x1xf32>
    %23 = arith.divf %21, %22 : vector<128x1xf32>
    %c0_15 = arith.constant 0 : index
    %c0_16 = arith.constant 0 : index
    %c0_17 = arith.constant 0 : index
    %24 = vector.load %arg4[%c0_15, %c0_16, %c0_17] : memref<1x128x1xf32, #tpu.memory_space<vmem>>, vector<1x128x1xf32>
    %25 = vector.shape_cast %24 : vector<1x128x1xf32> to vector<128x1xf32>
    %26 = vector.shape_cast %23 : vector<128x1xf32> to vector<1x128x1xf32>
    tpu.vector_store %arg4[%c0_15, %c0_16, %c0_17], %26 {strides = array<i32>} : memref<1x128x1xf32, #tpu.memory_space<vmem>>, vector<1x128x1xf32>,
    %27 = vector.broadcast %23 : vector<128x1xf32> to vector<128x256xf32>
    %28 = arith.mulf %1, %27 : vector<128x256xf32>
    %cst_18 = arith.constant dense<0xFF800000> : vector<256xf32>
    %29 = vector.multi_reduction <maximumf>, %28, %cst_18 [0] : vector<128x256xf32> to vector<256xf32>
    %30 = vector.shape_cast %29 : vector<256xf32> to vector<1x256xf32>
    %cst_19 = arith.constant dense<0.000000e+00> : vector<256xf32>
    %31 = vector.multi_reduction <add>, %28, %cst_19 [0] : vector<128x256xf32> to vector<256xf32>
    %32 = vector.shape_cast %31 : vector<256xf32> to vector<1x256xf32>
    %cst_20 = arith.constant 7.812500e-03 : f32
    %33 = vector.broadcast %cst_20 : f32 to vector<1x256xf32>
    %34 = arith.mulf %32, %33 : vector<1x256xf32>
    %35 = tpu.concatenate %30, %34 in 0 : vector<1x256xf32>, vector<1x256xf32> -> vector<2x256xf32>
    %c0_21 = arith.constant 0 : index
    %c0_22 = arith.constant 0 : index
    %c0_23 = arith.constant 0 : index
    %36 = vector.load %arg5[%c0_21, %c0_22, %c0_23] : memref<1x2x256xf32, #tpu.memory_space<vmem>>, vector<1x2x256xf32>
    %37 = vector.shape_cast %36 : vector<1x2x256xf32> to vector<2x256xf32>
    %38 = vector.shape_cast %35 : vector<2x256xf32> to vector<1x2x256xf32>
    tpu.vector_store %arg5[%c0_21, %c0_22, %c0_23], %38 {strides = array<i32>} : memref<1x2x256xf32, #tpu.memory_space<vmem>>, vector<1x2x256xf32>,
    return
  }
  func.func @transform_0(%arg0: i32) -> (i32, i32, i32) {
    %c0_i32 = arith.constant 0 : i32
    %c0_i32_0 = arith.constant 0 : i32
    %c0_i32_1 = arith.constant 0 : i32
    return %arg0, %c0_i32, %c0_i32_0 : i32, i32, i32
  }
  func.func @transform_1(%arg0: i32) -> (i32, i32) {
    %c0_i32 = arith.constant 0 : i32
    %c0_i32_0 = arith.constant 0 : i32
    %c0_i32_1 = arith.constant 0 : i32
    return %c0_i32, %c0_i32_0 : i32, i32
  }
  func.func @transform_2(%arg0: i32) -> (i32, i32) {
    %c0_i32 = arith.constant 0 : i32
    %c0_i32_0 = arith.constant 0 : i32
    %c0_i32_1 = arith.constant 0 : i32
    return %c0_i32, %c0_i32_0 : i32, i32
  }
  func.func @transform_3(%arg0: i32) -> (i32, i32, i32) {
    %c0_i32 = arith.constant 0 : i32
    %c0_i32_0 = arith.constant 0 : i32
    %c0_i32_1 = arith.constant 0 : i32
    return %arg0, %c0_i32, %c0_i32_0 : i32, i32, i32
  }
  func.func @transform_4(%arg0: i32) -> (i32, i32, i32) {
    %c0_i32 = arith.constant 0 : i32
    %c0_i32_0 = arith.constant 0 : i32
    %c0_i32_1 = arith.constant 0 : i32
    return %arg0, %c0_i32, %c0_i32_0 : i32, i32, i32
  }
}

module attributes {stable_mosaic.version = 11 : i64} {
  func.func @_spatial_attn_kernel(%arg0: i32, %arg1: memref<1x2x22x22xf32, #tpu.memory_space<vmem>>, %arg2: memref<98xf32, #tpu.memory_space<smem>>, %arg3: memref<1xf32, #tpu.memory_space<smem>>, %arg4: memref<1x16x16xf32, #tpu.memory_space<vmem>>) attributes {dimension_semantics = [#tpu.dimension_semantics<parallel>], iteration_bounds = array<i64: 2>, scalar_prefetch = 0 : i64, scratch_operands = 0 : i64, tpu.core_type = #tpu.core_type<tc>, window_params = [{transform_indices = @transform_0, window_bounds = array<i64: 1, 2, 22, 22>}, {transform_indices = @transform_1, window_bounds = array<i64: 98>}, {transform_indices = @transform_2, window_bounds = array<i64: 1>}, {transform_indices = @transform_3, window_bounds = array<i64: 1, 16, 16>}]} {
    %c0 = arith.constant 0 : index
    %c0_0 = arith.constant 0 : index
    %c0_1 = arith.constant 0 : index
    %c0_2 = arith.constant 0 : index
    %0 = vector.load %arg1[%c0, %c0_0, %c0_1, %c0_2] : memref<1x2x22x22xf32, #tpu.memory_space<vmem>>, vector<1x2x22x22xf32>
    %1 = vector.shape_cast %0 : vector<1x2x22x22xf32> to vector<2x22x22xf32>
    %c0_3 = arith.constant 0 : index
    %2 = memref.load %arg3[%c0_3] : memref<1xf32, #tpu.memory_space<smem>>
    %3 = vector.broadcast %2 : f32 to vector<16x16xf32>
    %c0_4 = arith.constant 0 : index
    %4 = memref.load %arg2[%c0_4] : memref<98xf32, #tpu.memory_space<smem>>
    %5 = vector.extract_strided_slice %1 {offsets = [0, 0, 0], sizes = [1, 16, 16], strides = [1, 1, 1]} : vector<2x22x22xf32> to vector<1x16x16xf32>
    %6 = vector.shape_cast %5 : vector<1x16x16xf32> to vector<16x16xf32>
    %7 = vector.broadcast %4 : f32 to vector<16x16xf32>
    %8 = arith.mulf %7, %6 : vector<16x16xf32>
    %9 = arith.addf %3, %8 : vector<16x16xf32>
    %c1 = arith.constant 1 : index
    %10 = memref.load %arg2[%c1] : memref<98xf32, #tpu.memory_space<smem>>
    %11 = vector.extract_strided_slice %1 {offsets = [0, 0, 1], sizes = [1, 16, 16], strides = [1, 1, 1]} : vector<2x22x22xf32> to vector<1x16x16xf32>
    %12 = vector.shape_cast %11 : vector<1x16x16xf32> to vector<16x16xf32>
    %13 = vector.broadcast %10 : f32 to vector<16x16xf32>
    %14 = arith.mulf %13, %12 : vector<16x16xf32>
    %15 = arith.addf %9, %14 : vector<16x16xf32>
    %c2 = arith.constant 2 : index
    %16 = memref.load %arg2[%c2] : memref<98xf32, #tpu.memory_space<smem>>
    %17 = vector.extract_strided_slice %1 {offsets = [0, 0, 2], sizes = [1, 16, 16], strides = [1, 1, 1]} : vector<2x22x22xf32> to vector<1x16x16xf32>
    %18 = vector.shape_cast %17 : vector<1x16x16xf32> to vector<16x16xf32>
    %19 = vector.broadcast %16 : f32 to vector<16x16xf32>
    %20 = arith.mulf %19, %18 : vector<16x16xf32>
    %21 = arith.addf %15, %20 : vector<16x16xf32>
    %c3 = arith.constant 3 : index
    %22 = memref.load %arg2[%c3] : memref<98xf32, #tpu.memory_space<smem>>
    %23 = vector.extract_strided_slice %1 {offsets = [0, 0, 3], sizes = [1, 16, 16], strides = [1, 1, 1]} : vector<2x22x22xf32> to vector<1x16x16xf32>
    %24 = vector.shape_cast %23 : vector<1x16x16xf32> to vector<16x16xf32>
    %25 = vector.broadcast %22 : f32 to vector<16x16xf32>
    %26 = arith.mulf %25, %24 : vector<16x16xf32>
    %27 = arith.addf %21, %26 : vector<16x16xf32>
    %c4 = arith.constant 4 : index
    %28 = memref.load %arg2[%c4] : memref<98xf32, #tpu.memory_space<smem>>
    %29 = vector.extract_strided_slice %1 {offsets = [0, 0, 4], sizes = [1, 16, 16], strides = [1, 1, 1]} : vector<2x22x22xf32> to vector<1x16x16xf32>
    %30 = vector.shape_cast %29 : vector<1x16x16xf32> to vector<16x16xf32>
    %31 = vector.broadcast %28 : f32 to vector<16x16xf32>
    %32 = arith.mulf %31, %30 : vector<16x16xf32>
    %33 = arith.addf %27, %32 : vector<16x16xf32>
    %c5 = arith.constant 5 : index
    %34 = memref.load %arg2[%c5] : memref<98xf32, #tpu.memory_space<smem>>
    %35 = vector.extract_strided_slice %1 {offsets = [0, 0, 5], sizes = [1, 16, 16], strides = [1, 1, 1]} : vector<2x22x22xf32> to vector<1x16x16xf32>
    %36 = vector.shape_cast %35 : vector<1x16x16xf32> to vector<16x16xf32>
    %37 = vector.broadcast %34 : f32 to vector<16x16xf32>
    %38 = arith.mulf %37, %36 : vector<16x16xf32>
    %39 = arith.addf %33, %38 : vector<16x16xf32>
    %c6 = arith.constant 6 : index
    %40 = memref.load %arg2[%c6] : memref<98xf32, #tpu.memory_space<smem>>
    %41 = vector.extract_strided_slice %1 {offsets = [0, 0, 6], sizes = [1, 16, 16], strides = [1, 1, 1]} : vector<2x22x22xf32> to vector<1x16x16xf32>
    %42 = vector.shape_cast %41 : vector<1x16x16xf32> to vector<16x16xf32>
    %43 = vector.broadcast %40 : f32 to vector<16x16xf32>
    %44 = arith.mulf %43, %42 : vector<16x16xf32>
    %45 = arith.addf %39, %44 : vector<16x16xf32>
    %c7 = arith.constant 7 : index
    %46 = memref.load %arg2[%c7] : memref<98xf32, #tpu.memory_space<smem>>
    %47 = vector.extract_strided_slice %1 {offsets = [0, 1, 0], sizes = [1, 16, 16], strides = [1, 1, 1]} : vector<2x22x22xf32> to vector<1x16x16xf32>
    %48 = vector.shape_cast %47 : vector<1x16x16xf32> to vector<16x16xf32>
    %49 = vector.broadcast %46 : f32 to vector<16x16xf32>
    %50 = arith.mulf %49, %48 : vector<16x16xf32>
    %51 = arith.addf %45, %50 : vector<16x16xf32>
    %c8 = arith.constant 8 : index
    %52 = memref.load %arg2[%c8] : memref<98xf32, #tpu.memory_space<smem>>
    %53 = vector.extract_strided_slice %1 {offsets = [0, 1, 1], sizes = [1, 16, 16], strides = [1, 1, 1]} : vector<2x22x22xf32> to vector<1x16x16xf32>
    %54 = vector.shape_cast %53 : vector<1x16x16xf32> to vector<16x16xf32>
    %55 = vector.broadcast %52 : f32 to vector<16x16xf32>
    %56 = arith.mulf %55, %54 : vector<16x16xf32>
    %57 = arith.addf %51, %56 : vector<16x16xf32>
    %c9 = arith.constant 9 : index
    %58 = memref.load %arg2[%c9] : memref<98xf32, #tpu.memory_space<smem>>
    %59 = vector.extract_strided_slice %1 {offsets = [0, 1, 2], sizes = [1, 16, 16], strides = [1, 1, 1]} : vector<2x22x22xf32> to vector<1x16x16xf32>
    %60 = vector.shape_cast %59 : vector<1x16x16xf32> to vector<16x16xf32>
    %61 = vector.broadcast %58 : f32 to vector<16x16xf32>
    %62 = arith.mulf %61, %60 : vector<16x16xf32>
    %63 = arith.addf %57, %62 : vector<16x16xf32>
    %c10 = arith.constant 10 : index
    %64 = memref.load %arg2[%c10] : memref<98xf32, #tpu.memory_space<smem>>
    %65 = vector.extract_strided_slice %1 {offsets = [0, 1, 3], sizes = [1, 16, 16], strides = [1, 1, 1]} : vector<2x22x22xf32> to vector<1x16x16xf32>
    %66 = vector.shape_cast %65 : vector<1x16x16xf32> to vector<16x16xf32>
    %67 = vector.broadcast %64 : f32 to vector<16x16xf32>
    %68 = arith.mulf %67, %66 : vector<16x16xf32>
    %69 = arith.addf %63, %68 : vector<16x16xf32>
    %c11 = arith.constant 11 : index
    %70 = memref.load %arg2[%c11] : memref<98xf32, #tpu.memory_space<smem>>
    %71 = vector.extract_strided_slice %1 {offsets = [0, 1, 4], sizes = [1, 16, 16], strides = [1, 1, 1]} : vector<2x22x22xf32> to vector<1x16x16xf32>
    %72 = vector.shape_cast %71 : vector<1x16x16xf32> to vector<16x16xf32>
    %73 = vector.broadcast %70 : f32 to vector<16x16xf32>
    %74 = arith.mulf %73, %72 : vector<16x16xf32>
    %75 = arith.addf %69, %74 : vector<16x16xf32>
    %c12 = arith.constant 12 : index
    %76 = memref.load %arg2[%c12] : memref<98xf32, #tpu.memory_space<smem>>
    %77 = vector.extract_strided_slice %1 {offsets = [0, 1, 5], sizes = [1, 16, 16], strides = [1, 1, 1]} : vector<2x22x22xf32> to vector<1x16x16xf32>
    %78 = vector.shape_cast %77 : vector<1x16x16xf32> to vector<16x16xf32>
    %79 = vector.broadcast %76 : f32 to vector<16x16xf32>
    %80 = arith.mulf %79, %78 : vector<16x16xf32>
    %81 = arith.addf %75, %80 : vector<16x16xf32>
    %c13 = arith.constant 13 : index
    %82 = memref.load %arg2[%c13] : memref<98xf32, #tpu.memory_space<smem>>
    %83 = vector.extract_strided_slice %1 {offsets = [0, 1, 6], sizes = [1, 16, 16], strides = [1, 1, 1]} : vector<2x22x22xf32> to vector<1x16x16xf32>
    %84 = vector.shape_cast %83 : vector<1x16x16xf32> to vector<16x16xf32>
    %85 = vector.broadcast %82 : f32 to vector<16x16xf32>
    %86 = arith.mulf %85, %84 : vector<16x16xf32>
    %87 = arith.addf %81, %86 : vector<16x16xf32>
    %c14 = arith.constant 14 : index
    %88 = memref.load %arg2[%c14] : memref<98xf32, #tpu.memory_space<smem>>
    %89 = vector.extract_strided_slice %1 {offsets = [0, 2, 0], sizes = [1, 16, 16], strides = [1, 1, 1]} : vector<2x22x22xf32> to vector<1x16x16xf32>
    %90 = vector.shape_cast %89 : vector<1x16x16xf32> to vector<16x16xf32>
    %91 = vector.broadcast %88 : f32 to vector<16x16xf32>
    %92 = arith.mulf %91, %90 : vector<16x16xf32>
    %93 = arith.addf %87, %92 : vector<16x16xf32>
    %c15 = arith.constant 15 : index
    %94 = memref.load %arg2[%c15] : memref<98xf32, #tpu.memory_space<smem>>
    %95 = vector.extract_strided_slice %1 {offsets = [0, 2, 1], sizes = [1, 16, 16], strides = [1, 1, 1]} : vector<2x22x22xf32> to vector<1x16x16xf32>
    %96 = vector.shape_cast %95 : vector<1x16x16xf32> to vector<16x16xf32>
    %97 = vector.broadcast %94 : f32 to vector<16x16xf32>
    %98 = arith.mulf %97, %96 : vector<16x16xf32>
    %99 = arith.addf %93, %98 : vector<16x16xf32>
    %c16 = arith.constant 16 : index
    %100 = memref.load %arg2[%c16] : memref<98xf32, #tpu.memory_space<smem>>
    %101 = vector.extract_strided_slice %1 {offsets = [0, 2, 2], sizes = [1, 16, 16], strides = [1, 1, 1]} : vector<2x22x22xf32> to vector<1x16x16xf32>
    %102 = vector.shape_cast %101 : vector<1x16x16xf32> to vector<16x16xf32>
    %103 = vector.broadcast %100 : f32 to vector<16x16xf32>
    %104 = arith.mulf %103, %102 : vector<16x16xf32>
    %105 = arith.addf %99, %104 : vector<16x16xf32>
    %c17 = arith.constant 17 : index
    %106 = memref.load %arg2[%c17] : memref<98xf32, #tpu.memory_space<smem>>
    %107 = vector.extract_strided_slice %1 {offsets = [0, 2, 3], sizes = [1, 16, 16], strides = [1, 1, 1]} : vector<2x22x22xf32> to vector<1x16x16xf32>
    %108 = vector.shape_cast %107 : vector<1x16x16xf32> to vector<16x16xf32>
    %109 = vector.broadcast %106 : f32 to vector<16x16xf32>
    %110 = arith.mulf %109, %108 : vector<16x16xf32>
    %111 = arith.addf %105, %110 : vector<16x16xf32>
    %c18 = arith.constant 18 : index
    %112 = memref.load %arg2[%c18] : memref<98xf32, #tpu.memory_space<smem>>
    %113 = vector.extract_strided_slice %1 {offsets = [0, 2, 4], sizes = [1, 16, 16], strides = [1, 1, 1]} : vector<2x22x22xf32> to vector<1x16x16xf32>
    %114 = vector.shape_cast %113 : vector<1x16x16xf32> to vector<16x16xf32>
    %115 = vector.broadcast %112 : f32 to vector<16x16xf32>
    %116 = arith.mulf %115, %114 : vector<16x16xf32>
    %117 = arith.addf %111, %116 : vector<16x16xf32>
    %c19 = arith.constant 19 : index
    %118 = memref.load %arg2[%c19] : memref<98xf32, #tpu.memory_space<smem>>
    %119 = vector.extract_strided_slice %1 {offsets = [0, 2, 5], sizes = [1, 16, 16], strides = [1, 1, 1]} : vector<2x22x22xf32> to vector<1x16x16xf32>
    %120 = vector.shape_cast %119 : vector<1x16x16xf32> to vector<16x16xf32>
    %121 = vector.broadcast %118 : f32 to vector<16x16xf32>
    %122 = arith.mulf %121, %120 : vector<16x16xf32>
    %123 = arith.addf %117, %122 : vector<16x16xf32>
    %c20 = arith.constant 20 : index
    %124 = memref.load %arg2[%c20] : memref<98xf32, #tpu.memory_space<smem>>
    %125 = vector.extract_strided_slice %1 {offsets = [0, 2, 6], sizes = [1, 16, 16], strides = [1, 1, 1]} : vector<2x22x22xf32> to vector<1x16x16xf32>
    %126 = vector.shape_cast %125 : vector<1x16x16xf32> to vector<16x16xf32>
    %127 = vector.broadcast %124 : f32 to vector<16x16xf32>
    %128 = arith.mulf %127, %126 : vector<16x16xf32>
    %129 = arith.addf %123, %128 : vector<16x16xf32>
    %c21 = arith.constant 21 : index
    %130 = memref.load %arg2[%c21] : memref<98xf32, #tpu.memory_space<smem>>
    %131 = vector.extract_strided_slice %1 {offsets = [0, 3, 0], sizes = [1, 16, 16], strides = [1, 1, 1]} : vector<2x22x22xf32> to vector<1x16x16xf32>
    %132 = vector.shape_cast %131 : vector<1x16x16xf32> to vector<16x16xf32>
    %133 = vector.broadcast %130 : f32 to vector<16x16xf32>
    %134 = arith.mulf %133, %132 : vector<16x16xf32>
    %135 = arith.addf %129, %134 : vector<16x16xf32>
    %c22 = arith.constant 22 : index
    %136 = memref.load %arg2[%c22] : memref<98xf32, #tpu.memory_space<smem>>
    %137 = vector.extract_strided_slice %1 {offsets = [0, 3, 1], sizes = [1, 16, 16], strides = [1, 1, 1]} : vector<2x22x22xf32> to vector<1x16x16xf32>
    %138 = vector.shape_cast %137 : vector<1x16x16xf32> to vector<16x16xf32>
    %139 = vector.broadcast %136 : f32 to vector<16x16xf32>
    %140 = arith.mulf %139, %138 : vector<16x16xf32>
    %141 = arith.addf %135, %140 : vector<16x16xf32>
    %c23 = arith.constant 23 : index
    %142 = memref.load %arg2[%c23] : memref<98xf32, #tpu.memory_space<smem>>
    %143 = vector.extract_strided_slice %1 {offsets = [0, 3, 2], sizes = [1, 16, 16], strides = [1, 1, 1]} : vector<2x22x22xf32> to vector<1x16x16xf32>
    %144 = vector.shape_cast %143 : vector<1x16x16xf32> to vector<16x16xf32>
    %145 = vector.broadcast %142 : f32 to vector<16x16xf32>
    %146 = arith.mulf %145, %144 : vector<16x16xf32>
    %147 = arith.addf %141, %146 : vector<16x16xf32>
    %c24 = arith.constant 24 : index
    %148 = memref.load %arg2[%c24] : memref<98xf32, #tpu.memory_space<smem>>
    %149 = vector.extract_strided_slice %1 {offsets = [0, 3, 3], sizes = [1, 16, 16], strides = [1, 1, 1]} : vector<2x22x22xf32> to vector<1x16x16xf32>
    %150 = vector.shape_cast %149 : vector<1x16x16xf32> to vector<16x16xf32>
    %151 = vector.broadcast %148 : f32 to vector<16x16xf32>
    %152 = arith.mulf %151, %150 : vector<16x16xf32>
    %153 = arith.addf %147, %152 : vector<16x16xf32>
    %c25 = arith.constant 25 : index
    %154 = memref.load %arg2[%c25] : memref<98xf32, #tpu.memory_space<smem>>
    %155 = vector.extract_strided_slice %1 {offsets = [0, 3, 4], sizes = [1, 16, 16], strides = [1, 1, 1]} : vector<2x22x22xf32> to vector<1x16x16xf32>
    %156 = vector.shape_cast %155 : vector<1x16x16xf32> to vector<16x16xf32>
    %157 = vector.broadcast %154 : f32 to vector<16x16xf32>
    %158 = arith.mulf %157, %156 : vector<16x16xf32>
    %159 = arith.addf %153, %158 : vector<16x16xf32>
    %c26 = arith.constant 26 : index
    %160 = memref.load %arg2[%c26] : memref<98xf32, #tpu.memory_space<smem>>
    %161 = vector.extract_strided_slice %1 {offsets = [0, 3, 5], sizes = [1, 16, 16], strides = [1, 1, 1]} : vector<2x22x22xf32> to vector<1x16x16xf32>
    %162 = vector.shape_cast %161 : vector<1x16x16xf32> to vector<16x16xf32>
    %163 = vector.broadcast %160 : f32 to vector<16x16xf32>
    %164 = arith.mulf %163, %162 : vector<16x16xf32>
    %165 = arith.addf %159, %164 : vector<16x16xf32>
    %c27 = arith.constant 27 : index
    %166 = memref.load %arg2[%c27] : memref<98xf32, #tpu.memory_space<smem>>
    %167 = vector.extract_strided_slice %1 {offsets = [0, 3, 6], sizes = [1, 16, 16], strides = [1, 1, 1]} : vector<2x22x22xf32> to vector<1x16x16xf32>
    %168 = vector.shape_cast %167 : vector<1x16x16xf32> to vector<16x16xf32>
    %169 = vector.broadcast %166 : f32 to vector<16x16xf32>
    %170 = arith.mulf %169, %168 : vector<16x16xf32>
    %171 = arith.addf %165, %170 : vector<16x16xf32>
    %c28 = arith.constant 28 : index
    %172 = memref.load %arg2[%c28] : memref<98xf32, #tpu.memory_space<smem>>
    %173 = vector.extract_strided_slice %1 {offsets = [0, 4, 0], sizes = [1, 16, 16], strides = [1, 1, 1]} : vector<2x22x22xf32> to vector<1x16x16xf32>
    %174 = vector.shape_cast %173 : vector<1x16x16xf32> to vector<16x16xf32>
    %175 = vector.broadcast %172 : f32 to vector<16x16xf32>
    %176 = arith.mulf %175, %174 : vector<16x16xf32>
    %177 = arith.addf %171, %176 : vector<16x16xf32>
    %c29 = arith.constant 29 : index
    %178 = memref.load %arg2[%c29] : memref<98xf32, #tpu.memory_space<smem>>
    %179 = vector.extract_strided_slice %1 {offsets = [0, 4, 1], sizes = [1, 16, 16], strides = [1, 1, 1]} : vector<2x22x22xf32> to vector<1x16x16xf32>
    %180 = vector.shape_cast %179 : vector<1x16x16xf32> to vector<16x16xf32>
    %181 = vector.broadcast %178 : f32 to vector<16x16xf32>
    %182 = arith.mulf %181, %180 : vector<16x16xf32>
    %183 = arith.addf %177, %182 : vector<16x16xf32>
    %c30 = arith.constant 30 : index
    %184 = memref.load %arg2[%c30] : memref<98xf32, #tpu.memory_space<smem>>
    %185 = vector.extract_strided_slice %1 {offsets = [0, 4, 2], sizes = [1, 16, 16], strides = [1, 1, 1]} : vector<2x22x22xf32> to vector<1x16x16xf32>
    %186 = vector.shape_cast %185 : vector<1x16x16xf32> to vector<16x16xf32>
    %187 = vector.broadcast %184 : f32 to vector<16x16xf32>
    %188 = arith.mulf %187, %186 : vector<16x16xf32>
    %189 = arith.addf %183, %188 : vector<16x16xf32>
    %c31 = arith.constant 31 : index
    %190 = memref.load %arg2[%c31] : memref<98xf32, #tpu.memory_space<smem>>
    %191 = vector.extract_strided_slice %1 {offsets = [0, 4, 3], sizes = [1, 16, 16], strides = [1, 1, 1]} : vector<2x22x22xf32> to vector<1x16x16xf32>
    %192 = vector.shape_cast %191 : vector<1x16x16xf32> to vector<16x16xf32>
    %193 = vector.broadcast %190 : f32 to vector<16x16xf32>
    %194 = arith.mulf %193, %192 : vector<16x16xf32>
    %195 = arith.addf %189, %194 : vector<16x16xf32>
    %c32 = arith.constant 32 : index
    %196 = memref.load %arg2[%c32] : memref<98xf32, #tpu.memory_space<smem>>
    %197 = vector.extract_strided_slice %1 {offsets = [0, 4, 4], sizes = [1, 16, 16], strides = [1, 1, 1]} : vector<2x22x22xf32> to vector<1x16x16xf32>
    %198 = vector.shape_cast %197 : vector<1x16x16xf32> to vector<16x16xf32>
    %199 = vector.broadcast %196 : f32 to vector<16x16xf32>
    %200 = arith.mulf %199, %198 : vector<16x16xf32>
    %201 = arith.addf %195, %200 : vector<16x16xf32>
    %c33 = arith.constant 33 : index
    %202 = memref.load %arg2[%c33] : memref<98xf32, #tpu.memory_space<smem>>
    %203 = vector.extract_strided_slice %1 {offsets = [0, 4, 5], sizes = [1, 16, 16], strides = [1, 1, 1]} : vector<2x22x22xf32> to vector<1x16x16xf32>
    %204 = vector.shape_cast %203 : vector<1x16x16xf32> to vector<16x16xf32>
    %205 = vector.broadcast %202 : f32 to vector<16x16xf32>
    %206 = arith.mulf %205, %204 : vector<16x16xf32>
    %207 = arith.addf %201, %206 : vector<16x16xf32>
    %c34 = arith.constant 34 : index
    %208 = memref.load %arg2[%c34] : memref<98xf32, #tpu.memory_space<smem>>
    %209 = vector.extract_strided_slice %1 {offsets = [0, 4, 6], sizes = [1, 16, 16], strides = [1, 1, 1]} : vector<2x22x22xf32> to vector<1x16x16xf32>
    %210 = vector.shape_cast %209 : vector<1x16x16xf32> to vector<16x16xf32>
    %211 = vector.broadcast %208 : f32 to vector<16x16xf32>
    %212 = arith.mulf %211, %210 : vector<16x16xf32>
    %213 = arith.addf %207, %212 : vector<16x16xf32>
    %c35 = arith.constant 35 : index
    %214 = memref.load %arg2[%c35] : memref<98xf32, #tpu.memory_space<smem>>
    %215 = vector.extract_strided_slice %1 {offsets = [0, 5, 0], sizes = [1, 16, 16], strides = [1, 1, 1]} : vector<2x22x22xf32> to vector<1x16x16xf32>
    %216 = vector.shape_cast %215 : vector<1x16x16xf32> to vector<16x16xf32>
    %217 = vector.broadcast %214 : f32 to vector<16x16xf32>
    %218 = arith.mulf %217, %216 : vector<16x16xf32>
    %219 = arith.addf %213, %218 : vector<16x16xf32>
    %c36 = arith.constant 36 : index
    %220 = memref.load %arg2[%c36] : memref<98xf32, #tpu.memory_space<smem>>
    %221 = vector.extract_strided_slice %1 {offsets = [0, 5, 1], sizes = [1, 16, 16], strides = [1, 1, 1]} : vector<2x22x22xf32> to vector<1x16x16xf32>
    %222 = vector.shape_cast %221 : vector<1x16x16xf32> to vector<16x16xf32>
    %223 = vector.broadcast %220 : f32 to vector<16x16xf32>
    %224 = arith.mulf %223, %222 : vector<16x16xf32>
    %225 = arith.addf %219, %224 : vector<16x16xf32>
    %c37 = arith.constant 37 : index
    %226 = memref.load %arg2[%c37] : memref<98xf32, #tpu.memory_space<smem>>
    %227 = vector.extract_strided_slice %1 {offsets = [0, 5, 2], sizes = [1, 16, 16], strides = [1, 1, 1]} : vector<2x22x22xf32> to vector<1x16x16xf32>
    %228 = vector.shape_cast %227 : vector<1x16x16xf32> to vector<16x16xf32>
    %229 = vector.broadcast %226 : f32 to vector<16x16xf32>
    %230 = arith.mulf %229, %228 : vector<16x16xf32>
    %231 = arith.addf %225, %230 : vector<16x16xf32>
    %c38 = arith.constant 38 : index
    %232 = memref.load %arg2[%c38] : memref<98xf32, #tpu.memory_space<smem>>
    %233 = vector.extract_strided_slice %1 {offsets = [0, 5, 3], sizes = [1, 16, 16], strides = [1, 1, 1]} : vector<2x22x22xf32> to vector<1x16x16xf32>
    %234 = vector.shape_cast %233 : vector<1x16x16xf32> to vector<16x16xf32>
    %235 = vector.broadcast %232 : f32 to vector<16x16xf32>
    %236 = arith.mulf %235, %234 : vector<16x16xf32>
    %237 = arith.addf %231, %236 : vector<16x16xf32>
    %c39 = arith.constant 39 : index
    %238 = memref.load %arg2[%c39] : memref<98xf32, #tpu.memory_space<smem>>
    %239 = vector.extract_strided_slice %1 {offsets = [0, 5, 4], sizes = [1, 16, 16], strides = [1, 1, 1]} : vector<2x22x22xf32> to vector<1x16x16xf32>
    %240 = vector.shape_cast %239 : vector<1x16x16xf32> to vector<16x16xf32>
    %241 = vector.broadcast %238 : f32 to vector<16x16xf32>
    %242 = arith.mulf %241, %240 : vector<16x16xf32>
    %243 = arith.addf %237, %242 : vector<16x16xf32>
    %c40 = arith.constant 40 : index
    %244 = memref.load %arg2[%c40] : memref<98xf32, #tpu.memory_space<smem>>
    %245 = vector.extract_strided_slice %1 {offsets = [0, 5, 5], sizes = [1, 16, 16], strides = [1, 1, 1]} : vector<2x22x22xf32> to vector<1x16x16xf32>
    %246 = vector.shape_cast %245 : vector<1x16x16xf32> to vector<16x16xf32>
    %247 = vector.broadcast %244 : f32 to vector<16x16xf32>
    %248 = arith.mulf %247, %246 : vector<16x16xf32>
    %249 = arith.addf %243, %248 : vector<16x16xf32>
    %c41 = arith.constant 41 : index
    %250 = memref.load %arg2[%c41] : memref<98xf32, #tpu.memory_space<smem>>
    %251 = vector.extract_strided_slice %1 {offsets = [0, 5, 6], sizes = [1, 16, 16], strides = [1, 1, 1]} : vector<2x22x22xf32> to vector<1x16x16xf32>
    %252 = vector.shape_cast %251 : vector<1x16x16xf32> to vector<16x16xf32>
    %253 = vector.broadcast %250 : f32 to vector<16x16xf32>
    %254 = arith.mulf %253, %252 : vector<16x16xf32>
    %255 = arith.addf %249, %254 : vector<16x16xf32>
    %c42 = arith.constant 42 : index
    %256 = memref.load %arg2[%c42] : memref<98xf32, #tpu.memory_space<smem>>
    %257 = vector.extract_strided_slice %1 {offsets = [0, 6, 0], sizes = [1, 16, 16], strides = [1, 1, 1]} : vector<2x22x22xf32> to vector<1x16x16xf32>
    %258 = vector.shape_cast %257 : vector<1x16x16xf32> to vector<16x16xf32>
    %259 = vector.broadcast %256 : f32 to vector<16x16xf32>
    %260 = arith.mulf %259, %258 : vector<16x16xf32>
    %261 = arith.addf %255, %260 : vector<16x16xf32>
    %c43 = arith.constant 43 : index
    %262 = memref.load %arg2[%c43] : memref<98xf32, #tpu.memory_space<smem>>
    %263 = vector.extract_strided_slice %1 {offsets = [0, 6, 1], sizes = [1, 16, 16], strides = [1, 1, 1]} : vector<2x22x22xf32> to vector<1x16x16xf32>
    %264 = vector.shape_cast %263 : vector<1x16x16xf32> to vector<16x16xf32>
    %265 = vector.broadcast %262 : f32 to vector<16x16xf32>
    %266 = arith.mulf %265, %264 : vector<16x16xf32>
    %267 = arith.addf %261, %266 : vector<16x16xf32>
    %c44 = arith.constant 44 : index
    %268 = memref.load %arg2[%c44] : memref<98xf32, #tpu.memory_space<smem>>
    %269 = vector.extract_strided_slice %1 {offsets = [0, 6, 2], sizes = [1, 16, 16], strides = [1, 1, 1]} : vector<2x22x22xf32> to vector<1x16x16xf32>
    %270 = vector.shape_cast %269 : vector<1x16x16xf32> to vector<16x16xf32>
    %271 = vector.broadcast %268 : f32 to vector<16x16xf32>
    %272 = arith.mulf %271, %270 : vector<16x16xf32>
    %273 = arith.addf %267, %272 : vector<16x16xf32>
    %c45 = arith.constant 45 : index
    %274 = memref.load %arg2[%c45] : memref<98xf32, #tpu.memory_space<smem>>
    %275 = vector.extract_strided_slice %1 {offsets = [0, 6, 3], sizes = [1, 16, 16], strides = [1, 1, 1]} : vector<2x22x22xf32> to vector<1x16x16xf32>
    %276 = vector.shape_cast %275 : vector<1x16x16xf32> to vector<16x16xf32>
    %277 = vector.broadcast %274 : f32 to vector<16x16xf32>
    %278 = arith.mulf %277, %276 : vector<16x16xf32>
    %279 = arith.addf %273, %278 : vector<16x16xf32>
    %c46 = arith.constant 46 : index
    %280 = memref.load %arg2[%c46] : memref<98xf32, #tpu.memory_space<smem>>
    %281 = vector.extract_strided_slice %1 {offsets = [0, 6, 4], sizes = [1, 16, 16], strides = [1, 1, 1]} : vector<2x22x22xf32> to vector<1x16x16xf32>
    %282 = vector.shape_cast %281 : vector<1x16x16xf32> to vector<16x16xf32>
    %283 = vector.broadcast %280 : f32 to vector<16x16xf32>
    %284 = arith.mulf %283, %282 : vector<16x16xf32>
    %285 = arith.addf %279, %284 : vector<16x16xf32>
    %c47 = arith.constant 47 : index
    %286 = memref.load %arg2[%c47] : memref<98xf32, #tpu.memory_space<smem>>
    %287 = vector.extract_strided_slice %1 {offsets = [0, 6, 5], sizes = [1, 16, 16], strides = [1, 1, 1]} : vector<2x22x22xf32> to vector<1x16x16xf32>
    %288 = vector.shape_cast %287 : vector<1x16x16xf32> to vector<16x16xf32>
    %289 = vector.broadcast %286 : f32 to vector<16x16xf32>
    %290 = arith.mulf %289, %288 : vector<16x16xf32>
    %291 = arith.addf %285, %290 : vector<16x16xf32>
    %c48 = arith.constant 48 : index
    %292 = memref.load %arg2[%c48] : memref<98xf32, #tpu.memory_space<smem>>
    %293 = vector.extract_strided_slice %1 {offsets = [0, 6, 6], sizes = [1, 16, 16], strides = [1, 1, 1]} : vector<2x22x22xf32> to vector<1x16x16xf32>
    %294 = vector.shape_cast %293 : vector<1x16x16xf32> to vector<16x16xf32>
    %295 = vector.broadcast %292 : f32 to vector<16x16xf32>
    %296 = arith.mulf %295, %294 : vector<16x16xf32>
    %297 = arith.addf %291, %296 : vector<16x16xf32>
    %c49 = arith.constant 49 : index
    %298 = memref.load %arg2[%c49] : memref<98xf32, #tpu.memory_space<smem>>
    %299 = vector.extract_strided_slice %1 {offsets = [1, 0, 0], sizes = [1, 16, 16], strides = [1, 1, 1]} : vector<2x22x22xf32> to vector<1x16x16xf32>
    %300 = vector.shape_cast %299 : vector<1x16x16xf32> to vector<16x16xf32>
    %301 = vector.broadcast %298 : f32 to vector<16x16xf32>
    %302 = arith.mulf %301, %300 : vector<16x16xf32>
    %303 = arith.addf %297, %302 : vector<16x16xf32>
    %c50 = arith.constant 50 : index
    %304 = memref.load %arg2[%c50] : memref<98xf32, #tpu.memory_space<smem>>
    %305 = vector.extract_strided_slice %1 {offsets = [1, 0, 1], sizes = [1, 16, 16], strides = [1, 1, 1]} : vector<2x22x22xf32> to vector<1x16x16xf32>
    %306 = vector.shape_cast %305 : vector<1x16x16xf32> to vector<16x16xf32>
    %307 = vector.broadcast %304 : f32 to vector<16x16xf32>
    %308 = arith.mulf %307, %306 : vector<16x16xf32>
    %309 = arith.addf %303, %308 : vector<16x16xf32>
    %c51 = arith.constant 51 : index
    %310 = memref.load %arg2[%c51] : memref<98xf32, #tpu.memory_space<smem>>
    %311 = vector.extract_strided_slice %1 {offsets = [1, 0, 2], sizes = [1, 16, 16], strides = [1, 1, 1]} : vector<2x22x22xf32> to vector<1x16x16xf32>
    %312 = vector.shape_cast %311 : vector<1x16x16xf32> to vector<16x16xf32>
    %313 = vector.broadcast %310 : f32 to vector<16x16xf32>
    %314 = arith.mulf %313, %312 : vector<16x16xf32>
    %315 = arith.addf %309, %314 : vector<16x16xf32>
    %c52 = arith.constant 52 : index
    %316 = memref.load %arg2[%c52] : memref<98xf32, #tpu.memory_space<smem>>
    %317 = vector.extract_strided_slice %1 {offsets = [1, 0, 3], sizes = [1, 16, 16], strides = [1, 1, 1]} : vector<2x22x22xf32> to vector<1x16x16xf32>
    %318 = vector.shape_cast %317 : vector<1x16x16xf32> to vector<16x16xf32>
    %319 = vector.broadcast %316 : f32 to vector<16x16xf32>
    %320 = arith.mulf %319, %318 : vector<16x16xf32>
    %321 = arith.addf %315, %320 : vector<16x16xf32>
    %c53 = arith.constant 53 : index
    %322 = memref.load %arg2[%c53] : memref<98xf32, #tpu.memory_space<smem>>
    %323 = vector.extract_strided_slice %1 {offsets = [1, 0, 4], sizes = [1, 16, 16], strides = [1, 1, 1]} : vector<2x22x22xf32> to vector<1x16x16xf32>
    %324 = vector.shape_cast %323 : vector<1x16x16xf32> to vector<16x16xf32>
    %325 = vector.broadcast %322 : f32 to vector<16x16xf32>
    %326 = arith.mulf %325, %324 : vector<16x16xf32>
    %327 = arith.addf %321, %326 : vector<16x16xf32>
    %c54 = arith.constant 54 : index
    %328 = memref.load %arg2[%c54] : memref<98xf32, #tpu.memory_space<smem>>
    %329 = vector.extract_strided_slice %1 {offsets = [1, 0, 5], sizes = [1, 16, 16], strides = [1, 1, 1]} : vector<2x22x22xf32> to vector<1x16x16xf32>
    %330 = vector.shape_cast %329 : vector<1x16x16xf32> to vector<16x16xf32>
    %331 = vector.broadcast %328 : f32 to vector<16x16xf32>
    %332 = arith.mulf %331, %330 : vector<16x16xf32>
    %333 = arith.addf %327, %332 : vector<16x16xf32>
    %c55 = arith.constant 55 : index
    %334 = memref.load %arg2[%c55] : memref<98xf32, #tpu.memory_space<smem>>
    %335 = vector.extract_strided_slice %1 {offsets = [1, 0, 6], sizes = [1, 16, 16], strides = [1, 1, 1]} : vector<2x22x22xf32> to vector<1x16x16xf32>
    %336 = vector.shape_cast %335 : vector<1x16x16xf32> to vector<16x16xf32>
    %337 = vector.broadcast %334 : f32 to vector<16x16xf32>
    %338 = arith.mulf %337, %336 : vector<16x16xf32>
    %339 = arith.addf %333, %338 : vector<16x16xf32>
    %c56 = arith.constant 56 : index
    %340 = memref.load %arg2[%c56] : memref<98xf32, #tpu.memory_space<smem>>
    %341 = vector.extract_strided_slice %1 {offsets = [1, 1, 0], sizes = [1, 16, 16], strides = [1, 1, 1]} : vector<2x22x22xf32> to vector<1x16x16xf32>
    %342 = vector.shape_cast %341 : vector<1x16x16xf32> to vector<16x16xf32>
    %343 = vector.broadcast %340 : f32 to vector<16x16xf32>
    %344 = arith.mulf %343, %342 : vector<16x16xf32>
    %345 = arith.addf %339, %344 : vector<16x16xf32>
    %c57 = arith.constant 57 : index
    %346 = memref.load %arg2[%c57] : memref<98xf32, #tpu.memory_space<smem>>
    %347 = vector.extract_strided_slice %1 {offsets = [1, 1, 1], sizes = [1, 16, 16], strides = [1, 1, 1]} : vector<2x22x22xf32> to vector<1x16x16xf32>
    %348 = vector.shape_cast %347 : vector<1x16x16xf32> to vector<16x16xf32>
    %349 = vector.broadcast %346 : f32 to vector<16x16xf32>
    %350 = arith.mulf %349, %348 : vector<16x16xf32>
    %351 = arith.addf %345, %350 : vector<16x16xf32>
    %c58 = arith.constant 58 : index
    %352 = memref.load %arg2[%c58] : memref<98xf32, #tpu.memory_space<smem>>
    %353 = vector.extract_strided_slice %1 {offsets = [1, 1, 2], sizes = [1, 16, 16], strides = [1, 1, 1]} : vector<2x22x22xf32> to vector<1x16x16xf32>
    %354 = vector.shape_cast %353 : vector<1x16x16xf32> to vector<16x16xf32>
    %355 = vector.broadcast %352 : f32 to vector<16x16xf32>
    %356 = arith.mulf %355, %354 : vector<16x16xf32>
    %357 = arith.addf %351, %356 : vector<16x16xf32>
    %c59 = arith.constant 59 : index
    %358 = memref.load %arg2[%c59] : memref<98xf32, #tpu.memory_space<smem>>
    %359 = vector.extract_strided_slice %1 {offsets = [1, 1, 3], sizes = [1, 16, 16], strides = [1, 1, 1]} : vector<2x22x22xf32> to vector<1x16x16xf32>
    %360 = vector.shape_cast %359 : vector<1x16x16xf32> to vector<16x16xf32>
    %361 = vector.broadcast %358 : f32 to vector<16x16xf32>
    %362 = arith.mulf %361, %360 : vector<16x16xf32>
    %363 = arith.addf %357, %362 : vector<16x16xf32>
    %c60 = arith.constant 60 : index
    %364 = memref.load %arg2[%c60] : memref<98xf32, #tpu.memory_space<smem>>
    %365 = vector.extract_strided_slice %1 {offsets = [1, 1, 4], sizes = [1, 16, 16], strides = [1, 1, 1]} : vector<2x22x22xf32> to vector<1x16x16xf32>
    %366 = vector.shape_cast %365 : vector<1x16x16xf32> to vector<16x16xf32>
    %367 = vector.broadcast %364 : f32 to vector<16x16xf32>
    %368 = arith.mulf %367, %366 : vector<16x16xf32>
    %369 = arith.addf %363, %368 : vector<16x16xf32>
    %c61 = arith.constant 61 : index
    %370 = memref.load %arg2[%c61] : memref<98xf32, #tpu.memory_space<smem>>
    %371 = vector.extract_strided_slice %1 {offsets = [1, 1, 5], sizes = [1, 16, 16], strides = [1, 1, 1]} : vector<2x22x22xf32> to vector<1x16x16xf32>
    %372 = vector.shape_cast %371 : vector<1x16x16xf32> to vector<16x16xf32>
    %373 = vector.broadcast %370 : f32 to vector<16x16xf32>
    %374 = arith.mulf %373, %372 : vector<16x16xf32>
    %375 = arith.addf %369, %374 : vector<16x16xf32>
    %c62 = arith.constant 62 : index
    %376 = memref.load %arg2[%c62] : memref<98xf32, #tpu.memory_space<smem>>
    %377 = vector.extract_strided_slice %1 {offsets = [1, 1, 6], sizes = [1, 16, 16], strides = [1, 1, 1]} : vector<2x22x22xf32> to vector<1x16x16xf32>
    %378 = vector.shape_cast %377 : vector<1x16x16xf32> to vector<16x16xf32>
    %379 = vector.broadcast %376 : f32 to vector<16x16xf32>
    %380 = arith.mulf %379, %378 : vector<16x16xf32>
    %381 = arith.addf %375, %380 : vector<16x16xf32>
    %c63 = arith.constant 63 : index
    %382 = memref.load %arg2[%c63] : memref<98xf32, #tpu.memory_space<smem>>
    %383 = vector.extract_strided_slice %1 {offsets = [1, 2, 0], sizes = [1, 16, 16], strides = [1, 1, 1]} : vector<2x22x22xf32> to vector<1x16x16xf32>
    %384 = vector.shape_cast %383 : vector<1x16x16xf32> to vector<16x16xf32>
    %385 = vector.broadcast %382 : f32 to vector<16x16xf32>
    %386 = arith.mulf %385, %384 : vector<16x16xf32>
    %387 = arith.addf %381, %386 : vector<16x16xf32>
    %c64 = arith.constant 64 : index
    %388 = memref.load %arg2[%c64] : memref<98xf32, #tpu.memory_space<smem>>
    %389 = vector.extract_strided_slice %1 {offsets = [1, 2, 1], sizes = [1, 16, 16], strides = [1, 1, 1]} : vector<2x22x22xf32> to vector<1x16x16xf32>
    %390 = vector.shape_cast %389 : vector<1x16x16xf32> to vector<16x16xf32>
    %391 = vector.broadcast %388 : f32 to vector<16x16xf32>
    %392 = arith.mulf %391, %390 : vector<16x16xf32>
    %393 = arith.addf %387, %392 : vector<16x16xf32>
    %c65 = arith.constant 65 : index
    %394 = memref.load %arg2[%c65] : memref<98xf32, #tpu.memory_space<smem>>
    %395 = vector.extract_strided_slice %1 {offsets = [1, 2, 2], sizes = [1, 16, 16], strides = [1, 1, 1]} : vector<2x22x22xf32> to vector<1x16x16xf32>
    %396 = vector.shape_cast %395 : vector<1x16x16xf32> to vector<16x16xf32>
    %397 = vector.broadcast %394 : f32 to vector<16x16xf32>
    %398 = arith.mulf %397, %396 : vector<16x16xf32>
    %399 = arith.addf %393, %398 : vector<16x16xf32>
    %c66 = arith.constant 66 : index
    %400 = memref.load %arg2[%c66] : memref<98xf32, #tpu.memory_space<smem>>
    %401 = vector.extract_strided_slice %1 {offsets = [1, 2, 3], sizes = [1, 16, 16], strides = [1, 1, 1]} : vector<2x22x22xf32> to vector<1x16x16xf32>
    %402 = vector.shape_cast %401 : vector<1x16x16xf32> to vector<16x16xf32>
    %403 = vector.broadcast %400 : f32 to vector<16x16xf32>
    %404 = arith.mulf %403, %402 : vector<16x16xf32>
    %405 = arith.addf %399, %404 : vector<16x16xf32>
    %c67 = arith.constant 67 : index
    %406 = memref.load %arg2[%c67] : memref<98xf32, #tpu.memory_space<smem>>
    %407 = vector.extract_strided_slice %1 {offsets = [1, 2, 4], sizes = [1, 16, 16], strides = [1, 1, 1]} : vector<2x22x22xf32> to vector<1x16x16xf32>
    %408 = vector.shape_cast %407 : vector<1x16x16xf32> to vector<16x16xf32>
    %409 = vector.broadcast %406 : f32 to vector<16x16xf32>
    %410 = arith.mulf %409, %408 : vector<16x16xf32>
    %411 = arith.addf %405, %410 : vector<16x16xf32>
    %c68 = arith.constant 68 : index
    %412 = memref.load %arg2[%c68] : memref<98xf32, #tpu.memory_space<smem>>
    %413 = vector.extract_strided_slice %1 {offsets = [1, 2, 5], sizes = [1, 16, 16], strides = [1, 1, 1]} : vector<2x22x22xf32> to vector<1x16x16xf32>
    %414 = vector.shape_cast %413 : vector<1x16x16xf32> to vector<16x16xf32>
    %415 = vector.broadcast %412 : f32 to vector<16x16xf32>
    %416 = arith.mulf %415, %414 : vector<16x16xf32>
    %417 = arith.addf %411, %416 : vector<16x16xf32>
    %c69 = arith.constant 69 : index
    %418 = memref.load %arg2[%c69] : memref<98xf32, #tpu.memory_space<smem>>
    %419 = vector.extract_strided_slice %1 {offsets = [1, 2, 6], sizes = [1, 16, 16], strides = [1, 1, 1]} : vector<2x22x22xf32> to vector<1x16x16xf32>
    %420 = vector.shape_cast %419 : vector<1x16x16xf32> to vector<16x16xf32>
    %421 = vector.broadcast %418 : f32 to vector<16x16xf32>
    %422 = arith.mulf %421, %420 : vector<16x16xf32>
    %423 = arith.addf %417, %422 : vector<16x16xf32>
    %c70 = arith.constant 70 : index
    %424 = memref.load %arg2[%c70] : memref<98xf32, #tpu.memory_space<smem>>
    %425 = vector.extract_strided_slice %1 {offsets = [1, 3, 0], sizes = [1, 16, 16], strides = [1, 1, 1]} : vector<2x22x22xf32> to vector<1x16x16xf32>
    %426 = vector.shape_cast %425 : vector<1x16x16xf32> to vector<16x16xf32>
    %427 = vector.broadcast %424 : f32 to vector<16x16xf32>
    %428 = arith.mulf %427, %426 : vector<16x16xf32>
    %429 = arith.addf %423, %428 : vector<16x16xf32>
    %c71 = arith.constant 71 : index
    %430 = memref.load %arg2[%c71] : memref<98xf32, #tpu.memory_space<smem>>
    %431 = vector.extract_strided_slice %1 {offsets = [1, 3, 1], sizes = [1, 16, 16], strides = [1, 1, 1]} : vector<2x22x22xf32> to vector<1x16x16xf32>
    %432 = vector.shape_cast %431 : vector<1x16x16xf32> to vector<16x16xf32>
    %433 = vector.broadcast %430 : f32 to vector<16x16xf32>
    %434 = arith.mulf %433, %432 : vector<16x16xf32>
    %435 = arith.addf %429, %434 : vector<16x16xf32>
    %c72 = arith.constant 72 : index
    %436 = memref.load %arg2[%c72] : memref<98xf32, #tpu.memory_space<smem>>
    %437 = vector.extract_strided_slice %1 {offsets = [1, 3, 2], sizes = [1, 16, 16], strides = [1, 1, 1]} : vector<2x22x22xf32> to vector<1x16x16xf32>
    %438 = vector.shape_cast %437 : vector<1x16x16xf32> to vector<16x16xf32>
    %439 = vector.broadcast %436 : f32 to vector<16x16xf32>
    %440 = arith.mulf %439, %438 : vector<16x16xf32>
    %441 = arith.addf %435, %440 : vector<16x16xf32>
    %c73 = arith.constant 73 : index
    %442 = memref.load %arg2[%c73] : memref<98xf32, #tpu.memory_space<smem>>
    %443 = vector.extract_strided_slice %1 {offsets = [1, 3, 3], sizes = [1, 16, 16], strides = [1, 1, 1]} : vector<2x22x22xf32> to vector<1x16x16xf32>
    %444 = vector.shape_cast %443 : vector<1x16x16xf32> to vector<16x16xf32>
    %445 = vector.broadcast %442 : f32 to vector<16x16xf32>
    %446 = arith.mulf %445, %444 : vector<16x16xf32>
    %447 = arith.addf %441, %446 : vector<16x16xf32>
    %c74 = arith.constant 74 : index
    %448 = memref.load %arg2[%c74] : memref<98xf32, #tpu.memory_space<smem>>
    %449 = vector.extract_strided_slice %1 {offsets = [1, 3, 4], sizes = [1, 16, 16], strides = [1, 1, 1]} : vector<2x22x22xf32> to vector<1x16x16xf32>
    %450 = vector.shape_cast %449 : vector<1x16x16xf32> to vector<16x16xf32>
    %451 = vector.broadcast %448 : f32 to vector<16x16xf32>
    %452 = arith.mulf %451, %450 : vector<16x16xf32>
    %453 = arith.addf %447, %452 : vector<16x16xf32>
    %c75 = arith.constant 75 : index
    %454 = memref.load %arg2[%c75] : memref<98xf32, #tpu.memory_space<smem>>
    %455 = vector.extract_strided_slice %1 {offsets = [1, 3, 5], sizes = [1, 16, 16], strides = [1, 1, 1]} : vector<2x22x22xf32> to vector<1x16x16xf32>
    %456 = vector.shape_cast %455 : vector<1x16x16xf32> to vector<16x16xf32>
    %457 = vector.broadcast %454 : f32 to vector<16x16xf32>
    %458 = arith.mulf %457, %456 : vector<16x16xf32>
    %459 = arith.addf %453, %458 : vector<16x16xf32>
    %c76 = arith.constant 76 : index
    %460 = memref.load %arg2[%c76] : memref<98xf32, #tpu.memory_space<smem>>
    %461 = vector.extract_strided_slice %1 {offsets = [1, 3, 6], sizes = [1, 16, 16], strides = [1, 1, 1]} : vector<2x22x22xf32> to vector<1x16x16xf32>
    %462 = vector.shape_cast %461 : vector<1x16x16xf32> to vector<16x16xf32>
    %463 = vector.broadcast %460 : f32 to vector<16x16xf32>
    %464 = arith.mulf %463, %462 : vector<16x16xf32>
    %465 = arith.addf %459, %464 : vector<16x16xf32>
    %c77 = arith.constant 77 : index
    %466 = memref.load %arg2[%c77] : memref<98xf32, #tpu.memory_space<smem>>
    %467 = vector.extract_strided_slice %1 {offsets = [1, 4, 0], sizes = [1, 16, 16], strides = [1, 1, 1]} : vector<2x22x22xf32> to vector<1x16x16xf32>
    %468 = vector.shape_cast %467 : vector<1x16x16xf32> to vector<16x16xf32>
    %469 = vector.broadcast %466 : f32 to vector<16x16xf32>
    %470 = arith.mulf %469, %468 : vector<16x16xf32>
    %471 = arith.addf %465, %470 : vector<16x16xf32>
    %c78 = arith.constant 78 : index
    %472 = memref.load %arg2[%c78] : memref<98xf32, #tpu.memory_space<smem>>
    %473 = vector.extract_strided_slice %1 {offsets = [1, 4, 1], sizes = [1, 16, 16], strides = [1, 1, 1]} : vector<2x22x22xf32> to vector<1x16x16xf32>
    %474 = vector.shape_cast %473 : vector<1x16x16xf32> to vector<16x16xf32>
    %475 = vector.broadcast %472 : f32 to vector<16x16xf32>
    %476 = arith.mulf %475, %474 : vector<16x16xf32>
    %477 = arith.addf %471, %476 : vector<16x16xf32>
    %c79 = arith.constant 79 : index
    %478 = memref.load %arg2[%c79] : memref<98xf32, #tpu.memory_space<smem>>
    %479 = vector.extract_strided_slice %1 {offsets = [1, 4, 2], sizes = [1, 16, 16], strides = [1, 1, 1]} : vector<2x22x22xf32> to vector<1x16x16xf32>
    %480 = vector.shape_cast %479 : vector<1x16x16xf32> to vector<16x16xf32>
    %481 = vector.broadcast %478 : f32 to vector<16x16xf32>
    %482 = arith.mulf %481, %480 : vector<16x16xf32>
    %483 = arith.addf %477, %482 : vector<16x16xf32>
    %c80 = arith.constant 80 : index
    %484 = memref.load %arg2[%c80] : memref<98xf32, #tpu.memory_space<smem>>
    %485 = vector.extract_strided_slice %1 {offsets = [1, 4, 3], sizes = [1, 16, 16], strides = [1, 1, 1]} : vector<2x22x22xf32> to vector<1x16x16xf32>
    %486 = vector.shape_cast %485 : vector<1x16x16xf32> to vector<16x16xf32>
    %487 = vector.broadcast %484 : f32 to vector<16x16xf32>
    %488 = arith.mulf %487, %486 : vector<16x16xf32>
    %489 = arith.addf %483, %488 : vector<16x16xf32>
    %c81 = arith.constant 81 : index
    %490 = memref.load %arg2[%c81] : memref<98xf32, #tpu.memory_space<smem>>
    %491 = vector.extract_strided_slice %1 {offsets = [1, 4, 4], sizes = [1, 16, 16], strides = [1, 1, 1]} : vector<2x22x22xf32> to vector<1x16x16xf32>
    %492 = vector.shape_cast %491 : vector<1x16x16xf32> to vector<16x16xf32>
    %493 = vector.broadcast %490 : f32 to vector<16x16xf32>
    %494 = arith.mulf %493, %492 : vector<16x16xf32>
    %495 = arith.addf %489, %494 : vector<16x16xf32>
    %c82 = arith.constant 82 : index
    %496 = memref.load %arg2[%c82] : memref<98xf32, #tpu.memory_space<smem>>
    %497 = vector.extract_strided_slice %1 {offsets = [1, 4, 5], sizes = [1, 16, 16], strides = [1, 1, 1]} : vector<2x22x22xf32> to vector<1x16x16xf32>
    %498 = vector.shape_cast %497 : vector<1x16x16xf32> to vector<16x16xf32>
    %499 = vector.broadcast %496 : f32 to vector<16x16xf32>
    %500 = arith.mulf %499, %498 : vector<16x16xf32>
    %501 = arith.addf %495, %500 : vector<16x16xf32>
    %c83 = arith.constant 83 : index
    %502 = memref.load %arg2[%c83] : memref<98xf32, #tpu.memory_space<smem>>
    %503 = vector.extract_strided_slice %1 {offsets = [1, 4, 6], sizes = [1, 16, 16], strides = [1, 1, 1]} : vector<2x22x22xf32> to vector<1x16x16xf32>
    %504 = vector.shape_cast %503 : vector<1x16x16xf32> to vector<16x16xf32>
    %505 = vector.broadcast %502 : f32 to vector<16x16xf32>
    %506 = arith.mulf %505, %504 : vector<16x16xf32>
    %507 = arith.addf %501, %506 : vector<16x16xf32>
    %c84 = arith.constant 84 : index
    %508 = memref.load %arg2[%c84] : memref<98xf32, #tpu.memory_space<smem>>
    %509 = vector.extract_strided_slice %1 {offsets = [1, 5, 0], sizes = [1, 16, 16], strides = [1, 1, 1]} : vector<2x22x22xf32> to vector<1x16x16xf32>
    %510 = vector.shape_cast %509 : vector<1x16x16xf32> to vector<16x16xf32>
    %511 = vector.broadcast %508 : f32 to vector<16x16xf32>
    %512 = arith.mulf %511, %510 : vector<16x16xf32>
    %513 = arith.addf %507, %512 : vector<16x16xf32>
    %c85 = arith.constant 85 : index
    %514 = memref.load %arg2[%c85] : memref<98xf32, #tpu.memory_space<smem>>
    %515 = vector.extract_strided_slice %1 {offsets = [1, 5, 1], sizes = [1, 16, 16], strides = [1, 1, 1]} : vector<2x22x22xf32> to vector<1x16x16xf32>
    %516 = vector.shape_cast %515 : vector<1x16x16xf32> to vector<16x16xf32>
    %517 = vector.broadcast %514 : f32 to vector<16x16xf32>
    %518 = arith.mulf %517, %516 : vector<16x16xf32>
    %519 = arith.addf %513, %518 : vector<16x16xf32>
    %c86 = arith.constant 86 : index
    %520 = memref.load %arg2[%c86] : memref<98xf32, #tpu.memory_space<smem>>
    %521 = vector.extract_strided_slice %1 {offsets = [1, 5, 2], sizes = [1, 16, 16], strides = [1, 1, 1]} : vector<2x22x22xf32> to vector<1x16x16xf32>
    %522 = vector.shape_cast %521 : vector<1x16x16xf32> to vector<16x16xf32>
    %523 = vector.broadcast %520 : f32 to vector<16x16xf32>
    %524 = arith.mulf %523, %522 : vector<16x16xf32>
    %525 = arith.addf %519, %524 : vector<16x16xf32>
    %c87 = arith.constant 87 : index
    %526 = memref.load %arg2[%c87] : memref<98xf32, #tpu.memory_space<smem>>
    %527 = vector.extract_strided_slice %1 {offsets = [1, 5, 3], sizes = [1, 16, 16], strides = [1, 1, 1]} : vector<2x22x22xf32> to vector<1x16x16xf32>
    %528 = vector.shape_cast %527 : vector<1x16x16xf32> to vector<16x16xf32>
    %529 = vector.broadcast %526 : f32 to vector<16x16xf32>
    %530 = arith.mulf %529, %528 : vector<16x16xf32>
    %531 = arith.addf %525, %530 : vector<16x16xf32>
    %c88 = arith.constant 88 : index
    %532 = memref.load %arg2[%c88] : memref<98xf32, #tpu.memory_space<smem>>
    %533 = vector.extract_strided_slice %1 {offsets = [1, 5, 4], sizes = [1, 16, 16], strides = [1, 1, 1]} : vector<2x22x22xf32> to vector<1x16x16xf32>
    %534 = vector.shape_cast %533 : vector<1x16x16xf32> to vector<16x16xf32>
    %535 = vector.broadcast %532 : f32 to vector<16x16xf32>
    %536 = arith.mulf %535, %534 : vector<16x16xf32>
    %537 = arith.addf %531, %536 : vector<16x16xf32>
    %c89 = arith.constant 89 : index
    %538 = memref.load %arg2[%c89] : memref<98xf32, #tpu.memory_space<smem>>
    %539 = vector.extract_strided_slice %1 {offsets = [1, 5, 5], sizes = [1, 16, 16], strides = [1, 1, 1]} : vector<2x22x22xf32> to vector<1x16x16xf32>
    %540 = vector.shape_cast %539 : vector<1x16x16xf32> to vector<16x16xf32>
    %541 = vector.broadcast %538 : f32 to vector<16x16xf32>
    %542 = arith.mulf %541, %540 : vector<16x16xf32>
    %543 = arith.addf %537, %542 : vector<16x16xf32>
    %c90 = arith.constant 90 : index
    %544 = memref.load %arg2[%c90] : memref<98xf32, #tpu.memory_space<smem>>
    %545 = vector.extract_strided_slice %1 {offsets = [1, 5, 6], sizes = [1, 16, 16], strides = [1, 1, 1]} : vector<2x22x22xf32> to vector<1x16x16xf32>
    %546 = vector.shape_cast %545 : vector<1x16x16xf32> to vector<16x16xf32>
    %547 = vector.broadcast %544 : f32 to vector<16x16xf32>
    %548 = arith.mulf %547, %546 : vector<16x16xf32>
    %549 = arith.addf %543, %548 : vector<16x16xf32>
    %c91 = arith.constant 91 : index
    %550 = memref.load %arg2[%c91] : memref<98xf32, #tpu.memory_space<smem>>
    %551 = vector.extract_strided_slice %1 {offsets = [1, 6, 0], sizes = [1, 16, 16], strides = [1, 1, 1]} : vector<2x22x22xf32> to vector<1x16x16xf32>
    %552 = vector.shape_cast %551 : vector<1x16x16xf32> to vector<16x16xf32>
    %553 = vector.broadcast %550 : f32 to vector<16x16xf32>
    %554 = arith.mulf %553, %552 : vector<16x16xf32>
    %555 = arith.addf %549, %554 : vector<16x16xf32>
    %c92 = arith.constant 92 : index
    %556 = memref.load %arg2[%c92] : memref<98xf32, #tpu.memory_space<smem>>
    %557 = vector.extract_strided_slice %1 {offsets = [1, 6, 1], sizes = [1, 16, 16], strides = [1, 1, 1]} : vector<2x22x22xf32> to vector<1x16x16xf32>
    %558 = vector.shape_cast %557 : vector<1x16x16xf32> to vector<16x16xf32>
    %559 = vector.broadcast %556 : f32 to vector<16x16xf32>
    %560 = arith.mulf %559, %558 : vector<16x16xf32>
    %561 = arith.addf %555, %560 : vector<16x16xf32>
    %c93 = arith.constant 93 : index
    %562 = memref.load %arg2[%c93] : memref<98xf32, #tpu.memory_space<smem>>
    %563 = vector.extract_strided_slice %1 {offsets = [1, 6, 2], sizes = [1, 16, 16], strides = [1, 1, 1]} : vector<2x22x22xf32> to vector<1x16x16xf32>
    %564 = vector.shape_cast %563 : vector<1x16x16xf32> to vector<16x16xf32>
    %565 = vector.broadcast %562 : f32 to vector<16x16xf32>
    %566 = arith.mulf %565, %564 : vector<16x16xf32>
    %567 = arith.addf %561, %566 : vector<16x16xf32>
    %c94 = arith.constant 94 : index
    %568 = memref.load %arg2[%c94] : memref<98xf32, #tpu.memory_space<smem>>
    %569 = vector.extract_strided_slice %1 {offsets = [1, 6, 3], sizes = [1, 16, 16], strides = [1, 1, 1]} : vector<2x22x22xf32> to vector<1x16x16xf32>
    %570 = vector.shape_cast %569 : vector<1x16x16xf32> to vector<16x16xf32>
    %571 = vector.broadcast %568 : f32 to vector<16x16xf32>
    %572 = arith.mulf %571, %570 : vector<16x16xf32>
    %573 = arith.addf %567, %572 : vector<16x16xf32>
    %c95 = arith.constant 95 : index
    %574 = memref.load %arg2[%c95] : memref<98xf32, #tpu.memory_space<smem>>
    %575 = vector.extract_strided_slice %1 {offsets = [1, 6, 4], sizes = [1, 16, 16], strides = [1, 1, 1]} : vector<2x22x22xf32> to vector<1x16x16xf32>
    %576 = vector.shape_cast %575 : vector<1x16x16xf32> to vector<16x16xf32>
    %577 = vector.broadcast %574 : f32 to vector<16x16xf32>
    %578 = arith.mulf %577, %576 : vector<16x16xf32>
    %579 = arith.addf %573, %578 : vector<16x16xf32>
    %c96 = arith.constant 96 : index
    %580 = memref.load %arg2[%c96] : memref<98xf32, #tpu.memory_space<smem>>
    %581 = vector.extract_strided_slice %1 {offsets = [1, 6, 5], sizes = [1, 16, 16], strides = [1, 1, 1]} : vector<2x22x22xf32> to vector<1x16x16xf32>
    %582 = vector.shape_cast %581 : vector<1x16x16xf32> to vector<16x16xf32>
    %583 = vector.broadcast %580 : f32 to vector<16x16xf32>
    %584 = arith.mulf %583, %582 : vector<16x16xf32>
    %585 = arith.addf %579, %584 : vector<16x16xf32>
    %c97 = arith.constant 97 : index
    %586 = memref.load %arg2[%c97] : memref<98xf32, #tpu.memory_space<smem>>
    %587 = vector.extract_strided_slice %1 {offsets = [1, 6, 6], sizes = [1, 16, 16], strides = [1, 1, 1]} : vector<2x22x22xf32> to vector<1x16x16xf32>
    %588 = vector.shape_cast %587 : vector<1x16x16xf32> to vector<16x16xf32>
    %589 = vector.broadcast %586 : f32 to vector<16x16xf32>
    %590 = arith.mulf %589, %588 : vector<16x16xf32>
    %591 = arith.addf %585, %590 : vector<16x16xf32>
    %592 = arith.negf %591 : vector<16x16xf32>
    %593 = math.exp %592 : vector<16x16xf32>
    %cst = arith.constant 1.000000e+00 : f32
    %594 = vector.broadcast %cst : f32 to vector<16x16xf32>
    %595 = arith.addf %594, %593 : vector<16x16xf32>
    %596 = arith.divf %594, %595 : vector<16x16xf32>
    %c0_5 = arith.constant 0 : index
    %c0_6 = arith.constant 0 : index
    %c0_7 = arith.constant 0 : index
    %597 = vector.load %arg4[%c0_5, %c0_6, %c0_7] : memref<1x16x16xf32, #tpu.memory_space<vmem>>, vector<1x16x16xf32>
    %598 = vector.shape_cast %597 : vector<1x16x16xf32> to vector<16x16xf32>
    %599 = vector.shape_cast %596 : vector<16x16xf32> to vector<1x16x16xf32>
    tpu.vector_store %arg4[%c0_5, %c0_6, %c0_7], %599 {strides = array<i32>} : memref<1x16x16xf32, #tpu.memory_space<vmem>>, vector<1x16x16xf32>,
    return
  }
  func.func @transform_0(%arg0: i32) -> (i32, i32, i32, i32) {
    %c0_i32 = arith.constant 0 : i32
    %c0_i32_0 = arith.constant 0 : i32
    %c0_i32_1 = arith.constant 0 : i32
    %c0_i32_2 = arith.constant 0 : i32
    return %arg0, %c0_i32, %c0_i32_0, %c0_i32_1 : i32, i32, i32, i32
  }
  func.func @transform_1(%arg0: i32) -> i32 {
    %c0_i32 = arith.constant 0 : i32
    %c0_i32_0 = arith.constant 0 : i32
    return %c0_i32 : i32
  }
  func.func @transform_2(%arg0: i32) -> i32 {
    %c0_i32 = arith.constant 0 : i32
    %c0_i32_0 = arith.constant 0 : i32
    return %c0_i32 : i32
  }
  func.func @transform_3(%arg0: i32) -> (i32, i32, i32) {
    %c0_i32 = arith.constant 0 : i32
    %c0_i32_0 = arith.constant 0 : i32
    %c0_i32_1 = arith.constant 0 : i32
    return %arg0, %c0_i32, %c0_i32_0 : i32, i32, i32
  }
}

module attributes {stable_mosaic.version = 11 : i64} {
  func.func @_apply_attn_kernel(%arg0: i32, %arg1: memref<1x128x256xf32, #tpu.memory_space<vmem>>, %arg2: memref<1x128x1xf32, #tpu.memory_space<vmem>>, %arg3: memref<1x1x256xf32, #tpu.memory_space<vmem>>, %arg4: memref<1x128x256xf32, #tpu.memory_space<vmem>>) attributes {dimension_semantics = [#tpu.dimension_semantics<parallel>], iteration_bounds = array<i64: 2>, scalar_prefetch = 0 : i64, scratch_operands = 0 : i64, tpu.core_type = #tpu.core_type<tc>, window_params = [{transform_indices = @transform_0, window_bounds = array<i64: 1, 128, 256>}, {transform_indices = @transform_1, window_bounds = array<i64: 1, 128, 1>}, {transform_indices = @transform_2, window_bounds = array<i64: 1, 1, 256>}, {transform_indices = @transform_3, window_bounds = array<i64: 1, 128, 256>}]} {
    %c0 = arith.constant 0 : index
    %c0_0 = arith.constant 0 : index
    %c0_1 = arith.constant 0 : index
    %0 = vector.load %arg1[%c0, %c0_0, %c0_1] : memref<1x128x256xf32, #tpu.memory_space<vmem>>, vector<1x128x256xf32>
    %1 = vector.shape_cast %0 : vector<1x128x256xf32> to vector<128x256xf32>
    %c0_2 = arith.constant 0 : index
    %c0_3 = arith.constant 0 : index
    %c0_4 = arith.constant 0 : index
    %2 = vector.load %arg2[%c0_2, %c0_3, %c0_4] : memref<1x128x1xf32, #tpu.memory_space<vmem>>, vector<1x128x1xf32>
    %3 = vector.shape_cast %2 : vector<1x128x1xf32> to vector<128x1xf32>
    %4 = vector.broadcast %3 : vector<128x1xf32> to vector<128x256xf32>
    %5 = arith.mulf %1, %4 : vector<128x256xf32>
    %c0_5 = arith.constant 0 : index
    %c0_6 = arith.constant 0 : index
    %c0_7 = arith.constant 0 : index
    %6 = vector.load %arg3[%c0_5, %c0_6, %c0_7] : memref<1x1x256xf32, #tpu.memory_space<vmem>>, vector<1x1x256xf32>
    %7 = vector.shape_cast %6 : vector<1x1x256xf32> to vector<1x256xf32>
    %8 = vector.broadcast %7 : vector<1x256xf32> to vector<128x256xf32>
    %9 = arith.mulf %5, %8 : vector<128x256xf32>
    %10 = arith.addf %9, %1 : vector<128x256xf32>
    %c0_8 = arith.constant 0 : index
    %c0_9 = arith.constant 0 : index
    %c0_10 = arith.constant 0 : index
    %11 = vector.load %arg4[%c0_8, %c0_9, %c0_10] : memref<1x128x256xf32, #tpu.memory_space<vmem>>, vector<1x128x256xf32>
    %12 = vector.shape_cast %11 : vector<1x128x256xf32> to vector<128x256xf32>
    %13 = vector.shape_cast %10 : vector<128x256xf32> to vector<1x128x256xf32>
    tpu.vector_store %arg4[%c0_8, %c0_9, %c0_10], %13 {strides = array<i32>} : memref<1x128x256xf32, #tpu.memory_space<vmem>>, vector<1x128x256xf32>,
    return
  }
  func.func @transform_0(%arg0: i32) -> (i32, i32, i32) {
    %c0_i32 = arith.constant 0 : i32
    %c0_i32_0 = arith.constant 0 : i32
    %c0_i32_1 = arith.constant 0 : i32
    return %arg0, %c0_i32, %c0_i32_0 : i32, i32, i32
  }
  func.func @transform_1(%arg0: i32) -> (i32, i32, i32) {
    %c0_i32 = arith.constant 0 : i32
    %c0_i32_0 = arith.constant 0 : i32
    %c0_i32_1 = arith.constant 0 : i32
    return %arg0, %c0_i32, %c0_i32_0 : i32, i32, i32
  }
  func.func @transform_2(%arg0: i32) -> (i32, i32, i32) {
    %c0_i32 = arith.constant 0 : i32
    %c0_i32_0 = arith.constant 0 : i32
    %c0_i32_1 = arith.constant 0 : i32
    return %arg0, %c0_i32, %c0_i32_0 : i32, i32, i32
  }
  func.func @transform_3(%arg0: i32) -> (i32, i32, i32) {
    %c0_i32 = arith.constant 0 : i32
    %c0_i32_0 = arith.constant 0 : i32
    %c0_i32_1 = arith.constant 0 : i32
    return %arg0, %c0_i32, %c0_i32_0 : i32, i32, i32
  }
}

</mosaic_0001>

<bundles_post_ra>
// kernel: cbam_forward.5
= control target key start
LH: loop header
LB: loop body
LE: loop exit
PB: predicated region body
PF: predicated region fallthrough
CT: control target
= control target key end

     0   :  { %s612_s12 = smov 0   ;;  %s744_s0 = inlined_call_operand.vmem [shape: f32[2,128,256], index: 0, kind: input, shape index: {}]   ;;  %s745_s1 = inlined_call_operand.vmem [shape: f32[2,128,1], index: 1, kind: input, shape index: {}]   ;;  %s746_s2 = inlined_call_operand.vmem [shape: f32[2,1,256], index: 2, kind: input, shape index: {}]   ;;  %s747_s3 = inlined_call_operand.vmem [shape: f32[2,128,256], index: 3, kind: output, shape index: {}]  }
   0x1 LB: > { %s555_s13 = sadd.s32 4294967295, %s589_s12   ;;  %p559_p0 = scmp.ge.s32.totalorder %s589_s12, 1  ;;  %s589_s12 = sphi %s612_s12, %s13_s12  }
   0x2   : > { %p156_p1 = scmp.lt.s32.totalorder %s589_s12, 3 }
   0x4   : > { %p157_p2 = pnand %p559_p0, %p156_p1 }
   0x5   : > { %p189_p3 = scmp.lt.s32.totalorder (!%p157_p2), %s555_s13, 1  ;;  %v591_v0 = vmov (!%p157_p2), 0   ;;  %v370_v17 = vlaneseq (!%p157_p2) }
   0x6   : > { %160 = sbr.rel (%p157_p2) target bundleno = 182 (0xb6), region = 32  ;;  %582 = vset.pattern.permute.xlu1 (!%p157_p2), %v591_v0  ;;  %581 = vset.pattern.permute.xlu0 (!%p157_p2), %v591_v0 }
   0x7   : > { %v371_v18 = vshrl.u32 (!%p157_p2), %v370_v17, 7 }
   0x9   : > { %v372_v19 = vsub.s32 (!%p157_p2), 0, %v371_v18  ;;  %v376_v20 = vsub.s32 (!%p157_p2), 1, %v371_v18 }
   0xd   : > { %s749_s13 = smov (!%p189_p3, %s555_s13), 1 }
   0xe   : > { %s570_s14 = sshll.u32 %s749_s13, 7  ;;  %s564_s18 = sshll.u32 %s749_s13, 1 }
   0xf   : > { %s198_s17 = scalar_lea.vmem %s745_s1, %s570_s14  ;;  %s569_s19 = sshll.u32 %s749_s13, 8 }
  0x10   : > { %v242_v1 = vld [vmem:[%s198_s17 + $0x10] sm:$0xff]  ;;  %v240_v2 = vld [vmem:[%s198_s17] sm:$0xff]  ;;  %v243_v3 = vld [vmem:[%s198_s17 + $0x18] sm:$0xff]  ;;  %s202_s22 = scalar_lea.vmem %s746_s2, %s564_s18  ;;  %s634_s25 = scalar_lea.vmem %s744_s0, %s569_s19 }
  0x11   : > { %268 = vperm.xlu1 %582, %v242_v1   ;;  %258 = vperm.xlu0 %581, %v240_v2   ;;  %v241_v4 = vld [vmem:[%s198_s17 + $0x8] sm:$0xff]  ;;  %v244_v6 = vld [vmem:[%s198_s17 + $0x20] sm:$0xff]  ;;  %v247_v7 = vld [vmem:[%s198_s17 + $0x38] sm:$0xff]  ;;  %s655_s28 = scalar_lea.vmem %s747_s3, %s569_s19 }
  0x12   : > { %v245_v5 = vld [vmem:[%s198_s17 + $0x28] sm:$0xff]  ;;  %v246_v8 = vld [vmem:[%s198_s17 + $0x30] sm:$0xff]  ;;  %v248_v10 = vld [vmem:[%s198_s17 + $0x40] sm:$0xff] }
  0x13   : > { %v249_v9 = vld [vmem:[%s198_s17 + $0x48] sm:$0xff]  ;;  %v251_v11 = vld [vmem:[%s198_s17 + $0x58] sm:$0xff]  ;;  %v250_v12 = vld [vmem:[%s198_s17 + $0x50] sm:$0xff] }
  0x14   : > { %v253_v13 = vld [vmem:[%s198_s17 + $0x68] sm:$0xff]  ;;  %v252_v14 = vld [vmem:[%s198_s17 + $0x60] sm:$0xff]  ;;  %v255_v15 = vld [vmem:[%s198_s17 + $0x78] sm:$0xff] }
  0x15   : > { %273 = vperm.xlu1 %582, %v243_v3   ;;  %263 = vperm.xlu0 %581, %v241_v4   ;;  %v254_v16 = vld [vmem:[%s198_s17 + $0x70] sm:$0xff]  ;;  %v368_v21 = vld [vmem:[%s202_s22] sm:$0x3]  ;;  %v213_v23 = vld [vmem:[%s634_s25 + $0x28] sm:$0xff] }
  0x16   : > { %v212_v22 = vld [vmem:[%s634_s25 + $0x20] sm:$0xff]  ;;  %v209_v25 = vld [vmem:[%s634_s25 + $0x8] sm:$0xff]  ;;  %v640_v26 = vrot.slane %v368_v21, %v372_v19  ;;  %v642_v27 = vrot.slane %v368_v21, %v376_v20  ;;  %v214_v34 = vld [vmem:[%s634_s25 + $0x30] sm:$0xff] }
  0x17   : > { %v208_v24 = vld [vmem:[%s634_s25] sm:$0xff]  ;;  %v215_v39 = vld [vmem:[%s634_s25 + $0x38] sm:$0xff]  ;;  %v210_v40 = vld [vmem:[%s634_s25 + $0x10] sm:$0xff] }
  0x18   : > { %v211_v41 = vld [vmem:[%s634_s25 + $0x18] sm:$0xff]  ;;  %v218_v48 = vld [vmem:[%s634_s25 + $0x50] sm:$0xff]  ;;  %v216_v54 = vld [vmem:[%s634_s25 + $0x40] sm:$0xff] }
  0x19   : > { %283 = vperm.xlu1 %582, %v245_v5   ;;  %278 = vperm.xlu0 %581, %v244_v6   ;;  %v219_v53 = vld [vmem:[%s634_s25 + $0x58] sm:$0xff]  ;;  %v217_v55 = vld [vmem:[%s634_s25 + $0x48] sm:$0xff]  ;;  %v222_v6 = vld [vmem:[%s634_s25 + $0x70] sm:$0xff] }
  0x1a   : > { %v226_v20 = vld [vmem:[%s634_s25 + $0x90] sm:$0xff] }
  0x1d   : > { %293 = vperm.xlu1 %582, %v247_v7   ;;  %288 = vperm.xlu0 %581, %v246_v8  }
  0x21   : > { %303 = vperm.xlu1 %582, %v249_v9   ;;  %298 = vperm.xlu0 %581, %v248_v10  }
  0x25   : > { %313 = vperm.xlu1 %582, %v251_v11   ;;  %308 = vperm.xlu0 %581, %v250_v12   ;;  %v223_v11 = vld [vmem:[%s634_s25 + $0x78] sm:$0xff]  ;;  %v220_v12 = vld [vmem:[%s634_s25 + $0x60] sm:$0xff] }
  0x29   : > { %323 = vperm.xlu1 %582, %v253_v13   ;;  %318 = vperm.xlu0 %581, %v252_v14   ;;  %v221_v13 = vld [vmem:[%s634_s25 + $0x68] sm:$0xff] }
  0x2d   : > { %333 = vperm.xlu1 %582, %v255_v15   ;;  %328 = vperm.xlu0 %581, %v254_v16  }
  0x90   : > { %v269_v28 = vpop.permute.xlu1 %268  ;;  %v259_v29 = vpop.permute.xlu0 %258 }
  0x91   : > { %v340_v30 = vmul.f32 %v269_v28, %v212_v22  ;;  %v341_v31 = vmul.f32 %v269_v28, %v213_v23  ;;  %v336_v32 = vmul.f32 %v259_v29, %v208_v24  ;;  %v337_v33 = vmul.f32 %v259_v29, %v209_v25  ;;  %v224_v28 = vld [vmem:[%s634_s25 + $0x80] sm:$0xff]  ;;  %v225_v29 = vld [vmem:[%s634_s25 + $0x88] sm:$0xff] }
  0x93   : > { %v384_v35 = vmul.f32 %v640_v26, %v340_v30  ;;  %v385_v36 = vmul.f32 %v642_v27, %v341_v31  ;;  %v380_v37 = vmul.f32 %v640_v26, %v336_v32  ;;  %v381_v38 = vmul.f32 %v642_v27, %v337_v33 }
  0x94   : > { %v274_v42 = vpop.permute.xlu1 %273  ;;  %v264_v43 = vpop.permute.xlu0 %263 }
  0x95   : > { %v416_v44 = vadd.f32 %v384_v35, %v212_v22  ;;  %v417_v45 = vadd.f32 %v385_v36, %v213_v23  ;;  %v412_v46 = vadd.f32 %v380_v37, %v208_v24  ;;  %v413_v47 = vadd.f32 %v381_v38, %v209_v25  ;;  %v227_v25 = vld [vmem:[%s634_s25 + $0x98] sm:$0xff] }
  0x96   : > { %v342_v49 = vmul.f32 %v274_v42, %v214_v34  ;;  %v343_v50 = vmul.f32 %v274_v42, %v215_v39  ;;  %v338_v51 = vmul.f32 %v264_v43, %v210_v40  ;;  %v339_v52 = vmul.f32 %v264_v43, %v211_v41 }
  0x97   : > { %448 = vst [vmem:[%s655_s28 + $0x20] sm:$0xff] %v416_v44  ;;  %449 = vst [vmem:[%s655_s28 + $0x28] sm:$0xff] %v417_v45  ;;  %v230_v44 = vld [vmem:[%s634_s25 + $0xb0] sm:$0xff] }
  0x98   : > { %444 = vst [vmem:[%s655_s28] sm:$0xff] %v412_v46  ;;  %445 = vst [vmem:[%s655_s28 + $0x8] sm:$0xff] %v413_v47  ;;  %v386_v56 = vmul.f32 %v640_v26, %v342_v49  ;;  %v387_v57 = vmul.f32 %v642_v27, %v343_v50  ;;  %v382_v58 = vmul.f32 %v640_v26, %v338_v51  ;;  %v284_v60 = vpop.permute.xlu1 %283  ;;  %v279_v61 = vpop.permute.xlu0 %278  ;;  %v231_v49 = vld [vmem:[%s634_s25 + $0xb8] sm:$0xff]  ;;  %v228_v50 = vld [vmem:[%s634_s25 + $0xa0] sm:$0xff] }
  0x99   : > { %v383_v59 = vmul.f32 %v642_v27, %v339_v52  ;;  %v346_v62 = vmul.f32 %v284_v60, %v218_v48  ;;  %v347_v63 = vmul.f32 %v284_v60, %v219_v53  ;;  %v344_v0 = vmul.f32 %v279_v61, %v216_v54  ;;  %v229_v51 = vld [vmem:[%s634_s25 + $0xa8] sm:$0xff] }
  0x9a   : > { %v345_v1 = vmul.f32 %v279_v61, %v217_v55  ;;  %v418_v2 = vadd.f32 %v386_v56, %v214_v34  ;;  %v419_v3 = vadd.f32 %v387_v57, %v215_v39  ;;  %v414_v4 = vadd.f32 %v382_v58, %v210_v40  ;;  %v234_v58 = vld [vmem:[%s634_s25 + $0xd0] sm:$0xff] }
  0x9b   : > { %v415_v5 = vadd.f32 %v383_v59, %v211_v41  ;;  %v390_v7 = vmul.f32 %v640_v26, %v346_v62  ;;  %v391_v8 = vmul.f32 %v642_v27, %v347_v63  ;;  %v388_v9 = vmul.f32 %v640_v26, %v344_v0  ;;  %v235_v63 = vld [vmem:[%s634_s25 + $0xd8] sm:$0xff]  ;;  %v232_v0 = vld [vmem:[%s634_s25 + $0xc0] sm:$0xff] }
  0x9c   : > { %v389_v10 = vmul.f32 %v642_v27, %v345_v1  ;;  %450 = vst [vmem:[%s655_s28 + $0x30] sm:$0xff] %v418_v2  ;;  %451 = vst [vmem:[%s655_s28 + $0x38] sm:$0xff] %v419_v3  ;;  %v294_v14 = vpop.permute.xlu1 %293  ;;  %v289_v15 = vpop.permute.xlu0 %288  ;;  %v233_v1 = vld [vmem:[%s634_s25 + $0xc8] sm:$0xff] }
  0x9d   : > { %446 = vst [vmem:[%s655_s28 + $0x10] sm:$0xff] %v414_v4  ;;  %447 = vst [vmem:[%s655_s28 + $0x18] sm:$0xff] %v415_v5  ;;  %v422_v16 = vadd.f32 %v390_v7, %v218_v48  ;;  %v423_v17 = vadd.f32 %v391_v8, %v219_v53  ;;  %v420_v18 = vadd.f32 %v388_v9, %v216_v54 }
  0x9e   : > { %v421_v19 = vadd.f32 %v389_v10, %v217_v55  ;;  %v350_v21 = vmul.f32 %v294_v14, %v222_v6  ;;  %v351_v22 = vmul.f32 %v294_v14, %v223_v11  ;;  %v348_v23 = vmul.f32 %v289_v15, %v220_v12 }
  0x9f   : > { %v349_v24 = vmul.f32 %v289_v15, %v221_v13  ;;  %454 = vst [vmem:[%s655_s28 + $0x50] sm:$0xff] %v422_v16  ;;  %455 = vst [vmem:[%s655_s28 + $0x58] sm:$0xff] %v423_v17  ;;  %v238_v16 = vld [vmem:[%s634_s25 + $0xf0] sm:$0xff] }
  0xa0   : > { %452 = vst [vmem:[%s655_s28 + $0x40] sm:$0xff] %v420_v18  ;;  %453 = vst [vmem:[%s655_s28 + $0x48] sm:$0xff] %v421_v19  ;;  %v394_v30 = vmul.f32 %v640_v26, %v350_v21  ;;  %v395_v31 = vmul.f32 %v642_v27, %v351_v22  ;;  %v392_v32 = vmul.f32 %v640_v26, %v348_v23  ;;  %v304_v34 = vpop.permute.xlu1 %303  ;;  %v299_v35 = vpop.permute.xlu0 %298  ;;  %v239_v21 = vld [vmem:[%s634_s25 + $0xf8] sm:$0xff]  ;;  %v236_v22 = vld [vmem:[%s634_s25 + $0xe0] sm:$0xff] }
  0xa1   : > { %v393_v33 = vmul.f32 %v642_v27, %v349_v24  ;;  %v354_v36 = vmul.f32 %v304_v34, %v226_v20  ;;  %v355_v37 = vmul.f32 %v304_v34, %v227_v25  ;;  %v352_v38 = vmul.f32 %v299_v35, %v224_v28  ;;  %v237_v23 = vld [vmem:[%s634_s25 + $0xe8] sm:$0xff] }
  0xa2   : > { %v353_v39 = vmul.f32 %v299_v35, %v225_v29  ;;  %v426_v40 = vadd.f32 %v394_v30, %v222_v6  ;;  %v427_v41 = vadd.f32 %v395_v31, %v223_v11  ;;  %v424_v42 = vadd.f32 %v392_v32, %v220_v12 }
  0xa3   : > { %v425_v43 = vadd.f32 %v393_v33, %v221_v13  ;;  %v398_v45 = vmul.f32 %v640_v26, %v354_v36  ;;  %v399_v46 = vmul.f32 %v642_v27, %v355_v37  ;;  %v396_v47 = vmul.f32 %v640_v26, %v352_v38 }
  0xa4   : > { %v397_v48 = vmul.f32 %v642_v27, %v353_v39  ;;  %458 = vst [vmem:[%s655_s28 + $0x70] sm:$0xff] %v426_v40  ;;  %459 = vst [vmem:[%s655_s28 + $0x78] sm:$0xff] %v427_v41  ;;  %v314_v52 = vpop.permute.xlu1 %313  ;;  %v309_v53 = vpop.permute.xlu0 %308 }
  0xa5   : > { %456 = vst [vmem:[%s655_s28 + $0x60] sm:$0xff] %v424_v42  ;;  %457 = vst [vmem:[%s655_s28 + $0x68] sm:$0xff] %v425_v43  ;;  %v430_v54 = vadd.f32 %v398_v45, %v226_v20  ;;  %v431_v55 = vadd.f32 %v399_v46, %v227_v25  ;;  %v428_v56 = vadd.f32 %v396_v47, %v224_v28 }
  0xa6   : > { %v429_v57 = vadd.f32 %v397_v48, %v225_v29  ;;  %v358_v59 = vmul.f32 %v314_v52, %v230_v44  ;;  %v359_v60 = vmul.f32 %v314_v52, %v231_v49  ;;  %v356_v61 = vmul.f32 %v309_v53, %v228_v50 }
  0xa7   : > { %v357_v62 = vmul.f32 %v309_v53, %v229_v51  ;;  %462 = vst [vmem:[%s655_s28 + $0x90] sm:$0xff] %v430_v54  ;;  %463 = vst [vmem:[%s655_s28 + $0x98] sm:$0xff] %v431_v55 }
  0xa8   : > { %460 = vst [vmem:[%s655_s28 + $0x80] sm:$0xff] %v428_v56  ;;  %461 = vst [vmem:[%s655_s28 + $0x88] sm:$0xff] %v429_v57  ;;  %v402_v2 = vmul.f32 %v640_v26, %v358_v59  ;;  %v403_v3 = vmul.f32 %v642_v27, %v359_v60  ;;  %v400_v4 = vmul.f32 %v640_v26, %v356_v61  ;;  %v324_v6 = vpop.permute.xlu1 %323  ;;  %v319_v7 = vpop.permute.xlu0 %318 }
  0xa9   : > { %v401_v5 = vmul.f32 %v642_v27, %v357_v62  ;;  %v362_v8 = vmul.f32 %v324_v6, %v234_v58  ;;  %v363_v9 = vmul.f32 %v324_v6, %v235_v63  ;;  %v360_v10 = vmul.f32 %v319_v7, %v232_v0 }
  0xaa   : > { %v361_v11 = vmul.f32 %v319_v7, %v233_v1  ;;  %v434_v12 = vadd.f32 %v402_v2, %v230_v44  ;;  %v435_v13 = vadd.f32 %v403_v3, %v231_v49  ;;  %v432_v14 = vadd.f32 %v400_v4, %v228_v50 }
  0xab   : > { %v433_v15 = vadd.f32 %v401_v5, %v229_v51  ;;  %v406_v17 = vmul.f32 %v640_v26, %v362_v8  ;;  %v407_v18 = vmul.f32 %v642_v27, %v363_v9  ;;  %v404_v19 = vmul.f32 %v640_v26, %v360_v10 }
  0xac   : > { %v405_v20 = vmul.f32 %v642_v27, %v361_v11  ;;  %466 = vst [vmem:[%s655_s28 + $0xb0] sm:$0xff] %v434_v12  ;;  %467 = vst [vmem:[%s655_s28 + $0xb8] sm:$0xff] %v435_v13  ;;  %v334_v24 = vpop.permute.xlu1 %333  ;;  %v329_v25 = vpop.permute.xlu0 %328 }
  0xad   : > { %464 = vst [vmem:[%s655_s28 + $0xa0] sm:$0xff] %v432_v14  ;;  %465 = vst [vmem:[%s655_s28 + $0xa8] sm:$0xff] %v433_v15  ;;  %v438_v28 = vadd.f32 %v406_v17, %v234_v58  ;;  %v439_v29 = vadd.f32 %v407_v18, %v235_v63  ;;  %v436_v30 = vadd.f32 %v404_v19, %v232_v0 }
  0xae   : > { %v437_v31 = vadd.f32 %v405_v20, %v233_v1  ;;  %v366_v32 = vmul.f32 %v334_v24, %v238_v16  ;;  %v367_v33 = vmul.f32 %v334_v24, %v239_v21  ;;  %v364_v34 = vmul.f32 %v329_v25, %v236_v22 }
  0xaf   : > { %v365_v35 = vmul.f32 %v329_v25, %v237_v23  ;;  %470 = vst [vmem:[%s655_s28 + $0xd0] sm:$0xff] %v438_v28  ;;  %471 = vst [vmem:[%s655_s28 + $0xd8] sm:$0xff] %v439_v29 }
  0xb0   : > { %468 = vst [vmem:[%s655_s28 + $0xc0] sm:$0xff] %v436_v30  ;;  %469 = vst [vmem:[%s655_s28 + $0xc8] sm:$0xff] %v437_v31  ;;  %v410_v36 = vmul.f32 %v640_v26, %v366_v32  ;;  %v411_v37 = vmul.f32 %v642_v27, %v367_v33  ;;  %v408_v38 = vmul.f32 %v640_v26, %v364_v34 }
  0xb1   : > { %v409_v39 = vmul.f32 %v642_v27, %v365_v35 }
  0xb2   : > { %v442_v40 = vadd.f32 %v410_v36, %v238_v16  ;;  %v443_v41 = vadd.f32 %v411_v37, %v239_v21  ;;  %v440_v42 = vadd.f32 %v408_v38, %v236_v22 }
  0xb3   : > { %v441_v43 = vadd.f32 %v409_v39, %v237_v23 }
  0xb4   : > { %474 = vst [vmem:[%s655_s28 + $0xf0] sm:$0xff] %v442_v40  ;;  %475 = vst [vmem:[%s655_s28 + $0xf8] sm:$0xff] %v443_v41 }
  0xb5   : > { %472 = vst [vmem:[%s655_s28 + $0xe0] sm:$0xff] %v440_v42  ;;  %473 = vst [vmem:[%s655_s28 + $0xe8] sm:$0xff] %v441_v43 }
  0xb6 PF: > { %s13_s12 = sadd.s32 1, %s589_s12  }
  0xb7   : > { %p10_p4 = scmp.ge.s32.totalorder %s13_s12, 4  }
  0xb9   :  { %12 = sbr.rel (!%p10_p4) target bundleno = 1 (0x1), region = 68 }

// kernel: cbam_forward.3
= control target key start
LH: loop header
LB: loop body
LE: loop exit
PB: predicated region body
PF: predicated region fallthrough
CT: control target
= control target key end

     0   :  { %s1701_s15 = smov 0   ;;  %s2057_s0 = inlined_call_operand.vmem [shape: f32[2,128,256], index: 0, kind: input, shape index: {}]   ;;  %s2058_s1 = inlined_call_operand.vmem [shape: f32[8,128], index: 1, kind: input, shape index: {}]   ;;  %s2059_s2 = inlined_call_operand.vmem [shape: f32[128,8], index: 2, kind: input, shape index: {}]   ;;  %s2060_s3 = inlined_call_operand.vmem [shape: f32[2,128,1], index: 3, kind: output, shape index: {0}]   ;;  %s2061_s4 = inlined_call_operand.vmem [shape: f32[2,2,256], index: 4, kind: output, shape index: {1}]  }
   0x1 LB: > { %s1267_s16 = sadd.s32 4294967295, %s1670_s15   ;;  %p1271_p0 = scmp.ge.s32.totalorder %s1670_s15, 1  ;;  %s1670_s15 = sphi %s1701_s15, %s15_s15  }
   0x2   : > { %p165_p1 = scmp.lt.s32.totalorder %s1670_s15, 3 }
   0x4   : > { %p166_p2 = pnand %p1271_p0, %p165_p1 }
   0x5   : > { %p196_p3 = scmp.lt.s32.totalorder (!%p166_p2), %s1267_s16, 1  ;;  %v1672_v41 = vmov (!%p166_p2), 0.0|0.0   ;;  %vm1673_vm0 = vmmov (!%p166_p2), 0   ;;  %v1674_v61 = vmov (!%p166_p2), 0.0   ;;  %vm514_vm1 = vcmask (!%p166_p2), 64512  }
   0x6   : > { %169 = sbr.rel (%p166_p2) target bundleno = 909 (0x38d), region = 32  ;;  %1522 = vmatprep.subr.bf16.mxu1 (!%p166_p2), %v1672_v41  ;;  %1432 = vmatprep.mubr.msk.f32.mxu1 (!%p166_p2), %vm1673_vm0, %v1674_v61  ;;  %vm949_vm2 = vcmask (!%p166_p2), 7168   ;;  %vm1164_vm3 = vcmask (!%p166_p2), 1040384  }
   0xd   : > { %s2063_s16 = smov (!%p196_p3, %s1267_s16), 1 }
   0xe   : > { %s1329_s17 = sshll.u32 %s2063_s16, 8  ;;  %s1330_s5 = sshll.u32 %s2063_s16, 7 }
   0xf   : > { %s1715_s20 = scalar_lea.vmem %s2057_s0, %s1329_s17  ;;  %s1984_s8 = scalar_lea.vmem %s2060_s3, %s1330_s5 }
  0x10   : > { %v1718_v0 = vld [vmem:[%s1715_s20 + $0x20] sm:$0xff]  ;;  %v1721_v1 = vld [vmem:[%s1715_s20 + $0x28] sm:$0xff]  ;;  %v1732_v5 = vld [vmem:[%s1715_s20 + $0x30] sm:$0xff]  ;;  %s1331_s9 = sshll.u32 %s2063_s16, 2 }
  0x11   : > { %v1724_v2 = vld [vmem:[%s1715_s20] sm:$0xff]  ;;  %v249_v3 = vmax.f32 %v1718_v0, %v1721_v1  ;;  %v1729_v4 = vld [vmem:[%s1715_s20 + $0x8] sm:$0xff]  ;;  %v1735_v6 = vld [vmem:[%s1715_s20 + $0x38] sm:$0xff]  ;;  %v297_v52 = vadd.f32 %v1721_v1, %v1718_v0  ;;  %s210_s12 = scalar_lea.vmem %s2061_s4, %s1331_s9 }
  0x12   : > { %v243_v7 = vmax.f32 %v1724_v2, %v1729_v4  ;;  %v1740_v8 = vld [vmem:[%s1715_s20 + $0x10] sm:$0xff]  ;;  %v1743_v9 = vld [vmem:[%s1715_s20 + $0x18] sm:$0xff]  ;;  %v252_v10 = vmax.f32 %v1732_v5, %v1735_v6  ;;  %v1756_v14 = vld [vmem:[%s1715_s20 + $0x40] sm:$0xff]  ;;  %v291_v50 = vadd.f32 %v1729_v4, %v1724_v2  ;;  %v300_v51 = vadd.f32 %v1735_v6, %v1732_v5 }
  0x13   : > { %250 = vmax.xlane.f32.xlu1 %v249_v3  ;;  %v246_v11 = vmax.f32 %v1740_v8, %v1743_v9  ;;  %v1750_v12 = vld [vmem:[%s1715_s20 + $0x50] sm:$0xff]  ;;  %v1753_v13 = vld [vmem:[%s1715_s20 + $0x58] sm:$0xff]  ;;  %v1759_v15 = vld [vmem:[%s1715_s20 + $0x48] sm:$0xff]  ;;  %v294_v49 = vadd.f32 %v1743_v9, %v1740_v8 }
  0x14   : > { %244 = vmax.xlane.f32.xlu0 %v243_v7  ;;  %v258_v16 = vmax.f32 %v1750_v12, %v1753_v13  ;;  %v255_v17 = vmax.f32 %v1756_v14, %v1759_v15  ;;  %v1766_v18 = vld [vmem:[%s1715_s20 + $0x70] sm:$0xff]  ;;  %v1769_v19 = vld [vmem:[%s1715_s20 + $0x78] sm:$0xff]  ;;  %v1772_v20 = vld [vmem:[%s1715_s20 + $0x60] sm:$0xff]  ;;  %v306_v53 = vadd.f32 %v1753_v13, %v1750_v12  ;;  %v303_v54 = vadd.f32 %v1759_v15, %v1756_v14 }
  0x15   : > { %v1775_v21 = vld [vmem:[%s1715_s20 + $0x68] sm:$0xff]  ;;  %v264_v22 = vmax.f32 %v1766_v18, %v1769_v19  ;;  %v1782_v24 = vld [vmem:[%s1715_s20 + $0x90] sm:$0xff]  ;;  %v1785_v25 = vld [vmem:[%s1715_s20 + $0x98] sm:$0xff]  ;;  %v312_v55 = vadd.f32 %v1769_v19, %v1766_v18 }
  0x16   : > { %v261_v23 = vmax.f32 %v1772_v20, %v1775_v21  ;;  %v1788_v26 = vld [vmem:[%s1715_s20 + $0x80] sm:$0xff]  ;;  %v1791_v27 = vld [vmem:[%s1715_s20 + $0x88] sm:$0xff]  ;;  %v270_v28 = vmax.f32 %v1782_v24, %v1785_v25  ;;  %v1798_v30 = vld [vmem:[%s1715_s20 + $0xb0] sm:$0xff]  ;;  %v309_v56 = vadd.f32 %v1775_v21, %v1772_v20  ;;  %v318_v57 = vadd.f32 %v1785_v25, %v1782_v24 }
  0x17   : > { %253 = vmax.xlane.f32.xlu1 %v252_v10  ;;  %v267_v29 = vmax.f32 %v1788_v26, %v1791_v27  ;;  %v1801_v31 = vld [vmem:[%s1715_s20 + $0xb8] sm:$0xff]  ;;  %v1804_v32 = vld [vmem:[%s1715_s20 + $0xa0] sm:$0xff]  ;;  %v1807_v33 = vld [vmem:[%s1715_s20 + $0xa8] sm:$0xff]  ;;  %v315_v58 = vadd.f32 %v1791_v27, %v1788_v26 }
  0x18   : > { %247 = vmax.xlane.f32.xlu0 %v246_v11  ;;  %v276_v34 = vmax.f32 %v1798_v30, %v1801_v31  ;;  %v273_v35 = vmax.f32 %v1804_v32, %v1807_v33  ;;  %v1814_v36 = vld [vmem:[%s1715_s20 + $0xd0] sm:$0xff]  ;;  %v1817_v37 = vld [vmem:[%s1715_s20 + $0xd8] sm:$0xff]  ;;  %v1820_v38 = vld [vmem:[%s1715_s20 + $0xc0] sm:$0xff]  ;;  %v324_v59 = vadd.f32 %v1801_v31, %v1798_v30  ;;  %v321_v60 = vadd.f32 %v1807_v33, %v1804_v32 }
  0x19   : > { %v1823_v39 = vld [vmem:[%s1715_s20 + $0xc8] sm:$0xff]  ;;  %v282_v40 = vmax.f32 %v1814_v36, %v1817_v37  ;;  %v1831_v43 = vld [vmem:[%s1715_s20 + $0xf0] sm:$0xff]  ;;  %v1834_v44 = vld [vmem:[%s1715_s20 + $0xf8] sm:$0xff]  ;;  %v330_v62 = vadd.f32 %v1817_v37, %v1814_v36 }
  0x1a   : > { %v279_v42 = vmax.f32 %v1820_v38, %v1823_v39  ;;  %v1837_v45 = vld [vmem:[%s1715_s20 + $0xe0] sm:$0xff]  ;;  %v1840_v46 = vld [vmem:[%s1715_s20 + $0xe8] sm:$0xff]  ;;  %v288_v47 = vmax.f32 %v1831_v43, %v1834_v44  ;;  %v327_v63 = vadd.f32 %v1823_v39, %v1820_v38  ;;  %v336_v3 = vadd.f32 %v1834_v44, %v1831_v43 }
  0x1b   : > { %259 = vmax.xlane.f32.xlu1 %v258_v16  ;;  %v285_v48 = vmax.f32 %v1837_v45, %v1840_v46  ;;  %v333_v7 = vadd.f32 %v1840_v46, %v1837_v45 }
  0x1c   : > { %256 = vmax.xlane.f32.xlu0 %v255_v17 }
  0x1f   : > { %265 = vmax.xlane.f32.xlu1 %v264_v22 }
  0x20   : > { %262 = vmax.xlane.f32.xlu0 %v261_v23 }
  0x23   : > { %271 = vmax.xlane.f32.xlu1 %v270_v28 }
  0x24   : > { %268 = vmax.xlane.f32.xlu0 %v267_v29 }
  0x27   : > { %277 = vmax.xlane.f32.xlu1 %v276_v34 }
  0x28   : > { %274 = vmax.xlane.f32.xlu0 %v273_v35 }
  0x2b   : > { %283 = vmax.xlane.f32.xlu1 %v282_v40 }
  0x2c   : > { %280 = vmax.xlane.f32.xlu0 %v279_v42 }
  0x2f   : > { %289 = vmax.xlane.f32.xlu1 %v288_v47 }
  0x30   : > { %286 = vmax.xlane.f32.xlu0 %v285_v48 }
  0x33   : > { %295 = vadd.xlane.f32.xlu1 %v294_v49 }
  0x34   : > { %292 = vadd.xlane.f32.xlu0 %v291_v50 }
  0x37   : > { %301 = vadd.xlane.f32.xlu1 %v300_v51 }
  0x38   : > { %298 = vadd.xlane.f32.xlu0 %v297_v52 }
  0x3b   : > { %307 = vadd.xlane.f32.xlu1 %v306_v53 }
  0x3c   : > { %304 = vadd.xlane.f32.xlu0 %v303_v54 }
  0x3f   : > { %313 = vadd.xlane.f32.xlu1 %v312_v55 }
  0x40   : > { %310 = vadd.xlane.f32.xlu0 %v309_v56 }
  0x43   : > { %319 = vadd.xlane.f32.xlu1 %v318_v57 }
  0x44   : > { %316 = vadd.xlane.f32.xlu0 %v315_v58 }
  0x47   : > { %325 = vadd.xlane.f32.xlu1 %v324_v59 }
  0x48   : > { %322 = vadd.xlane.f32.xlu0 %v321_v60 }
  0x4b   : > { %331 = vadd.xlane.f32.xlu1 %v330_v62 }
  0x4c   : > { %328 = vadd.xlane.f32.xlu0 %v327_v63 }
  0x4f   : > { %337 = vadd.xlane.f32.xlu1 %v336_v3 }
  0x50   : > { %334 = vadd.xlane.f32.xlu0 %v333_v7 }
  0xa0   : > { %v251_v10 = vpop.xlane.xlu1 %250 }
  0xa1   : > { %v245_v11 = vpop.xlane.xlu0 %244 }
  0xa4   : > { %v254_v16 = vpop.xlane.xlu1 %253 }
  0xa5   : > { %v248_v17 = vpop.xlane.xlu0 %247  ;;  %v1526_v29 = vpack.c.bf16 %v254_v16, %v251_v10  ;;  %v355_v10 = vld [vmem:[%s2058_s1] sm:$0xff] }
  0xa6   : > { %v1523_v22 = vpack.c.bf16 %v248_v17, %v245_v11 }
  0xa8   : > { %1524 = vmatpush3.bf16.msra.mxu1 %v1523_v22  ;;  %v260_v23 = vpop.xlane.xlu1 %259 }
  0xa9   : > { %1525 = vmatprep.subr.bf16.mxu1 %v1672_v41  ;;  %v257_v28 = vpop.xlane.xlu0 %256 }
  0xaa   : > { %v1529_v40 = vpack.c.bf16 %v260_v23, %v257_v28 }
  0xac   : > { %1527 = vmatpush3.bf16.msra.mxu1 %v1526_v29  ;;  %v266_v34 = vpop.xlane.xlu1 %265 }
  0xad   : > { %1528 = vmatprep.subr.bf16.mxu1 %v1672_v41  ;;  %v263_v35 = vpop.xlane.xlu0 %262 }
  0xae   : > { %v1532_v48 = vpack.c.bf16 %v266_v34, %v263_v35 }
  0xb0   : > { %1530 = vmatpush3.bf16.msra.mxu1 %v1529_v40  ;;  %v272_v42 = vpop.xlane.xlu1 %271 }
  0xb1   : > { %1531 = vmatprep.subr.bf16.mxu1 %v1672_v41  ;;  %v269_v47 = vpop.xlane.xlu0 %268 }
  0xb2   : > { %v1535_v51 = vpack.c.bf16 %v272_v42, %v269_v47 }
  0xb4   : > { %1533 = vmatpush3.bf16.msra.mxu1 %v1532_v48  ;;  %v278_v49 = vpop.xlane.xlu1 %277 }
  0xb5   : > { %1534 = vmatprep.subr.bf16.mxu1 %v1672_v41  ;;  %v275_v50 = vpop.xlane.xlu0 %274 }
  0xb6   : > { %v1538_v54 = vpack.c.bf16 %v278_v49, %v275_v50 }
  0xb8   : > { %1536 = vmatpush3.bf16.msra.mxu1 %v1535_v51  ;;  %v284_v52 = vpop.xlane.xlu1 %283 }
  0xb9   : > { %1537 = vmatprep.subr.bf16.mxu1 %v1672_v41  ;;  %v281_v53 = vpop.xlane.xlu0 %280 }
  0xba   : > { %v1541_v57 = vpack.c.bf16 %v284_v52, %v281_v53 }
  0xbc   : > { %1539 = vmatpush3.bf16.msra.mxu1 %v1538_v54  ;;  %v290_v55 = vpop.xlane.xlu1 %289 }
  0xbd   : > { %1540 = vmatprep.subr.bf16.mxu1 %v1672_v41  ;;  %v287_v56 = vpop.xlane.xlu0 %286 }
  0xbe   : > { %v1544_v62 = vpack.c.bf16 %v290_v55, %v287_v56 }
  0xc0   : > { %1542 = vmatpush3.bf16.msra.mxu1 %v1541_v57  ;;  %v296_v58 = vpop.xlane.xlu1 %295 }
  0xc1   : > { %v340_v59 = vmul.f32 0.00390625, %v296_v58  ;;  %1543 = vmatprep.subr.bf16.mxu1 %v1672_v41  ;;  %v293_v60 = vpop.xlane.xlu0 %292 }
  0xc2   : > { %v339_v63 = vmul.f32 0.00390625, %v293_v60 }
  0xc4   : > { %v1547_v3 = vpack.c.bf16 %v340_v59, %v339_v63  ;;  %1545 = vmatpush3.bf16.msra.mxu1 %v1544_v62  ;;  %v302_v7 = vpop.xlane.xlu1 %301 }
  0xc5   : > { %v342_v11 = vmul.f32 0.00390625, %v302_v7  ;;  %1546 = vmatprep.subr.bf16.mxu1 %v1672_v41  ;;  %v299_v16 = vpop.xlane.xlu0 %298 }
  0xc6   : > { %v341_v17 = vmul.f32 0.00390625, %v299_v16 }
  0xc7   : > { %1433 = vmatmul.mubr.f32.vlgmr.msra.gmra.mrb[0].mxu1 %v355_v10 }
  0xc8   : > { %v1550_v22 = vpack.c.bf16 %v342_v11, %v341_v17  ;;  %1548 = vmatpush3.bf16.msra.mxu1 %v1547_v3  ;;  %v308_v23 = vpop.xlane.xlu1 %307  ;;  %1467 = vmatprep.mubr.msk.f32.mxu1 %vm1673_vm0, %v1674_v61 }
  0xc9   : > { %v344_v28 = vmul.f32 0.00390625, %v308_v23  ;;  %1549 = vmatprep.subr.bf16.mxu1 %v1672_v41  ;;  %v305_v29 = vpop.xlane.xlu0 %304  ;;  %v356_v23 = vld [vmem:[%s2059_s2] sm:$0xff] }
  0xca   : > { %v343_v34 = vmul.f32 0.00390625, %v305_v29  ;;  %1472 = vmatprep.mubr.msk.f32.mxu0 %vm514_vm1, %v356_v23 }
  0xcc   : > { %v1553_v35 = vpack.c.bf16 %v344_v28, %v343_v34  ;;  %1551 = vmatpush3.bf16.msra.mxu1 %v1550_v22  ;;  %v314_v40 = vpop.xlane.xlu1 %313 }
  0xcd   : > { %v346_v42 = vmul.f32 0.00390625, %v314_v40  ;;  %1552 = vmatprep.subr.bf16.mxu1 %v1672_v41  ;;  %v311_v47 = vpop.xlane.xlu0 %310 }
  0xce   : > { %v345_v48 = vmul.f32 0.00390625, %v311_v47 }
  0xd0   : > { %v1556_v49 = vpack.c.bf16 %v346_v42, %v345_v48  ;;  %1554 = vmatpush3.bf16.msra.mxu1 %v1553_v35  ;;  %v320_v50 = vpop.xlane.xlu1 %319  ;;  %v357_v42 = vld [vmem:[%s2059_s2 + $0x8] sm:$0xff]  ;;  %v360_v48 = vld [vmem:[%s2059_s2 + $0x20] sm:$0xff] }
  0xd1   : > { %v348_v51 = vmul.f32 0.00390625, %v320_v50  ;;  %1555 = vmatprep.subr.bf16.mxu1 %v1672_v41  ;;  %v317_v61 = vpop.xlane.xlu0 %316  ;;  %v362_v50 = vld [vmem:[%s2059_s2 + $0x30] sm:$0xff] }
  0xd2   : > { %v347_v52 = vmul.f32 0.00390625, %v317_v61  ;;  %v364_v61 = vld [vmem:[%s2059_s2 + $0x40] sm:$0xff] }
  0xd4   : > { %v1559_v53 = vpack.c.bf16 %v348_v51, %v347_v52  ;;  %1557 = vmatpush3.bf16.msra.mxu1 %v1556_v49  ;;  %v326_v54 = vpop.xlane.xlu1 %325  ;;  %v361_v49 = vld [vmem:[%s2059_s2 + $0x28] sm:$0xff]  ;;  %v363_v51 = vld [vmem:[%s2059_s2 + $0x38] sm:$0xff] }
  0xd5   : > { %v350_v55 = vmul.f32 0.00390625, %v326_v54  ;;  %1558 = vmatprep.subr.bf16.mxu1 %v1672_v41  ;;  %v323_v56 = vpop.xlane.xlu0 %322  ;;  %v365_v52 = vld [vmem:[%s2059_s2 + $0x48] sm:$0xff]  ;;  %v367_v54 = vld [vmem:[%s2059_s2 + $0x58] sm:$0xff] }
  0xd6   : > { %v349_v57 = vmul.f32 0.00390625, %v323_v56  ;;  %v369_v56 = vld [vmem:[%s2059_s2 + $0x68] sm:$0xff] }
  0xd8   : > { %v1562_v58 = vpack.c.bf16 %v350_v55, %v349_v57  ;;  %1560 = vmatpush3.bf16.msra.mxu1 %v1559_v53  ;;  %v332_v59 = vpop.xlane.xlu1 %331  ;;  %v366_v53 = vld [vmem:[%s2059_s2 + $0x50] sm:$0xff]  ;;  %v368_v55 = vld [vmem:[%s2059_s2 + $0x60] sm:$0xff] }
  0xd9   : > { %v352_v60 = vmul.f32 0.00390625, %v332_v59  ;;  %1561 = vmatprep.subr.bf16.mxu1 %v1672_v41  ;;  %v329_v62 = vpop.xlane.xlu0 %328  ;;  %v370_v57 = vld [vmem:[%s2059_s2 + $0x70] sm:$0xff]  ;;  %v1675_v59 = vmov 0  }
  0xda   : > { %v351_v63 = vmul.f32 0.00390625, %v329_v62  ;;  %1599 = vset.pattern.permute.xlu1 %v1675_v59  ;;  %1598 = vset.pattern.permute.xlu0 %v1675_v59 }
  0xdc   : > { %v1565_v3 = vpack.c.bf16 %v352_v60, %v351_v63  ;;  %1563 = vmatpush3.bf16.msra.mxu1 %v1562_v58  ;;  %v338_v7 = vpop.xlane.xlu1 %337  ;;  %v371_v58 = vld [vmem:[%s2059_s2 + $0x78] sm:$0xff] }
  0xdd   : > { %v354_v11 = vmul.f32 0.00390625, %v338_v7  ;;  %1564 = vmatprep.subr.bf16.mxu1 %v1672_v41  ;;  %v335_v16 = vpop.xlane.xlu0 %334 }
  0xde   : > { %v353_v17 = vmul.f32 0.00390625, %v335_v16 }
  0xe0   : > { %v1568_v22 = vpack.c.bf16 %v354_v11, %v353_v17  ;;  %1566 = vmatpush3.bf16.msra.mxu1 %v1565_v3 }
  0xe1   : > { %1567 = vmatprep.subr.bf16.mxu1 %v1672_v41  ;;  %v358_v41 = vld [vmem:[%s2059_s2 + $0x10] sm:$0xff] }
  0xe4   : > { %1569 = vmatpush3.bf16.msra.mxu1 %v1568_v22 }
  0xe7   : > { %1468 = vmatmul.mubr.f32.vlgmr.msra.gmra.mrb[2].mxu1 %v355_v10  ;;  %v359_v10 = vld [vmem:[%s2059_s2 + $0x18] sm:$0xff] }
 0x19a   : > { %v438_v28 = vpop.f32.mrb[0].mxu1 }
 0x19b   : > { %v1434_v29 = vpop.f32.mrb[1].mxu1  ;;  %v442_v47 = vmax.f32 %v438_v28, 0.0 }
 0x1ba   : > { %v509_v34 = vpop.f32.mrb[2].mxu1 }
 0x1bb   : > { %v513_v35 = vmax.f32 %v509_v34, 0.0  ;;  %v1469_v40 = vpop.f32.mrb[3].mxu1 }
 0x1bd   : > { %1470 = vmatprep.subr.mxu0 %v513_v35 }
 0x1be   : > { %1471 = vmatpush3.msra.mxu0 %v513_v35 }
 0x1bf   : > { %1473 = vmatmul.mubr.msk.f32.vlgmr.msra.gmra.mrb[0].mxu0 %vm514_vm1, %v357_v42  ;;  %1496 = vmatprep.subr.mxu0 %v442_v47 }
 0x1c0   : > { %1497 = vmatpush3.msra.mxu0 %v442_v47  ;;  %1475 = vmatprep.mubr.msk.f32.mxu0 %vm514_vm1, %v358_v41 }
 0x1c3   : > { %1476 = vmatmul.mubr.msk.f32.gmra.mrb[2].mxu0 %vm514_vm1, %v359_v10 }
 0x1c4   : > { %1478 = vmatprep.mubr.msk.f32.mxu0 %vm514_vm1, %v360_v48 }
 0x1c7   : > { %1479 = vmatmul.mubr.msk.f32.gmra.mrb[4].mxu0 %vm514_vm1, %v361_v49 }
 0x1c8   : > { %1481 = vmatprep.mubr.msk.f32.mxu0 %vm514_vm1, %v362_v50 }
 0x1cb   : > { %1482 = vmatmul.mubr.msk.f32.gmra.mrb[6].mxu0 %vm514_vm1, %v363_v51 }
 0x1cc   : > { %1484 = vmatprep.mubr.msk.f32.mxu0 %vm514_vm1, %v364_v61 }
 0x1cf   : > { %1485 = vmatmul.mubr.msk.f32.gmra.mrb[8].mxu0 %vm514_vm1, %v365_v52 }
 0x1d0   : > { %1487 = vmatprep.mubr.msk.f32.mxu0 %vm514_vm1, %v366_v53 }
 0x1d3   : > { %1488 = vmatmul.mubr.msk.f32.gmra.mrb[10].mxu0 %vm514_vm1, %v367_v54 }
 0x1d4   : > { %1490 = vmatprep.mubr.msk.f32.mxu0 %vm514_vm1, %v368_v55 }
 0x1d7   : > { %1491 = vmatmul.mubr.msk.f32.gmra.mrb[12].mxu0 %vm514_vm1, %v369_v56 }
 0x1d8   : > { %1493 = vmatprep.mubr.msk.f32.mxu0 %vm514_vm1, %v370_v57 }
 0x1db   : > { %1494 = vmatmul.mubr.msk.f32.gmra.mrb[14].mxu0 %vm514_vm1, %v371_v58 }
 0x1dc   : > { %1498 = vmatprep.mubr.msk.f32.mxu0 %vm514_vm1, %v356_v23 }
 0x1df   : > { %1499 = vmatmul.mubr.msk.f32.vlgmr.msra.gmra.mrb[0].mxu0 %vm514_vm1, %v357_v42 }
 0x1e0   : > { %1501 = vmatprep.mubr.msk.f32.mxu0 %vm514_vm1, %v358_v41 }
 0x1e3   : > { %1502 = vmatmul.mubr.msk.f32.gmra.mrb[2].mxu0 %vm514_vm1, %v359_v10 }
 0x1e4   : > { %1504 = vmatprep.mubr.msk.f32.mxu0 %vm514_vm1, %v360_v48 }
 0x1e7   : > { %1505 = vmatmul.mubr.msk.f32.gmra.mrb[4].mxu0 %vm514_vm1, %v361_v49 }
 0x1e8   : > { %1507 = vmatprep.mubr.msk.f32.mxu0 %vm514_vm1, %v362_v50 }
 0x1eb   : > { %1508 = vmatmul.mubr.msk.f32.gmra.mrb[6].mxu0 %vm514_vm1, %v363_v51 }
 0x1ec   : > { %1510 = vmatprep.mubr.msk.f32.mxu0 %vm514_vm1, %v364_v61 }
 0x1ef   : > { %1511 = vmatmul.mubr.msk.f32.gmra.mrb[8].mxu0 %vm514_vm1, %v365_v52 }
 0x1f0   : > { %1513 = vmatprep.mubr.msk.f32.mxu0 %vm514_vm1, %v366_v53 }
 0x1f3   : > { %1514 = vmatmul.mubr.msk.f32.gmra.mrb[10].mxu0 %vm514_vm1, %v367_v54 }
 0x1f4   : > { %1516 = vmatprep.mubr.msk.f32.mxu0 %vm514_vm1, %v368_v55 }
 0x1f7   : > { %1517 = vmatmul.mubr.msk.f32.gmra.mrb[12].mxu0 %vm514_vm1, %v369_v56 }
 0x1f8   : > { %1519 = vmatprep.mubr.msk.f32.mxu0 %vm514_vm1, %v370_v57 }
 0x1fb   : > { %1520 = vmatmul.mubr.msk.f32.gmra.mrb[14].mxu0 %vm514_vm1, %v371_v58 }
 0x2b2   : > { %v1500_v60 = vpop.f32.mrb[0].mxu0 }
 0x2b3   : > { %v1311_v62 = vmul.f32 -1.442695, %v1500_v60  ;;  %v774_v63 = vpop.f32.mrb[1].mxu0 }
 0x2b4   : > { %v1310_v3 = vmul.f32 -1.442695, %v774_v63 }
 0x2b5   : > { %1600 = vpow2.f32 %v1311_v62 }
 0x2b6   : > { %1602 = vpow2.f32 %v1310_v3  ;;  %v1503_v7 = vpop.f32.mrb[2].mxu0 }
 0x2b7   : > { %v1313_v11 = vmul.f32 -1.442695, %v1503_v7  ;;  %v784_v16 = vpop.f32.mrb[3].mxu0 }
 0x2b8   : > { %v1312_v17 = vmul.f32 -1.442695, %v784_v16 }
 0x2b9   : > { %1604 = vpow2.f32 %v1313_v11 }
 0x2ba   : > { %1606 = vpow2.f32 %v1312_v17  ;;  %v1506_v22 = vpop.f32.mrb[4].mxu0 }
 0x2bb   : > { %v1315_v23 = vmul.f32 -1.442695, %v1506_v22  ;;  %v794_v28 = vpop.f32.mrb[5].mxu0 }
 0x2bc   : > { %v1314_v29 = vmul.f32 -1.442695, %v794_v28 }
 0x2bd   : > { %1608 = vpow2.f32 %v1315_v23 }
 0x2be   : > { %1610 = vpow2.f32 %v1314_v29  ;;  %v1509_v34 = vpop.f32.mrb[6].mxu0 }
 0x2bf   : > { %v1601_v35 = vpop.eup %1600  ;;  %v1317_v40 = vmul.f32 -1.442695, %v1509_v34  ;;  %v804_v42 = vpop.f32.mrb[7].mxu0 }
 0x2c0   : > { %v1603_v47 = vpop.eup %1602  ;;  %v902_v41 = vadd.f32 1.0, %v1601_v35  ;;  %v1316_v10 = vmul.f32 -1.442695, %v804_v42 }
 0x2c1   : > { %v901_v48 = vadd.f32 1.0, %v1603_v47  ;;  %1612 = vpow2.f32 %v1317_v40 }
 0x2c2   : > { %1614 = vrcp.f32 %v902_v41  ;;  %v1512_v49 = vpop.f32.mrb[8].mxu0 }
 0x2c3   : > { %v1605_v50 = vpop.eup %1604  ;;  %1616 = vrcp.f32 %v901_v48  ;;  %v1319_v51 = vmul.f32 -1.442695, %v1512_v49  ;;  %v814_v61 = vpop.f32.mrb[9].mxu0 }
 0x2c4   : > { %v1607_v52 = vpop.eup %1606  ;;  %v904_v53 = vadd.f32 1.0, %v1605_v50  ;;  %1618 = vpow2.f32 %v1316_v10  ;;  %v1318_v54 = vmul.f32 -1.442695, %v814_v61 }
 0x2c5   : > { %v903_v55 = vadd.f32 1.0, %v1607_v52  ;;  %1620 = vpow2.f32 %v1319_v51 }
 0x2c6   : > { %1622 = vrcp.f32 %v904_v53  ;;  %v1515_v56 = vpop.f32.mrb[10].mxu0 }
 0x2c7   : > { %v1609_v57 = vpop.eup %1608  ;;  %1624 = vrcp.f32 %v903_v55  ;;  %v1321_v58 = vmul.f32 -1.442695, %v1515_v56  ;;  %v824_v59 = vpop.f32.mrb[11].mxu0 }
 0x2c8   : > { %v1611_v60 = vpop.eup %1610  ;;  %v906_v62 = vadd.f32 1.0, %v1609_v57  ;;  %1626 = vpow2.f32 %v1318_v54  ;;  %v1320_v63 = vmul.f32 -1.442695, %v824_v59 }
 0x2c9   : > { %v905_v3 = vadd.f32 1.0, %v1611_v60  ;;  %1628 = vpow2.f32 %v1321_v58 }
 0x2ca   : > { %1630 = vrcp.f32 %v906_v62  ;;  %v1518_v7 = vpop.f32.mrb[12].mxu0 }
 0x2cb   : > { %v1613_v11 = vpop.eup %1612  ;;  %1632 = vrcp.f32 %v905_v3  ;;  %v1323_v16 = vmul.f32 -1.442695, %v1518_v7  ;;  %v834_v17 = vpop.f32.mrb[13].mxu0 }
 0x2cc   : > { %v1615_v22 = vpop.eup %1614  ;;  %v908_v23 = vadd.f32 1.0, %v1613_v11  ;;  %1634 = vpow2.f32 %v1320_v63  ;;  %v1322_v28 = vmul.f32 -1.442695, %v834_v17 }
 0x2cd   : > { %v1617_v29 = vpop.eup %1616  ;;  %951 = vst.msk [vmem:[%s1984_s8 + $0x8] sm:$0xff] %vm949_vm2, %v1615_v22  ;;  %1636 = vpow2.f32 %v1323_v16  ;;  %973 = vperm.xlu1 %1599, %v1615_v22  }
 0x2ce   : > { %v1619_v34 = vpop.eup %1618  ;;  %950 = vst.msk [vmem:[%s1984_s8] sm:$0xff] %vm949_vm2, %v1617_v29  ;;  %1638 = vrcp.f32 %v908_v23  ;;  %968 = vperm.xlu0 %1598, %v1617_v29   ;;  %v1521_v35 = vpop.f32.mrb[14].mxu0 }
 0x2cf   : > { %v1621_v40 = vpop.eup %1620  ;;  %v907_v42 = vadd.f32 1.0, %v1619_v34  ;;  %1640 = vpow2.f32 %v1322_v28  ;;  %v1325_v47 = vmul.f32 -1.442695, %v1521_v35  ;;  %v844_v41 = vpop.f32.mrb[15].mxu0 }
 0x2d0   : > { %v1623_v10 = vpop.eup %1622  ;;  %v910_v48 = vadd.f32 1.0, %v1621_v40  ;;  %v1324_v49 = vmul.f32 -1.442695, %v844_v41 }
 0x2d1   : > { %v1625_v50 = vpop.eup %1624  ;;  %953 = vst.msk [vmem:[%s1984_s8 + $0x18] sm:$0xff] %vm949_vm2, %v1623_v10  ;;  %1642 = vrcp.f32 %v907_v42  ;;  %983 = vperm.xlu1 %1599, %v1623_v10  }
 0x2d2   : > { %v1627_v51 = vpop.eup %1626  ;;  %952 = vst.msk [vmem:[%s1984_s8 + $0x10] sm:$0xff] %vm949_vm2, %v1625_v50  ;;  %1644 = vrcp.f32 %v910_v48 }
 0x2d3   : > { %v1629_v61 = vpop.eup %1628  ;;  %v909_v52 = vadd.f32 1.0, %v1627_v51  ;;  %1646 = vpow2.f32 %v1325_v47 }
 0x2d4   : > { %v1631_v53 = vpop.eup %1630  ;;  %v912_v54 = vadd.f32 1.0, %v1629_v61  ;;  %1648 = vpow2.f32 %v1324_v49 }
 0x2d5   : > { %v1633_v55 = vpop.eup %1632  ;;  %955 = vst.msk [vmem:[%s1984_s8 + $0x28] sm:$0xff] %vm949_vm2, %v1631_v53  ;;  %1650 = vrcp.f32 %v909_v52  ;;  %978 = vperm.xlu1 %1599, %v1625_v50  }
 0x2d6   : > { %v1635_v56 = vpop.eup %1634  ;;  %954 = vst.msk [vmem:[%s1984_s8 + $0x20] sm:$0xff] %vm949_vm2, %v1633_v55  ;;  %1652 = vrcp.f32 %v912_v54 }
 0x2d7   : > { %v1637_v57 = vpop.eup %1636  ;;  %v911_v58 = vadd.f32 1.0, %v1635_v56 }
 0x2d8   : > { %v1639_v59 = vpop.eup %1638  ;;  %v914_v60 = vadd.f32 1.0, %v1637_v57 }
 0x2d9   : > { %v1641_v62 = vpop.eup %1640  ;;  %957 = vst.msk [vmem:[%s1984_s8 + $0x38] sm:$0xff] %vm949_vm2, %v1639_v59  ;;  %1654 = vrcp.f32 %v911_v58  ;;  %993 = vperm.xlu1 %1599, %v1631_v53  }
 0x2da   : > { %1656 = vrcp.f32 %v914_v60  ;;  %v913_v63 = vadd.f32 1.0, %v1641_v62 }
 0x2db   : > { %v1643_v3 = vpop.eup %1642 }
 0x2dc   : > { %v1645_v7 = vpop.eup %1644  ;;  %956 = vst.msk [vmem:[%s1984_s8 + $0x30] sm:$0xff] %vm949_vm2, %v1643_v3  ;;  %1658 = vrcp.f32 %v913_v63 }
 0x2dd   : > { %v1647_v11 = vpop.eup %1646  ;;  %959 = vst.msk [vmem:[%s1984_s8 + $0x48] sm:$0xff] %vm949_vm2, %v1645_v7  ;;  %988 = vperm.xlu1 %1599, %v1633_v55   ;;  %1013 = vperm.xlu0 %1598, %v1645_v7  }
 0x2de   : > { %v1649_v16 = vpop.eup %1648  ;;  %v916_v17 = vadd.f32 1.0, %v1647_v11 }
 0x2df   : > { %v1651_v22 = vpop.eup %1650  ;;  %v915_v23 = vadd.f32 1.0, %v1649_v16 }
 0x2e0   : > { %v1653_v28 = vpop.eup %1652  ;;  %958 = vst.msk [vmem:[%s1984_s8 + $0x40] sm:$0xff] %vm949_vm2, %v1651_v22  ;;  %1660 = vrcp.f32 %v916_v17 }
 0x2e1   : > { %961 = vst.msk [vmem:[%s1984_s8 + $0x58] sm:$0xff] %vm949_vm2, %v1653_v28  ;;  %1662 = vrcp.f32 %v915_v23  ;;  %1003 = vperm.xlu1 %1599, %v1639_v59   ;;  %1023 = vperm.xlu0 %1598, %v1653_v28  }
 0x2e3   : > { %v1655_v29 = vpop.eup %1654 }
 0x2e4   : > { %v1657_v34 = vpop.eup %1656  ;;  %960 = vst.msk [vmem:[%s1984_s8 + $0x50] sm:$0xff] %vm949_vm2, %v1655_v29 }
 0x2e5   : > { %963 = vst.msk [vmem:[%s1984_s8 + $0x68] sm:$0xff] %vm949_vm2, %v1657_v34  ;;  %998 = vperm.xlu1 %1599, %v1643_v3   ;;  %1033 = vperm.xlu0 %1598, %v1657_v34  }
 0x2e6   : > { %v1659_v35 = vpop.eup %1658 }
 0x2e7   : > { %962 = vst.msk [vmem:[%s1984_s8 + $0x60] sm:$0xff] %vm949_vm2, %v1659_v35 }
 0x2e9   : > { %1008 = vperm.xlu1 %1599, %v1651_v22  }
 0x2ea   : > { %v1661_v40 = vpop.eup %1660 }
 0x2eb   : > { %v1663_v42 = vpop.eup %1662  ;;  %965 = vst.msk [vmem:[%s1984_s8 + $0x78] sm:$0xff] %vm949_vm2, %v1661_v40  ;;  %1043 = vperm.xlu0 %1598, %v1661_v40  }
 0x2ec   : > { %964 = vst.msk [vmem:[%s1984_s8 + $0x70] sm:$0xff] %vm949_vm2, %v1663_v42 }
 0x2ed   : > { %1018 = vperm.xlu1 %1599, %v1655_v29  }
 0x2f1   : > { %1028 = vperm.xlu1 %1599, %v1659_v35  }
 0x2f5   : > { %1038 = vperm.xlu1 %1599, %v1663_v42  }
 0x34c   : > { %v974_v47 = vpop.permute.xlu1 %973 }
 0x34d   : > { %v969_v10 = vpop.permute.xlu0 %968  ;;  %v1048_v49 = vmul.f32 %v974_v47, %v1740_v8  ;;  %v1049_v50 = vmul.f32 %v974_v47, %v1743_v9 }
 0x34e   : > { %v1046_v51 = vmul.f32 %v969_v10, %v1724_v2  ;;  %v1047_v61 = vmul.f32 %v969_v10, %v1729_v4 }
 0x350   : > { %v984_v41 = vpop.permute.xlu1 %983  ;;  %v1120_v55 = vadd.f32 %v1048_v49, %v1046_v51  ;;  %v1141_v56 = vadd.f32 %v1049_v50, %v1047_v61 }
 0x351   : > { %v1052_v60 = vmul.f32 %v984_v41, %v1732_v5  ;;  %v1053_v8 = vmul.f32 %v984_v41, %v1735_v6 }
 0x353   : > { %v1079_v7 = vmax.f32 %v1048_v49, %v1052_v60  ;;  %v1100_v11 = vmax.f32 %v1049_v50, %v1053_v8 }
 0x354   : > { %v979_v48 = vpop.permute.xlu1 %978 }
 0x355   : > { %v1050_v52 = vmul.f32 %v979_v48, %v1718_v0  ;;  %v1051_v53 = vmul.f32 %v979_v48, %v1721_v1 }
 0x357   : > { %v1121_v57 = vadd.f32 %v1120_v55, %v1050_v52  ;;  %v1142_v58 = vadd.f32 %v1141_v56, %v1051_v53  ;;  %v1099_v55 = vmax.f32 %v1047_v61, %v1051_v53 }
 0x358   : > { %v994_v54 = vpop.permute.xlu1 %993 }
 0x359   : > { %v1056_v4 = vmul.f32 %v994_v54, %v1750_v12  ;;  %v1057_v0 = vmul.f32 %v994_v54, %v1753_v13  ;;  %v1122_v1 = vadd.f32 %v1121_v57, %v1052_v60  ;;  %v1143_v63 = vadd.f32 %v1142_v58, %v1053_v8 }
 0x35a   : > { %v1078_v54 = vmax.f32 %v1046_v51, %v1050_v52 }
 0x35b   : > { %v1081_v22 = vmax.f32 %v1079_v7, %v1056_v4 }
 0x35c   : > { %v989_v59 = vpop.permute.xlu1 %988  ;;  %v1014_v62 = vpop.permute.xlu0 %1013 }
 0x35d   : > { %v1054_v9 = vmul.f32 %v989_v59, %v1756_v14  ;;  %v1055_v2 = vmul.f32 %v989_v59, %v1759_v15  ;;  %v1102_v14 = vmax.f32 %v1100_v11, %v1057_v0  ;;  %v1064_v40 = vmul.f32 %v1014_v62, %v1782_v24 }
 0x35e   : > { %v1065_v42 = vmul.f32 %v1014_v62, %v1785_v25 }
 0x35f   : > { %v1123_v16 = vadd.f32 %v1122_v1, %v1054_v9  ;;  %v1144_v17 = vadd.f32 %v1143_v63, %v1055_v2  ;;  %v1080_v59 = vmax.f32 %v1078_v54, %v1054_v9  ;;  %v1101_v60 = vmax.f32 %v1099_v55, %v1055_v2 }
 0x360   : > { %v1004_v3 = vpop.permute.xlu1 %1003  ;;  %v1024_v23 = vpop.permute.xlu0 %1023 }
 0x361   : > { %v1060_v5 = vmul.f32 %v1004_v3, %v1766_v18  ;;  %v1061_v6 = vmul.f32 %v1004_v3, %v1769_v19  ;;  %v1124_v34 = vadd.f32 %v1123_v16, %v1056_v4  ;;  %v1145_v35 = vadd.f32 %v1144_v17, %v1057_v0 }
 0x362   : > { %v1068_v56 = vmul.f32 %v1024_v23, %v1798_v30  ;;  %v1069_v24 = vmul.f32 %v1024_v23, %v1801_v31 }
 0x363   : > { %v1083_v13 = vmax.f32 %v1081_v22, %v1060_v5  ;;  %v1104_v29 = vmax.f32 %v1102_v14, %v1061_v6 }
 0x364   : > { %v999_v15 = vpop.permute.xlu1 %998 }
 0x365   : > { %v1058_v28 = vmul.f32 %v999_v15, %v1772_v20  ;;  %v1059_v12 = vmul.f32 %v999_v15, %v1775_v21  ;;  %v1085_v48 = vmax.f32 %v1083_v13, %v1064_v40  ;;  %v1106_v49 = vmax.f32 %v1104_v29, %v1065_v42  ;;  %v1034_v20 = vpop.permute.xlu0 %1033 }
 0x366   : > { %v1072_v61 = vmul.f32 %v1034_v20, %v1814_v36  ;;  %v1073_v30 = vmul.f32 %v1034_v20, %v1817_v37 }
 0x367   : > { %v1125_v47 = vadd.f32 %v1124_v34, %v1058_v28  ;;  %v1146_v18 = vadd.f32 %v1145_v35, %v1059_v12  ;;  %v1087_v8 = vmax.f32 %v1085_v48, %v1068_v56  ;;  %v1108_v62 = vmax.f32 %v1106_v49, %v1069_v24 }
 0x368   : > { %v1009_v41 = vpop.permute.xlu1 %1008  ;;  %v1082_v1 = vmax.f32 %v1080_v59, %v1058_v28  ;;  %v1103_v51 = vmax.f32 %v1101_v60, %v1059_v12 }
 0x369   : > { %v1062_v19 = vmul.f32 %v1009_v41, %v1788_v26  ;;  %v1063_v10 = vmul.f32 %v1009_v41, %v1791_v27  ;;  %v1126_v50 = vadd.f32 %v1125_v47, %v1060_v5  ;;  %v1147_v21 = vadd.f32 %v1146_v18, %v1061_v6 }
 0x36a   : > { %v1044_v31 = vpop.permute.xlu0 %1043  ;;  %v1089_v3 = vmax.f32 %v1087_v8, %v1072_v61  ;;  %v1110_v7 = vmax.f32 %v1108_v62, %v1073_v30 }
 0x36b   : > { %v1127_v57 = vadd.f32 %v1126_v50, %v1062_v19  ;;  %v1148_v25 = vadd.f32 %v1147_v21, %v1063_v10  ;;  %v1084_v9 = vmax.f32 %v1082_v1, %v1062_v19  ;;  %v1105_v2 = vmax.f32 %v1103_v51, %v1063_v10 }
 0x36c   : > { %v1019_v58 = vpop.permute.xlu1 %1018  ;;  %v1076_v17 = vmul.f32 %v1044_v31, %v1831_v43  ;;  %v1077_v36 = vmul.f32 %v1044_v31, %v1834_v44 }
 0x36d   : > { %v1066_v26 = vmul.f32 %v1019_v58, %v1804_v32  ;;  %v1067_v27 = vmul.f32 %v1019_v58, %v1807_v33  ;;  %v1128_v4 = vadd.f32 %v1127_v57, %v1064_v40  ;;  %v1149_v0 = vadd.f32 %v1148_v25, %v1065_v42 }
 0x36e   : > { %v1091_v13 = vmax.f32 %v1089_v3, %v1076_v17  ;;  %v1112_v29 = vmax.f32 %v1110_v7, %v1077_v36 }
 0x36f   : > { %v1129_v52 = vadd.f32 %v1128_v4, %v1066_v26  ;;  %v1150_v53 = vadd.f32 %v1149_v0, %v1067_v27  ;;  %v1086_v5 = vmax.f32 %v1084_v9, %v1066_v26  ;;  %v1107_v37 = vmax.f32 %v1105_v2, %v1067_v27 }
 0x370   : > { %v1029_v63 = vpop.permute.xlu1 %1028 }
 0x371   : > { %v1070_v32 = vmul.f32 %v1029_v63, %v1820_v38  ;;  %v1071_v33 = vmul.f32 %v1029_v63, %v1823_v39  ;;  %v1130_v11 = vadd.f32 %v1129_v52, %v1068_v56  ;;  %v1151_v16 = vadd.f32 %v1150_v53, %v1069_v24 }
 0x373   : > { %v1131_v6 = vadd.f32 %v1130_v11, %v1070_v32  ;;  %v1152_v22 = vadd.f32 %v1151_v16, %v1071_v33  ;;  %v1088_v23 = vmax.f32 %v1086_v5, %v1070_v32  ;;  %v1109_v15 = vmax.f32 %v1107_v37, %v1071_v33 }
 0x374   : > { %v1039_v14 = vpop.permute.xlu1 %1038 }
 0x375   : > { %v1074_v28 = vmul.f32 %v1039_v14, %v1837_v45  ;;  %v1075_v38 = vmul.f32 %v1039_v14, %v1840_v46  ;;  %v1132_v39 = vadd.f32 %v1131_v6, %v1072_v61  ;;  %v1153_v12 = vadd.f32 %v1152_v22, %v1073_v30 }
 0x377   : > { %v1090_v34 = vmax.f32 %v1088_v23, %v1074_v28  ;;  %v1111_v35 = vmax.f32 %v1109_v15, %v1075_v38  ;;  %v1133_v43 = vadd.f32 %v1132_v39, %v1074_v28  ;;  %v1154_v40 = vadd.f32 %v1153_v12, %v1075_v38 }
 0x379   : > { %v1092_v44 = vmax.f32 %v1090_v34, %v1091_v13  ;;  %v1113_v42 = vmax.f32 %v1111_v35, %v1112_v29  ;;  %v1134_v47 = vadd.f32 %v1133_v43, %v1076_v17  ;;  %v1155_v18 = vadd.f32 %v1154_v40, %v1077_v36 }
 0x37b   : > { %v1093_v41 = vrot.slane %v1092_v44, 4  ;;  %v1114_v19 = vrot.slane %v1113_v42, 4  ;;  %v1135_v10 = vrot.slane %v1134_v47, 4  ;;  %v1156_v48 = vrot.slane %v1155_v18, 4 }
 0x37d   : > { %v1094_v49 = vmax.f32 %v1092_v44, %v1093_v41  ;;  %v1115_v45 = vmax.f32 %v1113_v42, %v1114_v19  ;;  %v1136_v20 = vadd.f32 %v1135_v10, %v1134_v47  ;;  %v1157_v46 = vadd.f32 %v1156_v48, %v1155_v18 }
 0x37f   : > { %v1095_v50 = vrot.slane %v1094_v49, 2  ;;  %v1116_v21 = vrot.slane %v1115_v45, 2  ;;  %v1137_v54 = vrot.slane %v1136_v20, 2  ;;  %v1158_v55 = vrot.slane %v1157_v46, 2 }
 0x381   : > { %v1096_v56 = vmax.f32 %v1094_v49, %v1095_v50  ;;  %v1117_v24 = vmax.f32 %v1115_v45, %v1116_v21  ;;  %v1138_v57 = vadd.f32 %v1137_v54, %v1136_v20  ;;  %v1159_v25 = vadd.f32 %v1158_v55, %v1157_v46 }
 0x383   : > { %v1097_v58 = vrot.slane %v1096_v56, 1  ;;  %v1118_v59 = vrot.slane %v1117_v24, 1  ;;  %v1139_v60 = vrot.slane %v1138_v57, 1  ;;  %v1160_v26 = vrot.slane %v1159_v25, 1 }
 0x385   : > { %v1140_v27 = vadd.f32 %v1139_v60, %v1138_v57  ;;  %v1161_v8 = vadd.f32 %v1160_v26, %v1159_v25  ;;  %v1098_v62 = vmax.f32 %v1096_v56, %v1097_v58  ;;  %v1119_v4 = vmax.f32 %v1117_v24, %v1118_v59 }
 0x387   : > { %v1162_v0 = vmul.f32 0.0078125, %v1140_v27  ;;  %v1163_v1 = vmul.f32 0.0078125, %v1161_v8 }
 0x389   : > { %v1165_v51 = vsel %vm1164_vm3, %v1098_v62, %v1162_v0  ;;  %v1166_v61 = vsel %vm1164_vm3, %v1119_v4, %v1163_v1 }
 0x38a   : > { %v1169_v30 = vcombine.low %v1165_v51, %v1166_v61 }
 0x38c   : > { %1326 = vst.sshfl [vmem:[%s210_s12] sm:$0x33 pattern:$0x76325410] %v1169_v30 }
 0x38d PF: > { %s15_s15 = sadd.s32 1, %s1670_s15  }
 0x38e   : > { %p12_p4 = scmp.ge.s32.totalorder %s15_s15, 4  }
 0x390   :  { %14 = sbr.rel (!%p12_p4) target bundleno = 1 (0x1), region = 74 }

// kernel: cbam_forward.4
= control target key start
LH: loop header
LB: loop body
LE: loop exit
PB: predicated region body
PF: predicated region fallthrough
CT: control target
= control target key end

     0   :  { %s3409_s0 = inlined_call_operand.vmem [shape: f32[2,2,22,22], index: 0, kind: input, shape index: {}]   ;;  %s3410_s1 = inlined_call_operand.vmem [shape: f32[98], index: 1, kind: input, shape index: {}]   ;;  %s3411_s2 = inlined_call_operand.<no memory space> [shape: f32[1], index: 2, kind: input, shape index: {}]   ;;  %s3412_s3 = inlined_call_operand.vmem [shape: f32[2,16,16], index: 3, kind: output, shape index: {}]  }
   0x1   :  { %8 = sst [smem:[#allocation2]] %s3411_s2 }
   0x2   :  { %9 = vsyncpa [#allocation4], 0  ;;  %s2387_s14 = smov 0  }
   0x3 LB: > { %s2178_s15 = sadd.s32 4294967295, %s2355_s14   ;;  %p2180_p0 = scmp.ge.s32.totalorder %s2355_s14, 1  ;;  %s2355_s14 = sphi %s2387_s14, %s15_s14  }
   0x4   : > { %p114_p1 = scmp.lt.s32.totalorder %s2355_s14, 3  ;;  %s127_s18 = sshll.u32 %s3410_s1, 4  ;;  %s128_s18 = int_to_ptr.vmem [resolvable:$true] %s127_s18 }
   0x5   : > { %p2299_p3 = scmp.eq.s32.totalorder %s2178_s15, 0  ;;  %s2330_s19 = scalar_lea.vmem %s128_s18, 16 }
   0x6   : > { %p2398_p2 = pnand %p2180_p0, %p114_p1  ;;  %p2331_p6 = scmp.ne.s32.totalorder %s128_s18, %s2330_s19 }
   0x7   : > { %p2338_p10 = scmp.lt.s32.totalorder %s128_s18, %s128_s18  ;;  %p2339_p11 = scmp.lt.s32.totalorder %s2330_s19, %s2330_s19 }
   0x8   : > { %p2295_p4 = pneg %p2398_p2 }
   0x9   : > { %p2340_p12 = por %p2339_p11, %p2338_p10 }
   0xa   : > { %p2296_p5 = pnand %p2299_p3, %p2295_p4 }
   0xc   : > { %p2332_p7 = pneg %p2296_p5 }
   0xe   : > { %p2333_p8 = pnand %p2332_p7, %p2331_p6 }
  0x10   : > { %p2334_p9 = pneg %p2333_p8 }
  0x12   : > { %p2341_p13 = pnand %p2340_p12, %p2334_p9 }
  0x14   : > { %2344 = shalt.err (!%p2341_p13)
}
  0x15   : > { %s2357_s20 = smov [#allocation3]   ;;  %151 = sbr.rel (%p2398_p2) target bundleno = 517 (0x205), region = 32 }
  0x16   : > { %2298 = dma.vmem_to_smem (!%p2296_p5), %s128_s18, 16, %s2357_s20, [#allocation4]  }
  0x1c   : > { %2350 = dma.done.wait (%p2299_p3), [#allocation4], 16  }
  0x1d   : > { %2352 = vsyncadd (%p2299_p3), [#allocation4], 4294967280 }
  0x1e   : > { %157 = sfence }
  0x1f   : > { %p176_p0 = scmp.lt.s32.totalorder %s2178_s15, 1  ;;  %s2189_s21 = sld [smem:[#allocation3 + $0x2]]  ;;  %vm292_vm0 = vcmask 1046528   ;;  %vm436_vm1 = vcmask 1045504   ;;  %vm580_vm2 = vcmask 1044480   ;;  %vm724_vm3 = vcmask 1043456  }
  0x20   : > { %s2188_s22 = sld [smem:[#allocation3 + $0x1]]  ;;  %s2190_s23 = sld [smem:[#allocation3 + $0x3]]  ;;  %vm868_vm4 = vcmask 1042432   ;;  %vm1012_vm5 = vcmask 1041408   ;;  %vm2108_vm6 = vcmask 130048  }
  0x21   : > { %s3415_s15 = smov (!%p176_p0, %s2178_s15), 1  ;;  %s2191_s28 = sld [smem:[#allocation3 + $0x4]] }
  0x22   : > { %s2290_s24 = smul.u32 48, %s3415_s15  ;;  %s2358_s29 = smov 126  }
  0x23   : > { %s2359_s30 = smov 127   ;;  %s2192_s4 = sld [smem:[#allocation3 + $0x5]] }
  0x24   : > { %s2415_s27 = scalar_lea.vmem %s3409_s0, %s2290_s24  ;;  %s2195_s5 = sld [smem:[#allocation3 + $0x8]] }
  0x25   : > { %v215_v0 = vstv %s2189_s21  ;;  %v2418_v1 = vld [vmem:[%s2415_s27] sm:$0xff]  ;;  %v2421_v2 = vld [vmem:[%s2415_s27 + $0x8] sm:$0xff]  ;;  %s2193_s6 = sld [smem:[#allocation3 + $0x6]]  ;;  %s2196_s7 = sld [smem:[#allocation3 + $0x9]]  ;;  %v2438_v15 = vld [vmem:[%s2415_s27 + $0x10] sm:$0x3f] }
  0x26   : > { %v201_v3 = vstv %s2188_s22  ;;  %v216_v4 = vmul.f32 %v215_v0, %v2418_v1  ;;  %v217_v6 = vmul.f32 %v215_v0, %v2421_v2  ;;  %v229_v8 = vstv %s2190_s23  ;;  %s2360_s8 = smov 125   ;;  %s2197_s9 = sld [smem:[#allocation3 + $0xa]] }
  0x27   : > { %v202_v5 = vmul.f32 %v201_v3, %v2418_v1  ;;  %v203_v7 = vmul.f32 %v201_v3, %v2421_v2  ;;  %v231_v9 = vmul.f32 %v229_v8, %v2421_v2  ;;  %v230_v10 = vmul.f32 %v229_v8, %v2418_v1  ;;  %s2361_s10 = smov 124   ;;  %s2198_s11 = sld [smem:[#allocation3 + $0xb]] }
  0x28   : > { %220 = vrot.lane.b32.xlu1 %v216_v4, %s2358_s29  ;;  %v243_v11 = vstv %s2191_s28  ;;  %s2362_s12 = smov 123   ;;  %s2199_s13 = sld [smem:[#allocation3 + $0xc]] }
  0x29   : > { %206 = vrot.lane.b32.xlu0 %v202_v5, %s2359_s30  ;;  %v245_v12 = vmul.f32 %v243_v11, %v2421_v2  ;;  %v244_v13 = vmul.f32 %v243_v11, %v2418_v1  ;;  %v257_v14 = vstv %s2192_s4  ;;  %s2363_s16 = smov 122   ;;  %s2200_s17 = sld [smem:[#allocation3 + $0xd]] }
  0x2a   : > { %v303_v16 = vstv %s2195_s5  ;;  %v259_v17 = vmul.f32 %v257_v14, %v2421_v2  ;;  %v258_v18 = vmul.f32 %v257_v14, %v2418_v1  ;;  %s2202_s18 = sld [smem:[#allocation3 + $0xf]]  ;;  %s2203_s2 = sld [smem:[#allocation3 + $0x10]] }
  0x2b   : > { %v271_v19 = vstv %s2193_s6  ;;  %v305_v20 = vmul.f32 %v303_v16, %v2421_v2  ;;  %v306_v21 = vmul.f32 %v303_v16, %v2438_v15  ;;  %v304_v22 = vmul.f32 %v303_v16, %v2418_v1  ;;  %s2204_s19 = sld [smem:[#allocation3 + $0x11]]  ;;  %s2205_s20 = sld [smem:[#allocation3 + $0x12]] }
  0x2c   : > { %222 = vrot.lane.b32.xlu1 %v217_v6, %s2358_s29  ;;  %v324_v23 = vstv %s2196_s7  ;;  %v273_v24 = vmul.f32 %v271_v19, %v2421_v2  ;;  %v272_v25 = vmul.f32 %v271_v19, %v2418_v1  ;;  %v345_v29 = vstv %s2197_s9  ;;  %s2206_s21 = sld [smem:[#allocation3 + $0x13]]  ;;  %s2207_s22 = sld [smem:[#allocation3 + $0x14]] }
  0x2d   : > { %208 = vrot.lane.b32.xlu0 %v203_v7, %s2359_s30  ;;  %v326_v26 = vmul.f32 %v324_v23, %v2421_v2  ;;  %v327_v27 = vmul.f32 %v324_v23, %v2438_v15  ;;  %v325_v28 = vmul.f32 %v324_v23, %v2418_v1  ;;  %v311_v30 = vrot.slane %v305_v20, 1  ;;  %s2209_s23 = sld [smem:[#allocation3 + $0x16]]  ;;  %s2210_s24 = sld [smem:[#allocation3 + $0x17]] }
  0x2e   : > { %v313_v31 = vrot.slane %v306_v21, 1  ;;  %v310_v32 = vrot.slane %v304_v22, 1  ;;  %v347_v33 = vmul.f32 %v345_v29, %v2421_v2  ;;  %v348_v34 = vmul.f32 %v345_v29, %v2438_v15  ;;  %s2211_s25 = sld [smem:[#allocation3 + $0x18]]  ;;  %s2212_s26 = sld [smem:[#allocation3 + $0x19]] }
  0x2f   : > { %v332_v35 = vrot.slane %v326_v26, 1  ;;  %v334_v36 = vrot.slane %v327_v27, 1  ;;  %v331_v37 = vrot.slane %v325_v28, 1  ;;  %v346_v40 = vmul.f32 %v345_v29, %v2418_v1  ;;  %s2213_s28 = sld [smem:[#allocation3 + $0x1a]]  ;;  %s2214_s4 = sld [smem:[#allocation3 + $0x1b]] }
  0x30   : > { %236 = vrot.lane.b32.xlu1 %v231_v9, %s2360_s8  ;;  %v314_v38 = vsel %vm292_vm0, %v311_v30, %v313_v31  ;;  %v312_v39 = vsel %vm292_vm0, %v310_v32, %v311_v30  ;;  %v366_v41 = vstv %s2198_s11  ;;  %v353_v42 = vrot.slane %v347_v33, 1  ;;  %s2216_s5 = sld [smem:[#allocation3 + $0x1d]]  ;;  %s2217_s6 = sld [smem:[#allocation3 + $0x1e]] }
  0x31   : > { %234 = vrot.lane.b32.xlu0 %v230_v10, %s2360_s8  ;;  %v355_v43 = vrot.slane %v348_v34, 1  ;;  %v368_v44 = vmul.f32 %v366_v41, %v2421_v2  ;;  %v369_v45 = vmul.f32 %v366_v41, %v2438_v15  ;;  %v367_v46 = vmul.f32 %v366_v41, %v2418_v1  ;;  %s2218_s7 = sld [smem:[#allocation3 + $0x1f]]  ;;  %s2219_s9 = sld [smem:[#allocation3 + $0x20]] }
  0x32   : > { %v335_v47 = vsel %vm292_vm0, %v332_v35, %v334_v36  ;;  %v333_v48 = vsel %vm292_vm0, %v331_v37, %v332_v35  ;;  %v352_v49 = vrot.slane %v346_v40, 1  ;;  %v387_v50 = vstv %s2199_s13  ;;  %s2220_s11 = sld [smem:[#allocation3 + $0x21]]  ;;  %s2221_s13 = sld [smem:[#allocation3 + $0x22]] }
  0x33   : > { %v356_v51 = vsel %vm292_vm0, %v353_v42, %v355_v43  ;;  %v374_v52 = vrot.slane %v368_v44, 1  ;;  %v376_v53 = vrot.slane %v369_v45, 1  ;;  %v373_v54 = vrot.slane %v367_v46, 1 }
  0x34   : > { %250 = vrot.lane.b32.xlu1 %v245_v12, %s2361_s10  ;;  %v408_v55 = vstv %s2200_s17  ;;  %v354_v56 = vsel %vm292_vm0, %v352_v49, %v353_v42  ;;  %v389_v57 = vmul.f32 %v387_v50, %v2421_v2  ;;  %v390_v58 = vmul.f32 %v387_v50, %v2438_v15  ;;  %s2223_s17 = sld [smem:[#allocation3 + $0x24]] }
  0x35   : > { %248 = vrot.lane.b32.xlu0 %v244_v13, %s2361_s10  ;;  %v388_v59 = vmul.f32 %v387_v50, %v2418_v1  ;;  %v410_v60 = vmul.f32 %v408_v55, %v2421_v2  ;;  %v411_v61 = vmul.f32 %v408_v55, %v2438_v15  ;;  %v377_v62 = vsel %vm292_vm0, %v374_v52, %v376_v53 }
  0x36   : > { %v375_v63 = vsel %vm292_vm0, %v373_v54, %v374_v52  ;;  %v409_v0 = vmul.f32 %v408_v55, %v2418_v1  ;;  %v395_v3 = vrot.slane %v389_v57, 1  ;;  %v397_v4 = vrot.slane %v390_v58, 1 }
  0x37   : > { %v394_v5 = vrot.slane %v388_v59, 1  ;;  %v447_v6 = vstv %s2202_s18  ;;  %v416_v7 = vrot.slane %v410_v60, 1  ;;  %v418_v8 = vrot.slane %v411_v61, 1  ;;  %s2224_s18 = sld [smem:[#allocation3 + $0x25]] }
  0x38   : > { %264 = vrot.lane.b32.xlu1 %v259_v17, %s2362_s12  ;;  %v415_v9 = vrot.slane %v409_v0, 1  ;;  %v449_v10 = vmul.f32 %v447_v6, %v2421_v2  ;;  %v450_v11 = vmul.f32 %v447_v6, %v2438_v15  ;;  %v468_v12 = vstv %s2203_s2  ;;  %s2225_s2 = sld [smem:[#allocation3 + $0x26]] }
  0x39   : > { %262 = vrot.lane.b32.xlu0 %v258_v18, %s2362_s12  ;;  %v398_v13 = vsel %vm292_vm0, %v395_v3, %v397_v4  ;;  %v396_v14 = vsel %vm292_vm0, %v394_v5, %v395_v3  ;;  %v448_v16 = vmul.f32 %v447_v6, %v2418_v1  ;;  %v470_v17 = vmul.f32 %v468_v12, %v2421_v2 }
  0x3a   : > { %v419_v18 = vsel %vm292_vm0, %v416_v7, %v418_v8  ;;  %v417_v19 = vsel %vm292_vm0, %v415_v9, %v416_v7  ;;  %v455_v20 = vrot.slane %v449_v10, 2  ;;  %v457_v21 = vrot.slane %v450_v11, 2 }
  0x3b   : > { %v454_v22 = vrot.slane %v448_v16, 2  ;;  %v471_v23 = vmul.f32 %v468_v12, %v2438_v15  ;;  %v476_v26 = vrot.slane %v470_v17, 2  ;;  %v510_v30 = vstv %s2205_s20  ;;  %s2227_s20 = sld [smem:[#allocation3 + $0x28]] }
  0x3c   : > { %278 = vrot.lane.b32.xlu1 %v273_v24, %s2363_s16  ;;  %v469_v24 = vmul.f32 %v468_v12, %v2418_v1  ;;  %v458_v27 = vsel %vm436_vm1, %v455_v20, %v457_v21  ;;  %v512_v35 = vmul.f32 %v510_v30, %v2421_v2  ;;  %v513_v36 = vmul.f32 %v510_v30, %v2438_v15 }
  0x3d   : > { %276 = vrot.lane.b32.xlu0 %v272_v25, %s2363_s16  ;;  %v489_v25 = vstv %s2204_s19  ;;  %v456_v31 = vsel %vm436_vm1, %v454_v22, %v455_v20  ;;  %v478_v32 = vrot.slane %v471_v23, 2  ;;  %v531_v43 = vstv %s2206_s21  ;;  %s2226_s19 = sld [smem:[#allocation3 + $0x27]]  ;;  %s2228_s21 = sld [smem:[#allocation3 + $0x29]] }
  0x3e   : > { %v491_v28 = vmul.f32 %v489_v25, %v2421_v2  ;;  %v492_v29 = vmul.f32 %v489_v25, %v2438_v15  ;;  %v475_v33 = vrot.slane %v469_v24, 2  ;;  %v490_v34 = vmul.f32 %v489_v25, %v2418_v1 }
  0x3f   : > { %v479_v40 = vsel %vm436_vm1, %v476_v26, %v478_v32  ;;  %v518_v44 = vrot.slane %v512_v35, 2  ;;  %v520_v45 = vrot.slane %v513_v36, 2  ;;  %v533_v50 = vmul.f32 %v531_v43, %v2421_v2 }
  0x40   : > { %317 = vrot.lane.b32.xlu1 %v314_v38, %s2359_s30  ;;  %v497_v37 = vrot.slane %v491_v28, 2  ;;  %v499_v38 = vrot.slane %v492_v29, 2  ;;  %v477_v41 = vsel %vm436_vm1, %v475_v33, %v476_v26  ;;  %v496_v42 = vrot.slane %v490_v34, 2 }
  0x41   : > { %315 = vrot.lane.b32.xlu0 %v312_v39, %s2359_s30  ;;  %v511_v39 = vmul.f32 %v510_v30, %v2418_v1  ;;  %v532_v52 = vmul.f32 %v531_v43, %v2418_v1  ;;  %v521_v53 = vsel %vm436_vm1, %v518_v44, %v520_v45  ;;  %v591_v57 = vstv %s2209_s23  ;;  %s2231_s23 = sld [smem:[#allocation3 + $0x2c]] }
  0x42   : > { %v500_v46 = vsel %vm436_vm1, %v497_v37, %v499_v38  ;;  %v498_v49 = vsel %vm436_vm1, %v496_v42, %v497_v37  ;;  %v539_v58 = vrot.slane %v533_v50, 2  ;;  %v594_v3 = vmul.f32 %v591_v57, %v2438_v15 }
  0x43   : > { %v538_v60 = vrot.slane %v532_v52, 2  ;;  %v612_v4 = vstv %s2210_s24  ;;  %v592_v8 = vmul.f32 %v591_v57, %v2418_v1  ;;  %v675_v32 = vstv %s2213_s28  ;;  %s2232_s24 = sld [smem:[#allocation3 + $0x2d]]  ;;  %s2683_s28 = sld [smem:[#allocation2]] }
  0x44   : > { %338 = vrot.lane.b32.xlu1 %v335_v47, %s2358_s29  ;;  %v517_v47 = vrot.slane %v511_v39, 2  ;;  %v614_v11 = vmul.f32 %v612_v4, %v2421_v2  ;;  %v615_v12 = vmul.f32 %v612_v4, %v2438_v15  ;;  %v601_v16 = vrot.slane %v594_v3, 3 }
  0x45   : > { %336 = vrot.lane.b32.xlu0 %v333_v48, %s2358_s29  ;;  %v552_v48 = vstv %s2207_s22  ;;  %v540_v6 = vsel %vm436_vm1, %v538_v60, %v539_v58  ;;  %v598_v17 = vrot.slane %v592_v8, 3  ;;  %v677_v37 = vmul.f32 %v675_v32, %v2421_v2  ;;  %s2230_s22 = sld [smem:[#allocation3 + $0x2b]] }
  0x46   : > { %v519_v54 = vsel %vm436_vm1, %v517_v47, %v518_v44  ;;  %v554_v55 = vmul.f32 %v552_v48, %v2421_v2  ;;  %v553_v61 = vmul.f32 %v552_v48, %v2418_v1  ;;  %v620_v20 = vrot.slane %v614_v11, 3 }
  0x47   : > { %v622_v21 = vrot.slane %v615_v12, 3  ;;  %v676_v45 = vmul.f32 %v675_v32, %v2418_v1  ;;  %v683_v47 = vrot.slane %v677_v37, 3 }
  0x48   : > { %359 = vrot.lane.b32.xlu1 %v356_v51, %s2360_s8  ;;  %v534_v51 = vmul.f32 %v531_v43, %v2438_v15  ;;  %v559_v7 = vrot.slane %v553_v61, 2 }
  0x49   : > { %357 = vrot.lane.b32.xlu0 %v354_v56, %s2360_s8  ;;  %v555_v56 = vmul.f32 %v552_v48, %v2438_v15  ;;  %v623_v29 = vsel %vm580_vm2, %v620_v20, %v622_v21 }
  0x4a   : > { %v541_v59 = vrot.slane %v534_v51, 2 }
  0x4b   : > { %v562_v0 = vrot.slane %v555_v56, 2 }
  0x4c   : > { %380 = vrot.lane.b32.xlu1 %v377_v62, %s2361_s10  ;;  %v593_v62 = vmul.f32 %v591_v57, %v2421_v2  ;;  %v542_v5 = vsel %vm436_vm1, %v539_v58, %v541_v59 }
  0x4d   : > { %378 = vrot.lane.b32.xlu0 %v375_v63, %s2361_s10  ;;  %v560_v63 = vrot.slane %v554_v55, 2 }
  0x4e   : > { %v599_v9 = vrot.slane %v593_v62, 3 }
  0x4f   : > { %v563_v10 = vsel %vm436_vm1, %v560_v63, %v562_v0 }
  0x50   : > { %401 = vrot.lane.b32.xlu1 %v398_v13, %s2362_s12  ;;  %v633_v13 = vstv %s2211_s25  ;;  %v602_v24 = vsel %vm580_vm2, %v599_v9, %v601_v16  ;;  %v600_v25 = vsel %vm580_vm2, %v598_v17, %v599_v9  ;;  %v798_v16 = vstv %s2219_s9  ;;  %s2670_s25 = sld [smem:[#allocation3]]  ;;  %s2763_s9 = sld [smem:[#allocation3 + $0x33]] }
  0x51   : > { %399 = vrot.lane.b32.xlu0 %v396_v14, %s2362_s12  ;;  %v561_v14 = vsel %vm436_vm1, %v559_v7, %v560_v63  ;;  %v636_v22 = vmul.f32 %v633_v13, %v2438_v15  ;;  %v634_v23 = vmul.f32 %v633_v13, %v2418_v1  ;;  %v756_v63 = vstv %s2217_s6  ;;  %s2727_s6 = sld [smem:[#allocation3 + $0x7]] }
  0x52   : > { %v759_v9 = vmul.f32 %v756_v63, %v2438_v15 }
  0x53   : > { %v643_v30 = vrot.slane %v636_v22, 3  ;;  %v800_v22 = vmul.f32 %v798_v16, %v2421_v2 }
  0x54   : > { %422 = vrot.lane.b32.xlu1 %v419_v18, %s2363_s16  ;;  %v613_v18 = vmul.f32 %v612_v4, %v2418_v1  ;;  %v766_v17 = vrot.slane %v759_v9, 4 }
  0x55   : > { %420 = vrot.lane.b32.xlu0 %v417_v19, %s2363_s16  ;;  %v635_v19 = vmul.f32 %v633_v13, %v2421_v2 }
  0x56   : > { %v619_v26 = vrot.slane %v613_v18, 3 }
  0x57   : > { %v641_v28 = vrot.slane %v635_v19, 3 }
  0x58   : > { %461 = vrot.lane.b32.xlu1 %v458_v27, %s2359_s30  ;;  %v654_v27 = vstv %s2212_s26  ;;  %v621_v33 = vsel %vm580_vm2, %v619_v26, %v620_v20  ;;  %s2233_s26 = sld [smem:[#allocation3 + $0x2e]] }
  0x59   : > { %459 = vrot.lane.b32.xlu0 %v456_v31, %s2359_s30  ;;  %v640_v31 = vrot.slane %v634_v23, 3  ;;  %v656_v34 = vmul.f32 %v654_v27, %v2421_v2  ;;  %v657_v35 = vmul.f32 %v654_v27, %v2438_v15  ;;  %v655_v36 = vmul.f32 %v654_v27, %v2418_v1 }
  0x5a   : > { %v644_v38 = vsel %vm580_vm2, %v641_v28, %v643_v30  ;;  %v801_v23 = vmul.f32 %v798_v16, %v2438_v15 }
  0x5b   : > { %v642_v39 = vsel %vm580_vm2, %v640_v31, %v641_v28  ;;  %v662_v42 = vrot.slane %v656_v34, 3  ;;  %v664_v43 = vrot.slane %v657_v35, 3  ;;  %v661_v44 = vrot.slane %v655_v36, 3 }
  0x5c   : > { %482 = vrot.lane.b32.xlu1 %v479_v40, %s2358_s29  ;;  %v678_v40 = vmul.f32 %v675_v32, %v2438_v15  ;;  %v806_v32 = vrot.slane %v800_v22, 4 }
  0x5d   : > { %480 = vrot.lane.b32.xlu0 %v477_v41, %s2358_s29  ;;  %v696_v41 = vstv %s2214_s4  ;;  %v665_v51 = vsel %vm580_vm2, %v662_v42, %v664_v43  ;;  %v663_v52 = vsel %vm580_vm2, %v661_v44, %v662_v42  ;;  %s2692_s4 = sld [smem:[#allocation3 + $0x2f]] }
  0x5e   : > { %v685_v48 = vrot.slane %v678_v40, 3  ;;  %v699_v50 = vmul.f32 %v696_v41, %v2438_v15 }
  0x60   : > { %503 = vrot.lane.b32.xlu1 %v500_v46, %s2360_s8  ;;  %v735_v46 = vstv %s2216_s5  ;;  %v686_v56 = vsel %vm580_vm2, %v683_v47, %v685_v48  ;;  %v706_v61 = vrot.slane %v699_v50, 3  ;;  %s2706_s5 = sld [smem:[#allocation3 + $0x30]] }
  0x61   : > { %501 = vrot.lane.b32.xlu0 %v498_v49, %s2360_s8  ;;  %v698_v49 = vmul.f32 %v696_v41, %v2421_v2  ;;  %v737_v55 = vmul.f32 %v735_v46, %v2421_v2  ;;  %v738_v58 = vmul.f32 %v735_v46, %v2438_v15  ;;  %v736_v59 = vmul.f32 %v735_v46, %v2418_v1 }
  0x63   : > { %v704_v57 = vrot.slane %v698_v49, 3  ;;  %v743_v0 = vrot.slane %v737_v55, 4  ;;  %v745_v3 = vrot.slane %v738_v58, 4  ;;  %v742_v4 = vrot.slane %v736_v59, 4 }
  0x64   : > { %524 = vrot.lane.b32.xlu1 %v521_v53, %s2361_s10  ;;  %v682_v53 = vrot.slane %v676_v45, 3 }
  0x65   : > { %522 = vrot.lane.b32.xlu0 %v519_v54, %s2361_s10  ;;  %v697_v54 = vmul.f32 %v696_v41, %v2418_v1  ;;  %v707_v7 = vsel %vm580_vm2, %v704_v57, %v706_v61  ;;  %v746_v12 = vsel %vm724_vm3, %v743_v0, %v745_v3  ;;  %v744_v13 = vsel %vm724_vm3, %v742_v4, %v743_v0 }
  0x66   : > { %v684_v60 = vsel %vm580_vm2, %v682_v53, %v683_v47  ;;  %v879_v47 = vstv %s2223_s17  ;;  %v921_v3 = vstv %s2225_s2  ;;  %s2805_s17 = sld [smem:[#allocation3 + $0x35]]  ;;  %s2820_s2 = sld [smem:[#allocation3 + $0x39]] }
  0x67   : > { %v703_v62 = vrot.slane %v697_v54, 3  ;;  %v881_v49 = vmul.f32 %v879_v47, %v2421_v2  ;;  %v882_v50 = vmul.f32 %v879_v47, %v2438_v15  ;;  %v922_v9 = vmul.f32 %v921_v3, %v2418_v1 }
  0x68   : > { %545 = vrot.lane.b32.xlu1 %v542_v5, %s2362_s12  ;;  %v758_v5 = vmul.f32 %v756_v63, %v2421_v2 }
  0x69   : > { %543 = vrot.lane.b32.xlu0 %v540_v6, %s2362_s12  ;;  %v777_v6 = vstv %s2218_s7  ;;  %v705_v8 = vsel %vm580_vm2, %v703_v62, %v704_v57  ;;  %v887_v58 = vrot.slane %v881_v49, 5  ;;  %v889_v59 = vrot.slane %v882_v50, 5  ;;  %s2748_s7 = sld [smem:[#allocation3 + $0x32]] }
  0x6a   : > { %v779_v11 = vmul.f32 %v777_v6, %v2421_v2  ;;  %v780_v19 = vmul.f32 %v777_v6, %v2438_v15  ;;  %v778_v20 = vmul.f32 %v777_v6, %v2418_v1  ;;  %v928_v22 = vrot.slane %v922_v9, 5 }
  0x6c   : > { %566 = vrot.lane.b32.xlu1 %v563_v10, %s2363_s16  ;;  %v757_v10 = vmul.f32 %v756_v63, %v2418_v1  ;;  %v785_v21 = vrot.slane %v779_v11, 4  ;;  %v787_v28 = vrot.slane %v780_v19, 4  ;;  %v890_v11 = vsel %vm868_vm4, %v887_v58, %v889_v59 }
  0x6d   : > { %564 = vrot.lane.b32.xlu0 %v561_v14, %s2363_s16  ;;  %v764_v14 = vrot.slane %v758_v5, 4 }
  0x6e   : > { %v763_v18 = vrot.slane %v757_v10, 4  ;;  %v788_v36 = vsel %vm724_vm3, %v785_v21, %v787_v28  ;;  %v942_v10 = vstv %s2226_s19  ;;  %v963_v28 = vstv %s2227_s20  ;;  %s2830_s19 = sld [smem:[#allocation3 + $0x37]]  ;;  %s2835_s20 = sld [smem:[#allocation3 + $0x3a]] }
  0x6f   : > { %v767_v26 = vsel %vm724_vm3, %v764_v14, %v766_v17  ;;  %v945_v19 = vmul.f32 %v942_v10, %v2438_v15 }
  0x70   : > { %605 = vrot.lane.b32.xlu1 %v602_v24, %s2359_s30  ;;  %v799_v24 = vmul.f32 %v798_v16, %v2418_v1  ;;  %v765_v27 = vsel %vm724_vm3, %v763_v18, %v764_v14  ;;  %v944_v18 = vmul.f32 %v942_v10, %v2421_v2 }
  0x71   : > { %603 = vrot.lane.b32.xlu0 %v600_v25, %s2359_s30  ;;  %v819_v25 = vstv %s2220_s11  ;;  %s2790_s11 = sld [smem:[#allocation3 + $0x34]] }
  0x72   : > { %v821_v30 = vmul.f32 %v819_v25, %v2421_v2  ;;  %v822_v31 = vmul.f32 %v819_v25, %v2438_v15  ;;  %v805_v34 = vrot.slane %v799_v24, 4  ;;  %v820_v35 = vmul.f32 %v819_v25, %v2418_v1 }
  0x74   : > { %626 = vrot.lane.b32.xlu1 %v623_v29, %s2358_s29  ;;  %v784_v29 = vrot.slane %v778_v20, 4  ;;  %v829_v40 = vrot.slane %v822_v31, 4  ;;  %v807_v42 = vsel %vm724_vm3, %v805_v34, %v806_v32  ;;  %v826_v43 = vrot.slane %v820_v35, 4 }
  0x75   : > { %624 = vrot.lane.b32.xlu0 %v621_v33, %s2358_s29  ;;  %v808_v33 = vrot.slane %v801_v23, 4  ;;  %v943_v23 = vmul.f32 %v942_v10, %v2418_v1  ;;  %v965_v34 = vmul.f32 %v963_v28, %v2421_v2  ;;  %v966_v35 = vmul.f32 %v963_v28, %v2438_v15 }
  0x76   : > { %v786_v37 = vsel %vm724_vm3, %v784_v29, %v785_v21  ;;  %v950_v29 = vrot.slane %v944_v18, 5 }
  0x77   : > { %v809_v41 = vsel %vm724_vm3, %v806_v32, %v808_v33  ;;  %v949_v33 = vrot.slane %v943_v23, 5 }
  0x78   : > { %647 = vrot.lane.b32.xlu1 %v644_v38, %s2360_s8  ;;  %v840_v38 = vstv %s2221_s13  ;;  %s2201_s13 = sld [smem:[#allocation3 + $0xe]] }
  0x79   : > { %645 = vrot.lane.b32.xlu0 %v642_v39, %s2360_s8  ;;  %v827_v39 = vrot.slane %v821_v30, 4  ;;  %v842_v44 = vmul.f32 %v840_v38, %v2421_v2  ;;  %v843_v45 = vmul.f32 %v840_v38, %v2438_v15  ;;  %v841_v46 = vmul.f32 %v840_v38, %v2418_v1 }
  0x7a   : > { %v952_v30 = vrot.slane %v945_v19, 5 }
  0x7b   : > { %v830_v48 = vsel %vm724_vm3, %v827_v39, %v829_v40  ;;  %v828_v53 = vsel %vm724_vm3, %v826_v43, %v827_v39  ;;  %v848_v54 = vrot.slane %v842_v44, 4  ;;  %v850_v55 = vrot.slane %v843_v45, 4 }
  0x7c   : > { %668 = vrot.lane.b32.xlu1 %v665_v51, %s2361_s10  ;;  %v880_v51 = vmul.f32 %v879_v47, %v2418_v1  ;;  %v953_v40 = vsel %vm868_vm4, %v950_v29, %v952_v30  ;;  %v1023_v44 = vstv %s2230_s22  ;;  %v971_v45 = vrot.slane %v965_v34, 5  ;;  %s2872_s22 = sld [smem:[#allocation3 + $0x3c]] }
  0x7d   : > { %666 = vrot.lane.b32.xlu0 %v663_v52, %s2361_s10  ;;  %v900_v52 = vstv %s2224_s18  ;;  %v851_v62 = vsel %vm724_vm3, %v848_v54, %v850_v55  ;;  %v1024_v55 = vmul.f32 %v1023_v44, %v2418_v1  ;;  %v193_v30 = vstv %s2683_s28  ;;  %s2817_s18 = sld [smem:[#allocation3 + $0x36]]  ;;  %s2947_s28 = sld [smem:[#allocation3 + $0x1c]] }
  0x7e   : > { %v902_v57 = vmul.f32 %v900_v52, %v2421_v2  ;;  %v903_v61 = vmul.f32 %v900_v52, %v2438_v15  ;;  %v901_v0 = vmul.f32 %v900_v52, %v2418_v1  ;;  %v1026_v52 = vmul.f32 %v1023_v44, %v2438_v15 }
  0x80   : > { %689 = vrot.lane.b32.xlu1 %v686_v56, %s2362_s12  ;;  %v847_v56 = vrot.slane %v841_v46, 4  ;;  %v908_v6 = vrot.slane %v902_v57, 5  ;;  %v907_v14 = vrot.slane %v901_v0, 5  ;;  %v973_v46 = vrot.slane %v966_v35, 5 }
  0x81   : > { %687 = vrot.lane.b32.xlu0 %v684_v60, %s2362_s12  ;;  %v886_v60 = vrot.slane %v880_v51, 5  ;;  %v1025_v51 = vmul.f32 %v1023_v44, %v2421_v2 }
  0x82   : > { %v849_v63 = vsel %vm724_vm3, %v847_v56, %v848_v54  ;;  %v909_v25 = vsel %vm868_vm4, %v907_v14, %v908_v6  ;;  %v974_v56 = vsel %vm868_vm4, %v971_v45, %v973_v46 }
  0x84   : > { %710 = vrot.lane.b32.xlu1 %v707_v7, %s2363_s16  ;;  %v923_v7 = vmul.f32 %v921_v3, %v2421_v2 }
  0x85   : > { %708 = vrot.lane.b32.xlu0 %v705_v8, %s2363_s16  ;;  %v924_v8 = vmul.f32 %v921_v3, %v2438_v15  ;;  %v1030_v3 = vrot.slane %v1024_v55, 6 }
  0x86   : > { %v929_v20 = vrot.slane %v923_v7, 5 }
  0x87   : > { %v931_v21 = vrot.slane %v924_v8, 5 }
  0x88   : > { %749 = vrot.lane.b32.xlu1 %v746_v12, %s2359_s30  ;;  %v888_v12 = vsel %vm868_vm4, %v886_v60, %v887_v58  ;;  %v930_v32 = vsel %vm868_vm4, %v928_v22, %v929_v20 }
  0x89   : > { %747 = vrot.lane.b32.xlu0 %v744_v13, %s2359_s30  ;;  %v910_v13 = vrot.slane %v903_v61, 5  ;;  %v932_v31 = vsel %vm868_vm4, %v929_v20, %v931_v21  ;;  %v1044_v61 = vstv %s2231_s23  ;;  %v1086_v21 = vstv %s2233_s26  ;;  %s2882_s23 = sld [smem:[#allocation3 + $0x15]]  ;;  %s2936_s26 = sld [smem:[#allocation3 + $0x40]] }
  0x8a   : > { %v1046_v8 = vmul.f32 %v1044_v61, %v2421_v2  ;;  %v1047_v9 = vmul.f32 %v1044_v61, %v2438_v15  ;;  %v1045_v10 = vmul.f32 %v1044_v61, %v2418_v1 }
  0x8b   : > { %v911_v24 = vsel %vm868_vm4, %v908_v6, %v910_v13  ;;  %v1065_v6 = vstv %s2232_s24  ;;  %v195_v13 = vstv %s2670_s25  ;;  %s2902_s24 = sld [smem:[#allocation3 + $0x3d]]  ;;  %s2914_s25 = sld [smem:[#allocation3 + $0x3e]] }
  0x8c   : > { %770 = vrot.lane.b32.xlu1 %v767_v26, %s2358_s29  ;;  %v1067_v19 = vmul.f32 %v1065_v6, %v2421_v2  ;;  %v1068_v20 = vmul.f32 %v1065_v6, %v2438_v15  ;;  %v1052_v22 = vrot.slane %v1046_v8, 6  ;;  %v1054_v23 = vrot.slane %v1047_v9, 6 }
  0x8d   : > { %768 = vrot.lane.b32.xlu0 %v765_v27, %s2358_s29  ;;  %v196_v34 = vmul.f32 %v195_v13, %v2418_v1 }
  0x8e   : > { %v1073_v35 = vrot.slane %v1067_v19, 6 }
  0x90   : > { %791 = vrot.lane.b32.xlu1 %v788_v36, %s2360_s8  ;;  %v964_v36 = vmul.f32 %v963_v28, %v2418_v1 }
  0x91   : > { %789 = vrot.lane.b32.xlu0 %v786_v37, %s2360_s8  ;;  %v984_v37 = vstv %s2228_s21  ;;  %s2852_s21 = sld [smem:[#allocation3 + $0x3b]] }
  0x92   : > { %v987_v43 = vmul.f32 %v984_v37, %v2438_v15  ;;  %v970_v47 = vrot.slane %v964_v36, 5  ;;  %v1075_v36 = vrot.slane %v1068_v20, 6  ;;  %v285_v20 = vstv %s2727_s6  ;;  %s2991_s6 = sld [smem:[#allocation3 + $0x43]] }
  0x94   : > { %812 = vrot.lane.b32.xlu1 %v809_v41, %s2361_s10  ;;  %v951_v41 = vsel %vm868_vm4, %v949_v33, %v950_v29  ;;  %v994_v54 = vrot.slane %v987_v43, 5  ;;  %v972_v57 = vsel %vm868_vm4, %v970_v47, %v971_v45  ;;  %v1089_v33 = vmul.f32 %v1086_v21, %v2438_v15 }
  0x95   : > { %810 = vrot.lane.b32.xlu0 %v807_v42, %s2361_s10  ;;  %v986_v42 = vmul.f32 %v984_v37, %v2421_v2  ;;  %v1107_v43 = vstv %s2692_s4  ;;  %s2949_s4 = sld [smem:[#allocation3 + $0x41]] }
  0x98   : > { %833 = vrot.lane.b32.xlu1 %v830_v48, %s2362_s12  ;;  %v985_v48 = vmul.f32 %v984_v37, %v2418_v1  ;;  %v1087_v37 = vmul.f32 %v1086_v21, %v2418_v1 }
  0x99   : > { %831 = vrot.lane.b32.xlu0 %v828_v53, %s2362_s12  ;;  %v992_v53 = vrot.slane %v986_v42, 5 }
  0x9a   : > { %v2622_v4 = vpop.permute.xlu1 %220  ;;  %v991_v58 = vrot.slane %v985_v48, 5  ;;  %v1096_v48 = vrot.slane %v1089_v33, 6 }
  0x9b   : > { %v2624_v5 = vpop.permute.xlu0 %206  ;;  %v995_v0 = vsel %vm868_vm4, %v992_v53, %v994_v54  ;;  %v1109_v54 = vmul.f32 %v1107_v43, %v2421_v2 }
  0x9c   : > { %854 = vrot.lane.b32.xlu1 %v851_v62, %s2363_s16  ;;  %v1031_v62 = vrot.slane %v1025_v51, 6  ;;  %v993_v7 = vsel %vm868_vm4, %v991_v58, %v992_v53  ;;  %v198_v51 = vadd.f32 %v196_v34, %v193_v30  ;;  %v1093_v53 = vrot.slane %v1087_v37, 6 }
  0x9d   : > { %852 = vrot.lane.b32.xlu0 %v849_v63, %s2363_s16  ;;  %v1033_v63 = vrot.slane %v1026_v52, 6  ;;  %v1076_v52 = vsel %vm1012_vm5, %v1073_v35, %v1075_v36  ;;  %v1128_v58 = vstv %s2706_s5  ;;  %s2976_s5 = sld [smem:[#allocation3 + $0x42]] }
  0x9e   : > { %v2633_v16 = vpop.permute.xlu1 %222  ;;  %v1032_v18 = vsel %vm1012_vm5, %v1030_v3, %v1031_v62  ;;  %v1131_v8 = vmul.f32 %v1128_v58, %v2438_v15  ;;  %v212_v9 = vadd.f32 %v2624_v5, %v198_v51 }
  0x9f   : > { %v2635_v17 = vpop.permute.xlu0 %208  ;;  %v1034_v14 = vsel %vm1012_vm5, %v1031_v62, %v1033_v63 }
  0xa0   : > { %893 = vrot.lane.b32.xlu1 %v890_v11, %s2359_s30  ;;  %v226_v5 = vadd.f32 %v2622_v4, %v212_v9 }
  0xa1   : > { %891 = vrot.lane.b32.xlu0 %v888_v12, %s2359_s30 }
  0xa2   : > { %v2644_v26 = vpop.permute.xlu1 %236 }
  0xa3   : > { %v2646_v27 = vpop.permute.xlu0 %234 }
  0xa4   : > { %914 = vrot.lane.b32.xlu1 %v911_v24, %s2358_s29  ;;  %v1051_v24 = vrot.slane %v1045_v10, 6  ;;  %v240_v34 = vadd.f32 %v2646_v27, %v226_v5 }
  0xa5   : > { %912 = vrot.lane.b32.xlu0 %v909_v25, %s2358_s29  ;;  %v1066_v25 = vmul.f32 %v1065_v6, %v2418_v1  ;;  %v1115_v6 = vrot.slane %v1109_v54, 6 }
  0xa6   : > { %v2655_v38 = vpop.permute.xlu1 %250 }
  0xa7   : > { %v2657_v39 = vpop.permute.xlu0 %248  ;;  %v1072_v42 = vrot.slane %v1066_v25, 6  ;;  %v288_v25 = vmul.f32 %v285_v20, %v2438_v15 }
  0xa8   : > { %935 = vrot.lane.b32.xlu1 %v932_v31, %s2360_s8  ;;  %v197_v31 = vmul.f32 %v195_v13, %v2421_v2  ;;  %v1129_v13 = vmul.f32 %v1128_v58, %v2418_v1 }
  0xa9   : > { %933 = vrot.lane.b32.xlu0 %v930_v32, %s2360_s8  ;;  %v1088_v32 = vmul.f32 %v1086_v21, %v2421_v2  ;;  %v1074_v55 = vsel %vm1012_vm5, %v1072_v42, %v1073_v35  ;;  %v296_v27 = vrot.slane %v288_v25, 1 }
  0xaa   : > { %v2666_v49 = vpop.permute.xlu1 %264  ;;  %v199_v46 = vadd.f32 %v197_v31, %v193_v30  ;;  %v2768_v30 = vld [vmem:[%s2415_s27] sm:$0xff] }
  0xab   : > { %v2668_v50 = vpop.permute.xlu0 %262  ;;  %v1094_v47 = vrot.slane %v1088_v32, 6  ;;  %v286_v31 = vmul.f32 %v2768_v30, %v285_v20 }
  0xac   : > { %956 = vrot.lane.b32.xlu1 %v953_v40, %s2361_s10  ;;  %v1055_v40 = vsel %vm1012_vm5, %v1052_v22, %v1054_v23  ;;  %v213_v63 = vadd.f32 %v2635_v17, %v199_v46 }
  0xad   : > { %954 = vrot.lane.b32.xlu0 %v951_v41, %s2361_s10  ;;  %v1053_v41 = vsel %vm1012_vm5, %v1051_v24, %v1052_v22  ;;  %v1095_v3 = vsel %vm1012_vm5, %v1093_v53, %v1094_v47  ;;  %v1138_v22 = vrot.slane %v1131_v8, 6  ;;  %v1135_v24 = vrot.slane %v1129_v13, 6 }
  0xae   : > { %v2679_v59 = vpop.permute.xlu1 %278  ;;  %v227_v19 = vadd.f32 %v2633_v16, %v213_v63  ;;  %v287_v16 = vmul.f32 %v285_v20, %v2421_v2  ;;  %v293_v42 = vrot.slane %v286_v31, 1  ;;  %v1169_v53 = vstv %s2763_s9  ;;  %v2862_v31 = vld [vmem:[%s2415_s27 + $0x28] sm:$0x3f]  ;;  %s3018_s9 = sld [smem:[#allocation3 + $0x45]] }
  0xaf   : > { %v2681_v60 = vpop.permute.xlu0 %276 }
  0xb0   : > { %977 = vrot.lane.b32.xlu1 %v974_v56, %s2362_s12  ;;  %v1110_v56 = vmul.f32 %v1107_v43, %v2438_v15  ;;  %v241_v33 = vadd.f32 %v2644_v26, %v227_v19  ;;  %v254_v15 = vadd.f32 %v2657_v39, %v240_v34  ;;  %v294_v26 = vrot.slane %v287_v16, 1  ;;  %v2842_v19 = vld [vmem:[%s2415_s27 + $0x10] sm:$0x3f] }
  0xb1   : > { %975 = vrot.lane.b32.xlu0 %v972_v57, %s2362_s12  ;;  %v1108_v57 = vmul.f32 %v1107_v43, %v2418_v1 }
  0xb2   : > { %v2694_v11 = vpop.permute.xlu1 %317  ;;  %v1117_v10 = vrot.slane %v1110_v56, 6  ;;  %v255_v35 = vadd.f32 %v2655_v38, %v241_v33  ;;  %v268_v39 = vadd.f32 %v2668_v50, %v254_v15  ;;  %v295_v50 = vsel %vm292_vm0, %v293_v42, %v294_v26 }
  0xb3   : > { %v2696_v12 = vpop.permute.xlu0 %315  ;;  %v1114_v17 = vrot.slane %v1108_v57, 6 }
  0xb4   : > { %998 = vrot.lane.b32.xlu1 %v995_v0, %s2363_s16  ;;  %v1097_v0 = vsel %vm1012_vm5, %v1094_v47, %v1096_v48  ;;  %v1118_v23 = vsel %vm1012_vm5, %v1115_v6, %v1117_v10  ;;  %v269_v38 = vadd.f32 %v2666_v49, %v255_v35  ;;  %v297_v49 = vsel %vm292_vm0, %v294_v26, %v296_v27 }
  0xb5   : > { %996 = vrot.lane.b32.xlu0 %v993_v7, %s2363_s16  ;;  %v1130_v7 = vmul.f32 %v1128_v58, %v2421_v2  ;;  %v1116_v1 = vsel %vm1012_vm5, %v1114_v17, %v1115_v6  ;;  %v1155_v2 = vstv %s2748_s7  ;;  %v1183_v58 = vstv %s2790_s11  ;;  %v2838_v17 = vld [vmem:[%s2415_s27 + $0x8] sm:$0xff]  ;;  %s3001_s7 = sld [smem:[#allocation3 + $0x44]]  ;;  %s3036_s11 = sld [smem:[#allocation3 + $0x23]] }
  0xb6   : > { %v2708_v28 = vpop.permute.xlu1 %338  ;;  %v283_v51 = vadd.f32 %v2679_v59, %v269_v38  ;;  %v1197_v10 = vstv %s2805_s17  ;;  %v1277_v38 = vstv %s2835_s20  ;;  %s3059_s17 = sld [smem:[#allocation3 + $0x48]]  ;;  %s3101_s20 = sld [smem:[#allocation3 + $0x4b]] }
  0xb7   : > { %v2710_v29 = vpop.permute.xlu0 %336  ;;  %v1136_v21 = vrot.slane %v1130_v7, 6 }
  0xb8   : > { %1037 = vrot.lane.b32.xlu1 %v1034_v14, %s2359_s30 }
  0xb9   : > { %1035 = vrot.lane.b32.xlu0 %v1032_v18, %s2359_s30  ;;  %v1139_v36 = vsel %vm1012_vm5, %v1136_v21, %v1138_v22  ;;  %v1137_v37 = vsel %vm1012_vm5, %v1135_v24, %v1136_v21  ;;  %v1211_v24 = vstv %s2817_s18  ;;  %s3066_s18 = sld [smem:[#allocation3 + $0x49]] }
  0xba   : > { %v2723_v44 = vpop.permute.xlu1 %359 }
  0xbb   : > { %v2725_v45 = vpop.permute.xlu0 %357 }
  0xbc   : > { %1058 = vrot.lane.b32.xlu1 %v1055_v40, %s2358_s29  ;;  %v2785_v40 = vld [vmem:[%s2415_s27 + $0x20] sm:$0xff] }
  0xbd   : > { %1056 = vrot.lane.b32.xlu0 %v1053_v41, %s2358_s29  ;;  %v2788_v41 = vld [vmem:[%s2415_s27 + $0x18] sm:$0xff]  ;;  %v1157_v47 = vmul.f32 %v1155_v2, %v2785_v40  ;;  %v1171_v56 = vmul.f32 %v1169_v53, %v2785_v40  ;;  %v1185_v6 = vmul.f32 %v1183_v58, %v2785_v40 }
  0xbe   : > { %v2737_v61 = vpop.permute.xlu1 %380  ;;  %v1156_v48 = vmul.f32 %v1155_v2, %v2788_v41  ;;  %v1170_v59 = vmul.f32 %v1169_v53, %v2788_v41  ;;  %v1184_v7 = vmul.f32 %v1183_v58, %v2788_v41 }
  0xbf   : > { %v2739_v62 = vpop.permute.xlu0 %378 }
  0xc0   : > { %1079 = vrot.lane.b32.xlu1 %v1076_v52, %s2360_s8  ;;  %v282_v52 = vadd.f32 %v2681_v60, %v268_v39  ;;  %v301_v60 = vadd.f32 %v297_v49, %v283_v51 }
  0xc1   : > { %1077 = vrot.lane.b32.xlu0 %v1074_v55, %s2360_s8 }
  0xc2   : > { %v2752_v14 = vpop.permute.xlu1 %401  ;;  %v300_v57 = vadd.f32 %v295_v50, %v282_v52  ;;  %v322_v8 = vadd.f32 %v2694_v11, %v301_v60  ;;  %v1279_v50 = vmul.f32 %v1277_v38, %v2785_v40 }
  0xc3   : > { %v2754_v18 = vpop.permute.xlu0 %399 }
  0xc4   : > { %1100 = vrot.lane.b32.xlu1 %v1097_v0, %s2361_s10  ;;  %v321_v9 = vadd.f32 %v2696_v12, %v300_v57  ;;  %v343_v12 = vadd.f32 %v2708_v28, %v322_v8  ;;  %v1256_v28 = vstv %s2820_s2  ;;  %s3083_s2 = sld [smem:[#allocation3 + $0x4a]] }
  0xc5   : > { %1098 = vrot.lane.b32.xlu0 %v1095_v3, %s2361_s10  ;;  %v429_v3 = vstv %s2201_s13  ;;  %v1258_v26 = vmul.f32 %v1256_v28, %v2785_v40  ;;  %v1259_v27 = vmul.f32 %v1256_v28, %v2862_v31  ;;  %v1257_v42 = vmul.f32 %v1256_v28, %v2788_v41  ;;  %s3049_s13 = sld [smem:[#allocation3 + $0x47]] }
  0xc6   : > { %v2771_v32 = vpop.permute.xlu1 %422  ;;  %v431_v13 = vmul.f32 %v2838_v17, %v429_v3  ;;  %v432_v20 = vmul.f32 %v2842_v19, %v429_v3  ;;  %v430_v21 = vmul.f32 %v2768_v30, %v429_v3  ;;  %v342_v5 = vadd.f32 %v2710_v29, %v321_v9 }
  0xc7   : > { %v2773_v4 = vpop.permute.xlu0 %420  ;;  %v364_v16 = vadd.f32 %v2723_v44, %v343_v12  ;;  %v1213_v44 = vmul.f32 %v1211_v24, %v2785_v40  ;;  %v1266_v60 = vrot.slane %v1259_v27, 1  ;;  %v1263_v57 = vrot.slane %v1257_v42, 1 }
  0xc8   : > { %1121 = vrot.lane.b32.xlu1 %v1118_v23, %s2362_s12  ;;  %v1199_v23 = vmul.f32 %v1197_v10, %v2785_v40  ;;  %v363_v25 = vadd.f32 %v2725_v45, %v342_v5  ;;  %v438_v29 = vrot.slane %v431_v13, 2  ;;  %v440_v33 = vrot.slane %v432_v20, 2 }
  0xc9   : > { %1119 = vrot.lane.b32.xlu0 %v1116_v1, %s2362_s12  ;;  %v1198_v1 = vmul.f32 %v1197_v10, %v2788_v41  ;;  %v437_v34 = vrot.slane %v430_v21, 2  ;;  %v385_v15 = vadd.f32 %v2737_v61, %v364_v16  ;;  %v1212_v45 = vmul.f32 %v1211_v24, %v2788_v41 }
  0xca   : > { %v2792_v43 = vpop.permute.xlu1 %461  ;;  %v441_v39 = vsel %vm436_vm1, %v438_v29, %v440_v33  ;;  %v1319_v9 = vstv %s2872_s22  ;;  %v1285_v10 = vrot.slane %v1279_v50, 1  ;;  %v573_v21 = vstv %s2882_s23  ;;  %s3122_s22 = sld [smem:[#allocation3 + $0x4e]]  ;;  %s3135_s23 = sld [smem:[#allocation3 + $0x4f]] }
  0xcb   : > { %v2794_v46 = vpop.permute.xlu0 %459  ;;  %v406_v61 = vadd.f32 %v2752_v14, %v385_v15  ;;  %v1321_v16 = vmul.f32 %v1319_v9, %v2785_v40  ;;  %v575_v15 = vmul.f32 %v2838_v17, %v573_v21  ;;  %v576_v27 = vmul.f32 %v2842_v19, %v573_v21 }
  0xcc   : > { %1142 = vrot.lane.b32.xlu1 %v1139_v36, %s2363_s16  ;;  %v384_v36 = vadd.f32 %v2739_v62, %v363_v25  ;;  %v1322_v25 = vmul.f32 %v1319_v9, %v2862_v31 }
  0xcd   : > { %1140 = vrot.lane.b32.xlu0 %v1137_v37, %s2363_s16  ;;  %v1225_v37 = vstv %s2830_s19  ;;  %v427_v52 = vadd.f32 %v2771_v32, %v406_v61  ;;  %v1278_v32 = vmul.f32 %v1277_v38, %v2788_v41  ;;  %v574_v61 = vmul.f32 %v2768_v30, %v573_v21  ;;  %s3099_s19 = sld [smem:[#allocation3 + $0x2a]] }
  0xce   : > { %v2809_v54 = vpop.permute.xlu1 %482  ;;  %v405_v62 = vadd.f32 %v2754_v18, %v384_v36  ;;  %v1227_v14 = vmul.f32 %v1225_v37, %v2785_v40  ;;  %v1298_v18 = vstv %s2852_s21  ;;  %v1226_v49 = vmul.f32 %v1225_v37, %v2788_v41  ;;  %s3105_s21 = sld [smem:[#allocation3 + $0x4c]] }
  0xcf   : > { %v2811_v55 = vpop.permute.xlu0 %480  ;;  %v1300_v3 = vmul.f32 %v1298_v18, %v2785_v40  ;;  %v1301_v8 = vmul.f32 %v1298_v18, %v2862_v31  ;;  %v1299_v20 = vmul.f32 %v1298_v18, %v2788_v41  ;;  %v1361_v18 = vstv %s2914_s25  ;;  %s3155_s25 = sld [smem:[#allocation3 + $0x51]] }
  0xd0   : > { %1162 = vrot.lane.b32.xlu1 %v1157_v47, %s2359_s30  ;;  %v439_v47 = vsel %vm436_vm1, %v437_v34, %v438_v29  ;;  %v426_v53 = vadd.f32 %v2773_v4, %v405_v62  ;;  %v1399_v21 = vstv %s2936_s26  ;;  %s3169_s26 = sld [smem:[#allocation3 + $0x52]] }
  0xd1   : > { %1160 = vrot.lane.b32.xlu0 %v1156_v48, %s2359_s30  ;;  %v1306_v33 = vrot.slane %v1300_v3, 1  ;;  %v1308_v34 = vrot.slane %v1301_v8, 1 }
  0xd2   : > { %v2822_v63 = vpop.permute.xlu1 %503 }
  0xd3   : > { %v2824_v0 = vpop.permute.xlu0 %501 }
  0xd4   : > { %1176 = vrot.lane.b32.xlu1 %v1171_v56, %s2358_s29  ;;  %v1280_v56 = vmul.f32 %v1277_v38, %v2862_v31  ;;  %v1327_v38 = vrot.slane %v1321_v16, 1 }
  0xd5   : > { %1174 = vrot.lane.b32.xlu0 %v1170_v59, %s2358_s29  ;;  %v1264_v59 = vrot.slane %v1258_v26, 1 }
  0xd6   : > { %v2846_v22 = vpop.permute.xlu1 %524  ;;  %v1287_v13 = vrot.slane %v1280_v56, 1  ;;  %v582_v56 = vrot.slane %v575_v15, 3  ;;  %v1402_v15 = vmul.f32 %v1399_v21, %v2862_v31 }
  0xd7   : > { %v2848_v11 = vpop.permute.xlu0 %522  ;;  %v1267_v12 = vsel %vm292_vm0, %v1264_v59, %v1266_v60  ;;  %v1265_v5 = vsel %vm292_vm0, %v1263_v57, %v1264_v59  ;;  %v584_v59 = vrot.slane %v576_v27, 3  ;;  %v581_v60 = vrot.slane %v574_v61, 3 }
  0xd8   : > { %1190 = vrot.lane.b32.xlu1 %v1185_v6, %s2360_s8  ;;  %v445_v6 = vadd.f32 %v441_v39, %v427_v52  ;;  %v1288_v36 = vsel %vm292_vm0, %v1285_v10, %v1287_v13  ;;  %v1329_v39 = vrot.slane %v1322_v25, 1  ;;  %v1362_v13 = vmul.f32 %v1361_v18, %v2788_v41 }
  0xd9   : > { %1188 = vrot.lane.b32.xlu0 %v1184_v7, %s2360_s8  ;;  %v444_v7 = vadd.f32 %v439_v47, %v426_v53  ;;  %v1309_v47 = vsel %vm292_vm0, %v1306_v33, %v1308_v34  ;;  %v717_v25 = vstv %s2947_s28  ;;  %v1401_v34 = vmul.f32 %v1399_v21, %v2785_v40  ;;  %s3172_s28 = sld [smem:[#allocation3 + $0x53]] }
  0xda   : > { %v2865_v2 = vpop.permute.xlu1 %545  ;;  %v466_v28 = vadd.f32 %v2792_v43, %v445_v6  ;;  %v1330_v3 = vsel %vm292_vm0, %v1327_v38, %v1329_v39  ;;  %v2998_v61 = vmul.f32 %v2838_v17, %v717_v25 }
  0xdb   : > { %v2867_v35 = vpop.permute.xlu0 %543  ;;  %v465_v29 = vadd.f32 %v2794_v46, %v444_v7  ;;  %v1340_v46 = vstv %s2902_s24  ;;  %v1364_v7 = vmul.f32 %v1361_v18, %v2862_v31  ;;  %s3146_s24 = sld [smem:[#allocation3 + $0x50]] }
  0xdc   : > { %1204 = vrot.lane.b32.xlu1 %v1199_v23, %s2361_s10  ;;  %v1284_v23 = vrot.slane %v1278_v32, 1  ;;  %v487_v37 = vadd.f32 %v2809_v54, %v466_v28  ;;  %v1342_v53 = vmul.f32 %v1340_v46, %v2785_v40  ;;  %v1341_v50 = vmul.f32 %v1340_v46, %v2788_v41 }
  0xdd   : > { %1202 = vrot.lane.b32.xlu0 %v1198_v1, %s2361_s10  ;;  %v486_v26 = vadd.f32 %v2811_v55, %v465_v29  ;;  %v1371_v29 = vrot.slane %v1364_v7, 1 }
  0xde   : > { %v2888_v48 = vpop.permute.xlu1 %566  ;;  %v1286_v43 = vsel %vm292_vm0, %v1284_v23, %v1285_v10  ;;  %v508_v54 = vadd.f32 %v2822_v63, %v487_v37  ;;  %v1400_v37 = vmul.f32 %v1399_v21, %v2788_v41 }
  0xdf   : > { %v2890_v51 = vpop.permute.xlu0 %564  ;;  %v507_v55 = vadd.f32 %v2824_v0, %v486_v26 }
  0xe0   : > { %1218 = vrot.lane.b32.xlu1 %v1213_v44, %s2362_s12  ;;  %v1305_v44 = vrot.slane %v1299_v20, 1  ;;  %v529_v63 = vadd.f32 %v2846_v22, %v508_v54  ;;  %v1347_v20 = vrot.slane %v1341_v50, 1 }
  0xe1   : > { %1216 = vrot.lane.b32.xlu0 %v1212_v45, %s2362_s12  ;;  %v1320_v45 = vmul.f32 %v1319_v9, %v2788_v41  ;;  %v528_v0 = vadd.f32 %v2848_v11, %v507_v55  ;;  %v1363_v11 = vmul.f32 %v1361_v18, %v2785_v40  ;;  %v1348_v9 = vrot.slane %v1342_v53, 1 }
  0xe2   : > { %v2904_v4 = vpop.permute.xlu1 %605  ;;  %v550_v6 = vadd.f32 %v2865_v2, %v529_v63  ;;  %v1407_v55 = vrot.slane %v1401_v34, 2  ;;  %v1441_v18 = vstv %s2976_s5  ;;  %v720_v63 = vmul.f32 %v2842_v19, %v717_v25  ;;  %s3188_s5 = sld [smem:[#allocation3 + $0x31]] }
  0xe3   : > { %v2906_v58 = vpop.permute.xlu0 %603  ;;  %v1326_v52 = vrot.slane %v1320_v45, 1  ;;  %v549_v22 = vadd.f32 %v2867_v35, %v528_v0  ;;  %v1369_v28 = vrot.slane %v1363_v11, 1  ;;  %v1349_v45 = vsel %vm292_vm0, %v1347_v20, %v1348_v9 }
  0xe4   : > { %1232 = vrot.lane.b32.xlu1 %v1227_v14, %s2363_s16  ;;  %v1343_v14 = vmul.f32 %v1340_v46, %v2862_v31  ;;  %v571_v2 = vadd.f32 %v2888_v48, %v550_v6  ;;  %v718_v0 = vmul.f32 %v2768_v30, %v717_v25  ;;  %v1443_v6 = vmul.f32 %v1441_v18, %v2785_v40 }
  0xe5   : > { %1230 = vrot.lane.b32.xlu0 %v1226_v49, %s2363_s16  ;;  %v1307_v49 = vsel %vm292_vm0, %v1305_v44, %v1306_v33  ;;  %v1328_v8 = vsel %vm292_vm0, %v1326_v52, %v1327_v38  ;;  %v570_v35 = vadd.f32 %v2890_v51, %v549_v22  ;;  %v1420_v33 = vstv %s2949_s4  ;;  %s3182_s4 = sld [smem:[#allocation3 + $0x55]] }
  0xe6   : > { %v2919_v1 = vpop.permute.xlu1 %626  ;;  %v1350_v10 = vrot.slane %v1343_v14, 1  ;;  %v1368_v51 = vrot.slane %v1362_v13, 1  ;;  %v1422_v46 = vmul.f32 %v1420_v33, %v2785_v40  ;;  %v1423_v27 = vmul.f32 %v1420_v33, %v2862_v31 }
  0xe7   : > { %v2921_v24 = vpop.permute.xlu0 %624  ;;  %v1421_v38 = vmul.f32 %v1420_v33, %v2788_v41  ;;  %v1372_v39 = vsel %vm292_vm0, %v1369_v28, %v1371_v29  ;;  %v1406_v14 = vrot.slane %v1400_v37, 2  ;;  %v1444_v22 = vmul.f32 %v1441_v18, %v2862_v31 }
  0xe8   : > { %1270 = vrot.lane.b32.xlu1 %v1267_v12, %s2359_s30  ;;  %v585_v12 = vsel %vm580_vm2, %v582_v56, %v584_v59  ;;  %v1351_v48 = vsel %vm292_vm0, %v1348_v9, %v1350_v10  ;;  %v1370_v54 = vsel %vm292_vm0, %v1368_v51, %v1369_v28  ;;  %v1430_v59 = vrot.slane %v1423_v27, 2 }
  0xe9   : > { %1268 = vrot.lane.b32.xlu0 %v1265_v5, %s2359_s30  ;;  %v583_v5 = vsel %vm580_vm2, %v581_v60, %v582_v56  ;;  %v1428_v56 = vrot.slane %v1422_v46, 2  ;;  %v1462_v11 = vstv %s2991_s6  ;;  %v726_v9 = vrot.slane %v2998_v61, 4  ;;  %s3201_s6 = sld [smem:[#allocation3 + $0x56]] }
  0xea   : > { %v2940_v62 = vpop.permute.xlu1 %647  ;;  %v588_v44 = vadd.f32 %v583_v5, %v570_v35  ;;  %v728_v10 = vrot.slane %v720_v63, 4  ;;  %v725_v13 = vrot.slane %v718_v0, 4  ;;  %v1449_v5 = vrot.slane %v1443_v6, 2 }
  0xeb   : > { %v2942_v42 = vpop.permute.xlu0 %645  ;;  %v1431_v20 = vsel %vm436_vm1, %v1428_v56, %v1430_v59  ;;  %v1451_v25 = vrot.slane %v1444_v22, 2  ;;  %v1464_v28 = vmul.f32 %v1462_v11, %v2785_v40  ;;  %v1465_v29 = vmul.f32 %v1462_v11, %v2862_v31 }
  0xec   : > { %1291 = vrot.lane.b32.xlu1 %v1288_v36, %s2358_s29  ;;  %v589_v36 = vadd.f32 %v585_v12, %v571_v2  ;;  %v609_v53 = vadd.f32 %v2906_v58, %v588_v44  ;;  %v1483_v12 = vstv %s3001_s7  ;;  %v1504_v37 = vstv %s3018_s9  ;;  %s3212_s7 = sld [smem:[#allocation3 + $0x57]]  ;;  %s3226_s9 = sld [smem:[#allocation3 + $0x58]] }
  0xed   : > { %1289 = vrot.lane.b32.xlu0 %v1286_v43, %s2358_s29  ;;  %v729_v46 = vsel %vm724_vm3, %v726_v9, %v728_v10  ;;  %v1484_v27 = vmul.f32 %v1483_v12, %v2788_v41  ;;  %v1472_v61 = vrot.slane %v1465_v29, 2 }
  0xee   : > { %v2960_v57 = vpop.permute.xlu1 %668  ;;  %v610_v52 = vadd.f32 %v2904_v4, %v589_v36  ;;  %v1427_v4 = vrot.slane %v1421_v38, 2 }
  0xef   : > { %v2962_v32 = vpop.permute.xlu0 %666  ;;  %v1490_v0 = vrot.slane %v1484_v27, 2 }
  0xf0   : > { %1312 = vrot.lane.b32.xlu1 %v1309_v47, %s2360_s8  ;;  %v1409_v47 = vrot.slane %v1402_v15, 2  ;;  %v631_v60 = vadd.f32 %v2919_v1, %v610_v52  ;;  %v1429_v21 = vsel %vm436_vm1, %v1427_v4, %v1428_v56  ;;  %v1485_v15 = vmul.f32 %v1483_v12, %v2785_v40 }
  0xf1   : > { %1310 = vrot.lane.b32.xlu0 %v1307_v49, %s2360_s8  ;;  %v1507_v52 = vmul.f32 %v1504_v37, %v2862_v31  ;;  %v1505_v56 = vmul.f32 %v1504_v37, %v2788_v41 }
  0xf2   : > { %v2980_v23 = vpop.permute.xlu1 %689  ;;  %v1410_v58 = vsel %vm436_vm1, %v1407_v55, %v1409_v47  ;;  %v652_v7 = vadd.f32 %v2940_v62, %v631_v60  ;;  %v1506_v47 = vmul.f32 %v1504_v37, %v2785_v40 }
  0xf3   : > { %v2982_v16 = vpop.permute.xlu0 %687 }
  0xf4   : > { %1333 = vrot.lane.b32.xlu1 %v1330_v3, %s2361_s10  ;;  %v630_v3 = vadd.f32 %v2921_v24, %v609_v53  ;;  %v1408_v24 = vsel %vm436_vm1, %v1406_v14, %v1407_v55  ;;  %v673_v62 = vadd.f32 %v2960_v57, %v652_v7  ;;  %v861_v55 = vstv %s3036_s11  ;;  %s3240_s11 = sld [smem:[#allocation3 + $0x59]] }
  0xf5   : > { %1331 = vrot.lane.b32.xlu0 %v1328_v8, %s2361_s10  ;;  %v1442_v8 = vmul.f32 %v1441_v18, %v2788_v41  ;;  %v1491_v18 = vrot.slane %v1485_v15, 2  ;;  %v863_v6 = vmul.f32 %v2838_v17, %v861_v55  ;;  %v1512_v22 = vrot.slane %v1506_v47, 2 }
  0xf6   : > { %v711_v26 = vpop.permute.xlu1 %710  ;;  %v651_v1 = vadd.f32 %v2942_v42, %v630_v3  ;;  %v694_v33 = vadd.f32 %v2980_v23, %v673_v62  ;;  %v727_v23 = vsel %vm724_vm3, %v725_v13, %v726_v9  ;;  %v1542_v3 = vstv %s3049_s13  ;;  %s3250_s13 = sld [smem:[#allocation3 + $0x5a]] }
  0xf7   : > { %v709_v43 = vpop.permute.xlu0 %708  ;;  %v1511_v9 = vrot.slane %v1505_v56, 2  ;;  %v1544_v10 = vmul.f32 %v1542_v3, %v2785_v40  ;;  %v1563_v13 = vstv %s3059_s17  ;;  %v1543_v62 = vmul.f32 %v1542_v3, %v2788_v41  ;;  %s2279_s17 = sld [smem:[#allocation3 + $0x5c]] }
  0xf8   : > { %1354 = vrot.lane.b32.xlu1 %v1351_v48, %s2362_s12  ;;  %v672_v42 = vadd.f32 %v2962_v32, %v651_v1  ;;  %v1448_v48 = vrot.slane %v1442_v8, 2  ;;  %v1463_v32 = vmul.f32 %v1462_v11, %v2788_v41  ;;  %v715_v36 = vadd.f32 %v711_v26, %v694_v33 }
  0xf9   : > { %1352 = vrot.lane.b32.xlu0 %v1349_v45, %s2362_s12  ;;  %v1486_v45 = vmul.f32 %v1483_v12, %v2862_v31  ;;  %v1452_v26 = vsel %vm436_vm1, %v1449_v5, %v1451_v25  ;;  %v1514_v11 = vrot.slane %v1507_v52, 2  ;;  %v1492_v8 = vsel %vm436_vm1, %v1490_v0, %v1491_v18 }
  0xfa   : > { %v3012_v49 = vpop.permute.xlu1 %749  ;;  %v693_v57 = vadd.f32 %v2982_v16, %v672_v42  ;;  %v1470_v16 = vrot.slane %v1464_v28, 2  ;;  %v1469_v38 = vrot.slane %v1463_v32, 2  ;;  %v733_v53 = vadd.f32 %v729_v46, %v715_v36 }
  0xfb   : > { %v3014_v50 = vpop.permute.xlu0 %747  ;;  %v1493_v63 = vrot.slane %v1486_v45, 2  ;;  %v864_v42 = vmul.f32 %v2842_v19, %v861_v55  ;;  %v1515_v28 = vsel %vm436_vm1, %v1512_v22, %v1514_v11  ;;  %v1566_v32 = vmul.f32 %v1563_v13, %v2862_v31 }
  0xfc   : > { %1375 = vrot.lane.b32.xlu1 %v1372_v39, %s2363_s16  ;;  %v714_v44 = vadd.f32 %v709_v43, %v693_v57  ;;  %v1450_v43 = vsel %vm436_vm1, %v1448_v48, %v1449_v5  ;;  %v1473_v59 = vsel %vm436_vm1, %v1470_v16, %v1472_v61  ;;  %v1471_v60 = vsel %vm436_vm1, %v1469_v38, %v1470_v16 }
  0xfd   : > { %1373 = vrot.lane.b32.xlu0 %v1370_v54, %s2363_s16  ;;  %v754_v7 = vadd.f32 %v3012_v49, %v733_v53  ;;  %v862_v5 = vmul.f32 %v2768_v30, %v861_v55  ;;  %v1565_v57 = vmul.f32 %v1563_v13, %v2785_v40  ;;  %v1550_v48 = vrot.slane %v1544_v10, 3 }
  0xfe   : > { %v3031_v2 = vpop.permute.xlu1 %770  ;;  %v732_v14 = vadd.f32 %v727_v23, %v714_v44  ;;  %v1564_v15 = vmul.f32 %v1563_v13, %v2788_v41  ;;  %v872_v45 = vrot.slane %v864_v42, 5  ;;  %v1573_v38 = vrot.slane %v1566_v32, 3 }
  0xff   : > { %v3033_v35 = vpop.permute.xlu0 %768  ;;  %v869_v37 = vrot.slane %v862_v5, 5  ;;  %v1571_v61 = vrot.slane %v1565_v57, 3  ;;  %v1605_v55 = vstv %s3083_s2  ;;  %v1005_v11 = vstv %s3099_s19  ;;  %s2282_s2 = sld [smem:[#allocation3 + $0x5f]]  ;;  %s2283_s19 = sld [smem:[#allocation3 + $0x60]] }
 0x100   : > { %1413 = vrot.lane.b32.xlu1 %v1410_v58, %s2359_s30  ;;  %v753_v1 = vadd.f32 %v3014_v50, %v732_v14  ;;  %v1545_v50 = vmul.f32 %v1542_v3, %v2862_v31  ;;  %v1607_v3 = vmul.f32 %v1605_v55, %v2785_v40  ;;  %v1008_v57 = vmul.f32 %v2842_v19, %v1005_v11 }
 0x101   : > { %1411 = vrot.lane.b32.xlu0 %v1408_v24, %s2359_s30  ;;  %v1494_v24 = vsel %vm436_vm1, %v1491_v18, %v1493_v63  ;;  %v1685_v19 = vstv %s3122_s22 }
 0x102   : > { %v792_v51 = vpop.permute.xlu1 %791  ;;  %v774_v49 = vadd.f32 %v3033_v35, %v753_v1  ;;  %v1513_v35 = vsel %vm436_vm1, %v1511_v9, %v1512_v22 }
 0x103   : > { %v790_v34 = vpop.permute.xlu0 %789 }
 0x104   : > { %1434 = vrot.lane.b32.xlu1 %v1431_v20, %s2358_s29  ;;  %v775_v20 = vadd.f32 %v3031_v2, %v754_v7  ;;  %v795_v33 = vadd.f32 %v790_v34, %v774_v49  ;;  %v1584_v2 = vstv %s3066_s18  ;;  %v1549_v34 = vrot.slane %v1543_v62, 3  ;;  %s2281_s18 = sld [smem:[#allocation3 + $0x5e]] }
 0x105   : > { %1432 = vrot.lane.b32.xlu0 %v1429_v21, %s2358_s29  ;;  %v870_v21 = vrot.slane %v863_v6, 5  ;;  %v1586_v16 = vmul.f32 %v1584_v2, %v2785_v40  ;;  %v1587_v27 = vmul.f32 %v1584_v2, %v2862_v31  ;;  %v1647_v62 = vstv %s3105_s21  ;;  %s2289_s21 = sshll.u32 %s3415_s15, 4 }
 0x106   : > { %v813_v39 = vpop.permute.xlu1 %812  ;;  %v796_v29 = vadd.f32 %v792_v51, %v775_v20  ;;  %v1552_v51 = vrot.slane %v1545_v50, 3  ;;  %v1551_v14 = vsel %vm580_vm2, %v1549_v34, %v1550_v48  ;;  %v1613_v20 = vrot.slane %v1607_v3, 3 }
 0x107   : > { %v811_v54 = vpop.permute.xlu0 %810  ;;  %v873_v18 = vsel %vm868_vm4, %v870_v21, %v872_v45  ;;  %v871_v63 = vsel %vm868_vm4, %v869_v37, %v870_v21  ;;  %v1007_v50 = vmul.f32 %v2838_v17, %v1005_v11  ;;  %v1648_v45 = vmul.f32 %v1647_v62, %v2788_v41 }
 0x108   : > { %1455 = vrot.lane.b32.xlu1 %v1452_v26, %s2360_s8  ;;  %v817_v36 = vadd.f32 %v813_v39, %v796_v29  ;;  %v816_v44 = vadd.f32 %v811_v54, %v795_v33  ;;  %v1570_v39 = vrot.slane %v1564_v15, 3  ;;  %v1585_v54 = vmul.f32 %v1584_v2, %v2788_v41 }
 0x109   : > { %1453 = vrot.lane.b32.xlu0 %v1450_v43, %s2360_s8  ;;  %v1553_v53 = vsel %vm580_vm2, %v1550_v48, %v1552_v51  ;;  %v1006_v2 = vmul.f32 %v2768_v30, %v1005_v11  ;;  %v1650_v48 = vmul.f32 %v1647_v62, %v2862_v31 }
 0x10a   : > { %v834_v4 = vpop.permute.xlu1 %833  ;;  %v1572_v6 = vsel %vm580_vm2, %v1570_v39, %v1571_v61  ;;  %v1591_v22 = vrot.slane %v1585_v54, 3 }
 0x10b   : > { %v832_v58 = vpop.permute.xlu0 %831  ;;  %v838_v26 = vadd.f32 %v834_v4, %v817_v36  ;;  %v1608_v4 = vmul.f32 %v1605_v55, %v2862_v31 }
 0x10c   : > { %1476 = vrot.lane.b32.xlu1 %v1473_v59, %s2361_s10  ;;  %v837_v43 = vadd.f32 %v832_v58, %v816_v44  ;;  %v1592_v59 = vrot.slane %v1586_v16, 3  ;;  %v1574_v58 = vsel %vm580_vm2, %v1571_v61, %v1573_v38  ;;  %v1014_v44 = vrot.slane %v1007_v50, 6 }
 0x10d   : > { %1474 = vrot.lane.b32.xlu0 %v1471_v60, %s2361_s10  ;;  %v1594_v60 = vrot.slane %v1587_v27, 3  ;;  %v1615_v49 = vrot.slane %v1608_v4, 3  ;;  %v1657_v38 = vrot.slane %v1650_v48, 3 }
 0x10e   : > { %v855_v12 = vpop.permute.xlu1 %854  ;;  %v1593_v42 = vsel %vm580_vm2, %v1591_v22, %v1592_v59 }
 0x10f   : > { %v853_v25 = vpop.permute.xlu0 %852  ;;  %v859_v47 = vadd.f32 %v855_v12, %v838_v26  ;;  %v1595_v13 = vsel %vm580_vm2, %v1592_v59, %v1594_v60  ;;  %v1616_v36 = vsel %vm580_vm2, %v1613_v20, %v1615_v49  ;;  %v1016_v26 = vrot.slane %v1008_v57, 6 }
 0x110   : > { %1497 = vrot.lane.b32.xlu1 %v1494_v24, %s2362_s12  ;;  %v858_v52 = vadd.f32 %v853_v25, %v837_v43  ;;  %v1606_v24 = vmul.f32 %v1605_v55, %v2788_v41  ;;  %v1013_v43 = vrot.slane %v1006_v2, 6  ;;  %v1687_v55 = vmul.f32 %v1685_v19, %v2785_v40 }
 0x111   : > { %1495 = vrot.lane.b32.xlu0 %v1492_v8, %s2362_s12  ;;  %v877_v7 = vadd.f32 %v873_v18, %v859_v47  ;;  %v1626_v8 = vstv %s3101_s20  ;;  %v1688_v47 = vmul.f32 %v1685_v19, %v2862_v31  ;;  %v1017_v59 = vsel %vm1012_vm5, %v1014_v44, %v1016_v26  ;;  %s2284_s20 = sld [smem:[#allocation3 + $0x61]] }
 0x112   : > { %v894_v46 = vpop.permute.xlu1 %893  ;;  %v876_v1 = vadd.f32 %v871_v63, %v858_v52  ;;  %v1628_v21 = vmul.f32 %v1626_v8, %v2785_v40  ;;  %v1629_v12 = vmul.f32 %v1626_v8, %v2862_v31  ;;  %v1627_v29 = vmul.f32 %v1626_v8, %v2788_v41 }
 0x113   : > { %v892_v23 = vpop.permute.xlu0 %891  ;;  %v898_v5 = vadd.f32 %v894_v46, %v877_v7  ;;  %v1015_v3 = vsel %vm1012_vm5, %v1013_v43, %v1014_v44  ;;  %v1693_v11 = vrot.slane %v1687_v55, 4  ;;  %v1695_v7 = vrot.slane %v1688_v47, 4 }
 0x114   : > { %1518 = vrot.lane.b32.xlu1 %v1515_v28, %s2363_s16  ;;  %v897_v25 = vadd.f32 %v892_v23, %v876_v1  ;;  %v1612_v28 = vrot.slane %v1606_v24, 3  ;;  %v1634_v51 = vrot.slane %v1628_v21, 3  ;;  %v1636_v34 = vrot.slane %v1629_v12, 3 }
 0x115   : > { %1516 = vrot.lane.b32.xlu0 %v1513_v35, %s2363_s16  ;;  %v1649_v35 = vmul.f32 %v1647_v62, %v2785_v40  ;;  %v1633_v23 = vrot.slane %v1627_v29, 3  ;;  %v1696_v12 = vsel %vm724_vm3, %v1693_v11, %v1695_v7  ;;  %v1748_v29 = vstv %s3155_s25 }
 0x116   : > { %v915_v0 = vpop.permute.xlu1 %914  ;;  %v1614_v46 = vsel %vm580_vm2, %v1612_v28, %v1613_v20  ;;  %v1637_v52 = vsel %vm580_vm2, %v1634_v51, %v1636_v34  ;;  %v1751_v34 = vmul.f32 %v1748_v29, %v2862_v31  ;;  %v1790_v43 = vstv %s3172_s28 }
 0x117   : > { %v913_v56 = vpop.permute.xlu0 %912  ;;  %v919_v32 = vadd.f32 %v915_v0, %v898_v5  ;;  %v1655_v61 = vrot.slane %v1649_v35, 3  ;;  %v1635_v0 = vsel %vm580_vm2, %v1633_v23, %v1634_v51 }
 0x118   : > { %1556 = vrot.lane.b32.xlu1 %v1553_v53, %s2359_s30  ;;  %v918_v15 = vadd.f32 %v913_v56, %v897_v25  ;;  %v1654_v53 = vrot.slane %v1648_v45, 3  ;;  %v1706_v56 = vstv %s3135_s23  ;;  %v1749_v45 = vmul.f32 %v1748_v29, %v2788_v41 }
 0x119   : > { %1554 = vrot.lane.b32.xlu0 %v1551_v14, %s2359_s30  ;;  %v1686_v14 = vmul.f32 %v1685_v19, %v2788_v41  ;;  %v1708_v8 = vmul.f32 %v1706_v56, %v2785_v40  ;;  %v1709_v20 = vmul.f32 %v1706_v56, %v2862_v31  ;;  %v1707_v49 = vmul.f32 %v1706_v56, %v2788_v41 }
 0x11a   : > { %v936_v9 = vpop.permute.xlu1 %935  ;;  %v1656_v1 = vsel %vm580_vm2, %v1654_v53, %v1655_v61 }
 0x11b   : > { %v934_v10 = vpop.permute.xlu0 %933  ;;  %v940_v30 = vadd.f32 %v936_v9, %v919_v32  ;;  %v1692_v24 = vrot.slane %v1686_v14, 4  ;;  %v1727_v9 = vstv %s3146_s24  ;;  %v1713_v57 = vrot.slane %v1707_v49, 4  ;;  %s185_s24 = scalar_lea.vmem %s3412_s3, %s2289_s21 }
 0x11c   : > { %1577 = vrot.lane.b32.xlu1 %v1574_v58, %s2358_s29  ;;  %v939_v37 = vadd.f32 %v934_v10, %v918_v15  ;;  %v1658_v58 = vsel %vm580_vm2, %v1655_v61, %v1657_v38  ;;  %v1729_v25 = vmul.f32 %v1727_v9, %v2785_v40  ;;  %v1730_v28 = vmul.f32 %v1727_v9, %v2862_v31 }
 0x11d   : > { %1575 = vrot.lane.b32.xlu0 %v1572_v6, %s2358_s29  ;;  %v1694_v5 = vsel %vm724_vm3, %v1692_v24, %v1693_v11  ;;  %v1728_v2 = vmul.f32 %v1727_v9, %v2788_v41 }
 0x11e   : > { %v957_v17 = vpop.permute.xlu1 %956  ;;  %v1735_v44 = vrot.slane %v1729_v25, 4  ;;  %v1737_v51 = vrot.slane %v1730_v28, 4  ;;  %v1849_v25 = vstv %s3201_s6 }
 0x11f   : > { %v955_v33 = vpop.permute.xlu0 %954  ;;  %v961_v39 = vadd.f32 %v957_v17, %v940_v30  ;;  %v1714_v17 = vrot.slane %v1708_v8, 4  ;;  %v3215_v8 = vld [vmem:[%s2415_s27 + $0x20] sm:$0xff] }
 0x120   : > { %1598 = vrot.lane.b32.xlu1 %v1595_v13, %s2360_s8  ;;  %v960_v54 = vadd.f32 %v955_v33, %v939_v37  ;;  %v1716_v33 = vrot.slane %v1709_v20, 4  ;;  %v1734_v37 = vrot.slane %v1728_v2, 4  ;;  %v1738_v61 = vsel %vm724_vm3, %v1735_v44, %v1737_v51 }
 0x121   : > { %1596 = vrot.lane.b32.xlu0 %v1593_v42, %s2360_s8  ;;  %v1715_v30 = vsel %vm724_vm3, %v1713_v57, %v1714_v17 }
 0x122   : > { %v978_v16 = vpop.permute.xlu1 %977  ;;  %v1717_v19 = vsel %vm724_vm3, %v1714_v17, %v1716_v33  ;;  %v1736_v55 = vsel %vm724_vm3, %v1734_v37, %v1735_v44 }
 0x123   : > { %v976_v27 = vpop.permute.xlu0 %975  ;;  %v982_v18 = vadd.f32 %v978_v16, %v961_v39  ;;  %v1769_v16 = vstv %s3169_s26  ;;  %v1758_v39 = vrot.slane %v1751_v34, 4 }
 0x124   : > { %1619 = vrot.lane.b32.xlu1 %v1616_v36, %s2361_s10  ;;  %v981_v63 = vadd.f32 %v976_v27, %v960_v54  ;;  %v1750_v36 = vmul.f32 %v1748_v29, %v2785_v40  ;;  %v1755_v54 = vrot.slane %v1749_v45, 4  ;;  %v1771_v47 = vmul.f32 %v1769_v16, %v2785_v40 }
 0x125   : > { %1617 = vrot.lane.b32.xlu0 %v1614_v46, %s2361_s10  ;;  %v1770_v53 = vmul.f32 %v1769_v16, %v2788_v41  ;;  %v1870_v45 = vstv %s3212_s7 }
 0x126   : > { %v999_v60 = vpop.permute.xlu1 %998  ;;  %v1756_v38 = vrot.slane %v1750_v36, 4 }
 0x127   : > { %v997_v4 = vpop.permute.xlu0 %996  ;;  %v1003_v6 = vadd.f32 %v999_v60, %v982_v18  ;;  %v1791_v60 = vmul.f32 %v1790_v43, %v2788_v41 }
 0x128   : > { %v1002_v22 = vadd.f32 %v997_v4, %v981_v63  ;;  %1640 = vrot.lane.b32.xlu1 %v1637_v52, %s2362_s12  ;;  %v1772_v52 = vmul.f32 %v1769_v16, %v2862_v31  ;;  %v1792_v63 = vmul.f32 %v1790_v43, %v2785_v40  ;;  %v1759_v4 = vsel %vm724_vm3, %v1756_v38, %v1758_v39 }
 0x129   : > { %1638 = vrot.lane.b32.xlu0 %v1635_v0, %s2362_s12  ;;  %v1021_v10 = vadd.f32 %v1017_v59, %v1003_v6  ;;  %v1793_v0 = vmul.f32 %v1790_v43, %v2862_v31  ;;  %v1757_v6 = vsel %vm724_vm3, %v1755_v54, %v1756_v38  ;;  %v1776_v40 = vrot.slane %v1770_v53, 4 }
 0x12a   : > { %v1020_v13 = vadd.f32 %v1015_v3, %v1002_v22  ;;  %v1038_v50 = vpop.permute.xlu1 %1037  ;;  %v1828_v3 = vstv %s3182_s4  ;;  %v1777_v22 = vrot.slane %v1771_v47, 4  ;;  %v1779_v11 = vrot.slane %v1772_v52, 4 }
 0x12b   : > { %v1036_v62 = vpop.permute.xlu0 %1035  ;;  %v1042_v42 = vadd.f32 %v1038_v50, %v1021_v10  ;;  %v1798_v24 = vrot.slane %v1792_v63, 4  ;;  %v1800_v41 = vrot.slane %v1793_v0, 4  ;;  %v1830_v9 = vmul.f32 %v3215_v8, %v1828_v3 }
 0x12c   : > { %v1041_v21 = vadd.f32 %v1036_v62, %v1020_v13  ;;  %1661 = vrot.lane.b32.xlu1 %v1658_v58, %s2363_s16  ;;  %v1149_v58 = vstv %s3188_s5  ;;  %v1797_v20 = vrot.slane %v1791_v60, 4  ;;  %v1831_v49 = vmul.f32 %v1828_v3, %v2862_v31  ;;  %v3223_v62 = vld [vmem:[%s2415_s27 + $0x18] sm:$0xff] }
 0x12d   : > { %1659 = vrot.lane.b32.xlu0 %v1656_v1, %s2363_s16  ;;  %v1151_v50 = vmul.f32 %v3215_v8, %v1149_v58  ;;  %v1801_v17 = vsel %vm724_vm3, %v1798_v24, %v1800_v41  ;;  %v1836_v33 = vrot.slane %v1830_v9, 5  ;;  %v1850_v36 = vmul.f32 %v3223_v62, %v1849_v25 }
 0x12e   : > { %v1059_v35 = vpop.permute.xlu1 %1058  ;;  %v1872_v16 = vmul.f32 %v3215_v8, %v1870_v45  ;;  %v1891_v43 = vstv %s3226_s9 }
 0x12f   : > { %v1057_v48 = vpop.permute.xlu0 %1056  ;;  %v1063_v32 = vadd.f32 %v1059_v35, %v1042_v42  ;;  %v1150_v42 = vmul.f32 %v3223_v62, %v1149_v58  ;;  %v1799_v35 = vsel %vm724_vm3, %v1797_v20, %v1798_v24  ;;  %v1856_v54 = vrot.slane %v1850_v36, 5 }
 0x130   : > { %v1062_v15 = vadd.f32 %v1057_v48, %v1041_v21  ;;  %1699 = vrot.lane.b32.xlu1 %v1696_v12, %s2359_s30  ;;  %v1780_v21 = vsel %vm724_vm3, %v1777_v22, %v1779_v11  ;;  %v1778_v12 = vsel %vm724_vm3, %v1776_v40, %v1777_v22  ;;  %v1838_v48 = vrot.slane %v1831_v49, 5 }
 0x131   : > { %1697 = vrot.lane.b32.xlu0 %v1694_v5, %s2359_s30  ;;  %v1829_v5 = vmul.f32 %v3223_v62, %v1828_v3  ;;  %v1878_v63 = vrot.slane %v1872_v16, 5  ;;  %v1933_v20 = vstv %s3250_s13 }
 0x132   : > { %v1080_v46 = vpop.permute.xlu1 %1079 }
 0x133   : > { %v1078_v23 = vpop.permute.xlu0 %1077  ;;  %v1084_v27 = vadd.f32 %v1080_v46, %v1063_v32  ;;  %v1851_v32 = vmul.f32 %v3215_v8, %v1849_v25  ;;  %v1835_v34 = vrot.slane %v1829_v5, 5  ;;  %v1935_v5 = vmul.f32 %v3215_v8, %v1933_v20 }
 0x134   : > { %v1083_v26 = vadd.f32 %v1078_v23, %v1062_v15  ;;  %1720 = vrot.lane.b32.xlu1 %v1717_v19, %s2358_s29  ;;  %v1852_v15 = vmul.f32 %v1849_v25, %v2862_v31  ;;  %v1839_v23 = vsel %vm868_vm4, %v1836_v33, %v1838_v48 }
 0x135   : > { %1718 = vrot.lane.b32.xlu0 %v1715_v30, %s2358_s29  ;;  %v1857_v38 = vrot.slane %v1851_v32, 5 }
 0x136   : > { %v1101_v14 = vpop.permute.xlu1 %1100  ;;  %v1859_v39 = vrot.slane %v1852_v15, 5  ;;  %v1941_v15 = vrot.slane %v1935_v5, 5 }
 0x137   : > { %v1099_v18 = vpop.permute.xlu0 %1098  ;;  %v1105_v56 = vadd.f32 %v1101_v14, %v1084_v27  ;;  %v1873_v27 = vmul.f32 %v1870_v45, %v2862_v31  ;;  %v1893_v14 = vmul.f32 %v3215_v8, %v1891_v43  ;;  %v1858_v3 = vsel %vm868_vm4, %v1856_v54, %v1857_v38 }
 0x138   : > { %v1104_v59 = vadd.f32 %v1099_v18, %v1083_v26  ;;  %1741 = vrot.lane.b32.xlu1 %v1738_v61, %s2360_s8  ;;  %v1871_v26 = vmul.f32 %v3223_v62, %v1870_v45  ;;  %v1837_v61 = vsel %vm868_vm4, %v1835_v34, %v1836_v33  ;;  %v3254_v18 = vld [vmem:[%s2415_s27 + $0x28] sm:$0x3f]  ;;  %v1860_v60 = vsel %vm868_vm4, %v1857_v38, %v1859_v39  ;;  %s2280_s27 = sld [smem:[#allocation3 + $0x5d]] }
 0x139   : > { %1739 = vrot.lane.b32.xlu0 %v1736_v55, %s2360_s8  ;;  %v1894_v31 = vmul.f32 %v3254_v18, %v1891_v43  ;;  %v1880_v0 = vrot.slane %v1873_v27, 5  ;;  %v1899_v40 = vrot.slane %v1893_v14, 5  ;;  %v1936_v25 = vmul.f32 %v3254_v18, %v1933_v20 }
 0x13a   : > { %v1122_v7 = vpop.permute.xlu1 %1121 }
 0x13b   : > { %v1120_v1 = vpop.permute.xlu0 %1119  ;;  %v1126_v10 = vadd.f32 %v1122_v7, %v1105_v56  ;;  %v1877_v56 = vrot.slane %v1871_v26, 5  ;;  %v1901_v7 = vrot.slane %v1894_v31, 5  ;;  %v1943_v36 = vrot.slane %v1936_v25, 5 }
 0x13c   : > { %v1125_v13 = vadd.f32 %v1120_v1, %v1104_v59  ;;  %1762 = vrot.lane.b32.xlu1 %v1759_v4, %s2361_s10  ;;  %v1892_v59 = vmul.f32 %v3223_v62, %v1891_v43  ;;  %v1881_v1 = vsel %vm868_vm4, %v1878_v63, %v1880_v0  ;;  %v2013_v43 = vstv %s2281_s18 }
 0x13d   : > { %1760 = vrot.lane.b32.xlu0 %v1757_v6, %s2361_s10  ;;  %v1912_v6 = vstv %s3240_s11  ;;  %v1879_v24 = vsel %vm868_vm4, %v1877_v56, %v1878_v63  ;;  %v1944_v16 = vsel %vm868_vm4, %v1941_v15, %v1943_v36  ;;  %v2016_v14 = vmul.f32 %v3254_v18, %v2013_v43 }
 0x13e   : > { %v1143_v28 = vpop.permute.xlu1 %1142  ;;  %v1898_v41 = vrot.slane %v1892_v59, 5  ;;  %v1914_v9 = vmul.f32 %v3215_v8, %v1912_v6  ;;  %v2014_v31 = vmul.f32 %v3223_v62, %v2013_v43  ;;  %v2034_v63 = vstv %s2282_s2 }
 0x13f   : > { %v1141_v29 = vpop.permute.xlu0 %1140  ;;  %v1147_v57 = vadd.f32 %v1143_v28, %v1126_v10  ;;  %v1915_v10 = vmul.f32 %v3254_v18, %v1912_v6  ;;  %v1934_v28 = vmul.f32 %v3223_v62, %v1933_v20 }
 0x140   : > { %v1146_v2 = vadd.f32 %v1141_v29, %v1125_v13  ;;  %1783 = vrot.lane.b32.xlu1 %v1780_v21, %s2362_s12  ;;  %v1913_v13 = vmul.f32 %v3223_v62, %v1912_v6  ;;  %v1971_v29 = vstv %s2279_s17  ;;  %v1920_v33 = vrot.slane %v1914_v9, 5 }
 0x141   : > { %1781 = vrot.lane.b32.xlu0 %v1778_v12, %s2362_s12  ;;  %v1153_v44 = vadd.f32 %v1151_v50, %v1147_v57  ;;  %v1902_v12 = vsel %vm868_vm4, %v1899_v40, %v1901_v7  ;;  %v1922_v57 = vrot.slane %v1915_v10, 5  ;;  %v1973_v32 = vmul.f32 %v3215_v8, %v1971_v29 }
 0x142   : > { %v1152_v51 = vadd.f32 %v1150_v42, %v1146_v2  ;;  %v1163_v19 = vpop.permute.xlu1 %1162  ;;  %v1919_v2 = vrot.slane %v1913_v13, 5 }
 0x143   : > { %v1161_v30 = vpop.permute.xlu0 %1160  ;;  %v1167_v37 = vadd.f32 %v1163_v19, %v1153_v44  ;;  %v1940_v44 = vrot.slane %v1934_v28, 5  ;;  %v1923_v34 = vsel %vm868_vm4, %v1920_v33, %v1922_v57  ;;  %v1972_v19 = vmul.f32 %v3223_v62, %v1971_v29 }
 0x144   : > { %v1166_v46 = vadd.f32 %v1161_v30, %v1152_v51  ;;  %1804 = vrot.lane.b32.xlu1 %v1801_v17, %s2363_s16  ;;  %v1900_v17 = vsel %vm868_vm4, %v1898_v41, %v1899_v40  ;;  %v1974_v51 = vmul.f32 %v3254_v18, %v1971_v29  ;;  %v1921_v45 = vsel %vm868_vm4, %v1919_v2, %v1920_v33 }
 0x145   : > { %1802 = vrot.lane.b32.xlu0 %v1799_v35, %s2363_s16  ;;  %v1942_v27 = vsel %vm868_vm4, %v1940_v44, %v1941_v15  ;;  %v2035_v40 = vmul.f32 %v3223_v62, %v2034_v63  ;;  %v2055_v41 = vstv %s2283_s19  ;;  %v2076_v33 = vstv %s2284_s20 }
 0x146   : > { %v1177_v55 = vpop.permute.xlu1 %1176  ;;  %v1981_v26 = vrot.slane %v1974_v51, 6  ;;  %v2056_v28 = vmul.f32 %v3223_v62, %v2055_v41  ;;  %v2078_v44 = vmul.f32 %v3215_v8, %v2076_v33  ;;  %v2079_v51 = vmul.f32 %v3254_v18, %v2076_v33 }
 0x147   : > { %v1175_v47 = vpop.permute.xlu0 %1174  ;;  %v1181_v52 = vadd.f32 %v1177_v55, %v1167_v37 }
 0x148   : > { %v1180_v53 = vadd.f32 %v1175_v47, %v1166_v46  ;;  %1842 = vrot.lane.b32.xlu1 %v1839_v23, %s2359_s30  ;;  %v1992_v46 = vstv %s2280_s27  ;;  %v1979_v23 = vrot.slane %v1973_v32, 6  ;;  %v2062_v36 = vrot.slane %v2056_v28, 6 }
 0x149   : > { %1840 = vrot.lane.b32.xlu0 %v1837_v61, %s2359_s30  ;;  %v1978_v61 = vrot.slane %v1972_v19, 6  ;;  %v1994_v38 = vmul.f32 %v3215_v8, %v1992_v46  ;;  %v1995_v39 = vmul.f32 %v3254_v18, %v1992_v46  ;;  %v1993_v54 = vmul.f32 %v3223_v62, %v1992_v46 }
 0x14a   : > { %v1191_v4 = vpop.permute.xlu1 %1190 }
 0x14b   : > { %v1189_v58 = vpop.permute.xlu0 %1188  ;;  %v1195_v22 = vadd.f32 %v1191_v4, %v1181_v52  ;;  %v2015_v52 = vmul.f32 %v3215_v8, %v2013_v43  ;;  %v1980_v0 = vsel %vm1012_vm5, %v1978_v61, %v1979_v23  ;;  %v2000_v56 = vrot.slane %v1994_v38, 6 }
 0x14c   : > { %v1194_v11 = vadd.f32 %v1189_v58, %v1180_v53  ;;  %1863 = vrot.lane.b32.xlu1 %v1860_v60, %s2358_s29  ;;  %v1982_v53 = vsel %vm1012_vm5, %v1979_v23, %v1981_v26  ;;  %v2002_v59 = vrot.slane %v1995_v39, 6  ;;  %v1999_v60 = vrot.slane %v1993_v54, 6 }
 0x14d   : > { %1861 = vrot.lane.b32.xlu0 %v1858_v3, %s2358_s29  ;;  %v2036_v58 = vmul.f32 %v3215_v8, %v2034_v63  ;;  %v2021_v6 = vrot.slane %v2015_v52, 6 }
 0x14e   : > { %v1205_v49 = vpop.permute.xlu1 %1204  ;;  %v2003_v7 = vsel %vm1012_vm5, %v2000_v56, %v2002_v59 }
 0x14f   : > { %v1203_v50 = vpop.permute.xlu0 %1202  ;;  %v3271_v42 = vadd.f32 %v1205_v49, %v1195_v22  ;;  %v2023_v22 = vrot.slane %v2016_v14, 6  ;;  %v2042_v13 = vrot.slane %v2036_v58, 6  ;;  %v2041_v49 = vrot.slane %v2035_v40, 6 }
 0x150   : > { %v3273_v21 = vadd.f32 %v1203_v50, %v1194_v11  ;;  %1884 = vrot.lane.b32.xlu1 %v1881_v1, %s2360_s8  ;;  %v2037_v11 = vmul.f32 %v3254_v18, %v2034_v63  ;;  %v2001_v1 = vsel %vm1012_vm5, %v1999_v60, %v2000_v56  ;;  %v2057_v50 = vmul.f32 %v3215_v8, %v2055_v41 }
 0x151   : > { %1882 = vrot.lane.b32.xlu0 %v1879_v24, %s2360_s8  ;;  %v2020_v24 = vrot.slane %v2014_v31, 6  ;;  %v2024_v5 = vsel %vm1012_vm5, %v2021_v6, %v2023_v22  ;;  %v2043_v2 = vsel %vm1012_vm5, %v2041_v49, %v2042_v13 }
 0x152   : > { %v3282_v35 = vpop.permute.xlu1 %1218  ;;  %v2044_v20 = vrot.slane %v2037_v11, 6  ;;  %v2063_v32 = vrot.slane %v2057_v50, 6 }
 0x153   : > { %v3284_v48 = vpop.permute.xlu0 %1216  ;;  %v2022_v25 = vsel %vm1012_vm5, %v2020_v24, %v2021_v6  ;;  %v1223_v6 = vadd.f32 %v3282_v35, %v3271_v42 }
 0x154   : > { %1905 = vrot.lane.b32.xlu1 %v1902_v12, %s2361_s10  ;;  %v2058_v12 = vmul.f32 %v3254_v18, %v2055_v41  ;;  %v2045_v57 = vsel %vm1012_vm5, %v2042_v13, %v2044_v20  ;;  %v2064_v23 = vsel %vm1012_vm5, %v2062_v36, %v2063_v32  ;;  %v1222_v22 = vadd.f32 %v3284_v48, %v3273_v21 }
 0x155   : > { %1903 = vrot.lane.b32.xlu0 %v1900_v17, %s2361_s10 }
 0x156   : > { %v3293_v30 = vpop.permute.xlu1 %1232  ;;  %v2065_v15 = vrot.slane %v2058_v12, 6 }
 0x157   : > { %v3295_v37 = vpop.permute.xlu0 %1230 }
 0x158   : > { %1926 = vrot.lane.b32.xlu1 %v1923_v34, %s2362_s12  ;;  %v2077_v34 = vmul.f32 %v3223_v62, %v2076_v33  ;;  %v2066_v46 = vsel %vm1012_vm5, %v2063_v32, %v2065_v15 }
 0x159   : > { %1924 = vrot.lane.b32.xlu0 %v1921_v45, %s2362_s12 }
 0x15a   : > { %v3304_v55 = vpop.permute.xlu1 %1270  ;;  %v2083_v26 = vrot.slane %v2077_v34, 6 }
 0x15b   : > { %v3306_v47 = vpop.permute.xlu0 %1268 }
 0x15c   : > { %1947 = vrot.lane.b32.xlu1 %v1944_v16, %s2363_s16  ;;  %v2084_v16 = vrot.slane %v2078_v44, 6 }
 0x15d   : > { %1945 = vrot.lane.b32.xlu0 %v1942_v27, %s2363_s16  ;;  %v2086_v27 = vrot.slane %v2079_v51, 6 }
 0x15e   : > { %v3315_v3 = vpop.permute.xlu1 %1291  ;;  %v2085_v54 = vsel %vm1012_vm5, %v2083_v26, %v2084_v16 }
 0x15f   : > { %v3317_v4 = vpop.permute.xlu0 %1289  ;;  %v2087_v39 = vsel %vm1012_vm5, %v2084_v16, %v2086_v27 }
 0x160   : > { %1985 = vrot.lane.b32.xlu1 %v1982_v53, %s2359_s30 }
 0x161   : > { %1983 = vrot.lane.b32.xlu0 %v1980_v0, %s2359_s30  ;;  %s2250_s30 = sld [smem:[#allocation3 + $0x3f]] }
 0x162   : > { %v3326_v9 = vpop.permute.xlu1 %1312 }
 0x163   : > { %v3328_v10 = vpop.permute.xlu0 %1310 }
 0x164   : > { %2006 = vrot.lane.b32.xlu1 %v2003_v7, %s2358_s29  ;;  %v1237_v7 = vadd.f32 %v3293_v30, %v1223_v6 }
 0x165   : > { %2004 = vrot.lane.b32.xlu0 %v2001_v1, %s2358_s29  ;;  %s2243_s29 = sld [smem:[#allocation3 + $0x38]]  ;;  %v1236_v1 = vadd.f32 %v3295_v37, %v1222_v22 }
 0x166   : > { %v3337_v29 = vpop.permute.xlu1 %1333 }
 0x167   : > { %v3339_v17 = vpop.permute.xlu0 %1331  ;;  %v1382_v48 = vstv %s2250_s30 }
 0x168   : > { %2027 = vrot.lane.b32.xlu1 %v2024_v5, %s2360_s8  ;;  %v1384_v5 = vmul.f32 %v3215_v8, %v1382_v48  ;;  %v1383_v28 = vmul.f32 %v3223_v62, %v1382_v48 }
 0x169   : > { %2025 = vrot.lane.b32.xlu0 %v2022_v25, %s2360_s8  ;;  %v1385_v25 = vmul.f32 %v3254_v18, %v1382_v48  ;;  %s2257_s8 = sld [smem:[#allocation3 + $0x46]] }
 0x16a   : > { %v1355_v45 = vpop.permute.xlu1 %1354  ;;  %v1390_v15 = vrot.slane %v1384_v5, 2  ;;  %v1389_v36 = vrot.slane %v1383_v28, 2 }
 0x16b   : > { %v1353_v19 = vpop.permute.xlu0 %1352  ;;  %v1239_v38 = vstv %s2243_s29 }
 0x16c   : > { %2048 = vrot.lane.b32.xlu1 %v2045_v57, %s2361_s10  ;;  %v1241_v14 = vmul.f32 %v3215_v8, %v1239_v38  ;;  %v1242_v31 = vmul.f32 %v3254_v18, %v1239_v38  ;;  %v1240_v63 = vmul.f32 %v3223_v62, %v1239_v38 }
 0x16d   : > { %2046 = vrot.lane.b32.xlu0 %v2043_v2, %s2361_s10  ;;  %s2264_s10 = sld [smem:[#allocation3 + $0x4d]] }
 0x16e   : > { %v1376_v43 = vpop.permute.xlu1 %1375  ;;  %v1247_v59 = vrot.slane %v1241_v14, 1  ;;  %v1249_v60 = vrot.slane %v1242_v31, 1  ;;  %v1246_v58 = vrot.slane %v1240_v63, 1 }
 0x16f   : > { %v1374_v61 = vpop.permute.xlu0 %1373  ;;  %v1525_v14 = vstv %s2257_s8 }
 0x170   : > { %2069 = vrot.lane.b32.xlu1 %v2066_v46, %s2362_s12  ;;  %v1250_v24 = vsel %vm292_vm0, %v1247_v59, %v1249_v60  ;;  %v1248_v41 = vsel %vm292_vm0, %v1246_v58, %v1247_v59  ;;  %v1526_v59 = vmul.f32 %v3223_v62, %v1525_v14 }
 0x171   : > { %2067 = vrot.lane.b32.xlu0 %v2064_v23, %s2362_s12  ;;  %v1254_v49 = vadd.f32 %v1250_v24, %v1237_v7  ;;  %v1253_v50 = vadd.f32 %v1248_v41, %v1236_v1  ;;  %s2271_s12 = sld [smem:[#allocation3 + $0x54]] }
 0x172   : > { %v1414_v52 = vpop.permute.xlu1 %1413 }
 0x173   : > { %v1412_v53 = vpop.permute.xlu0 %1411  ;;  %v1275_v35 = vadd.f32 %v3304_v55, %v1254_v49  ;;  %v1274_v21 = vadd.f32 %v3306_v47, %v1253_v50  ;;  %v1668_v28 = vstv %s2264_s10 }
 0x174   : > { %2090 = vrot.lane.b32.xlu1 %v2087_v39, %s2363_s16 }
 0x175   : > { %2088 = vrot.lane.b32.xlu0 %v2085_v54, %s2363_s16  ;;  %v1296_v30 = vadd.f32 %v3315_v3, %v1275_v35  ;;  %v1295_v37 = vadd.f32 %v3317_v4, %v1274_v21  ;;  %v1392_v3 = vrot.slane %v1385_v25, 2  ;;  %s2278_s16 = sld [smem:[#allocation3 + $0x5b]] }
 0x176   : > { %v1435_v0 = vpop.permute.xlu1 %1434 }
 0x177   : > { %v1433_v56 = vpop.permute.xlu0 %1432  ;;  %v1317_v2 = vadd.f32 %v3326_v9, %v1296_v30  ;;  %v1316_v32 = vadd.f32 %v3328_v10, %v1295_v37  ;;  %v1393_v16 = vsel %vm436_vm1, %v1390_v15, %v1392_v3  ;;  %v1391_v9 = vsel %vm436_vm1, %v1389_v36, %v1390_v15 }
 0x179   : > { %v1338_v55 = vadd.f32 %v3337_v29, %v1317_v2  ;;  %v1337_v47 = vadd.f32 %v3339_v17, %v1316_v32  ;;  %v1670_v2 = vmul.f32 %v3215_v8, %v1668_v28 }
 0x17a   : > { %v1456_v11 = vpop.permute.xlu1 %1455 }
 0x17b   : > { %v1454_v40 = vpop.permute.xlu0 %1453  ;;  %v1359_v51 = vadd.f32 %v1355_v45, %v1338_v55  ;;  %v1358_v34 = vadd.f32 %v1353_v19, %v1337_v47 }
 0x17d   : > { %v1380_v46 = vadd.f32 %v1376_v43, %v1359_v51  ;;  %v1379_v23 = vadd.f32 %v1374_v61, %v1358_v34  ;;  %v1527_v43 = vmul.f32 %v3215_v8, %v1525_v14  ;;  %v1528_v61 = vmul.f32 %v3254_v18, %v1525_v14 }
 0x17e   : > { %v1477_v13 = vpop.permute.xlu1 %1476  ;;  %v1676_v51 = vrot.slane %v1670_v2, 4  ;;  %v1954_v2 = vstv %s2278_s16 }
 0x17f   : > { %v1475_v20 = vpop.permute.xlu0 %1474  ;;  %v1397_v26 = vadd.f32 %v1393_v16, %v1380_v46  ;;  %v1396_v29 = vadd.f32 %v1391_v9, %v1379_v23  ;;  %v1533_v24 = vrot.slane %v1527_v43, 3 }
 0x181   : > { %v1418_v39 = vadd.f32 %v1414_v52, %v1397_v26  ;;  %v1417_v54 = vadd.f32 %v1412_v53, %v1396_v29  ;;  %v1535_v52 = vrot.slane %v1528_v61, 3  ;;  %v1532_v53 = vrot.slane %v1526_v59, 3 }
 0x182   : > { %v1498_v12 = vpop.permute.xlu1 %1497 }
 0x183   : > { %v1496_v42 = vpop.permute.xlu0 %1495  ;;  %v1439_v45 = vadd.f32 %v1435_v0, %v1418_v39  ;;  %v1438_v19 = vadd.f32 %v1433_v56, %v1417_v54  ;;  %v1536_v21 = vsel %vm580_vm2, %v1533_v24, %v1535_v52  ;;  %v1534_v48 = vsel %vm580_vm2, %v1532_v53, %v1533_v24 }
 0x185   : > { %v1460_v60 = vadd.f32 %v1456_v11, %v1439_v45  ;;  %v1459_v58 = vadd.f32 %v1454_v40, %v1438_v19  ;;  %v1811_v45 = vstv %s2271_s12 }
 0x186   : > { %v1519_v33 = vpop.permute.xlu1 %1518 }
 0x187   : > { %v1517_v57 = vpop.permute.xlu0 %1516  ;;  %v1481_v7 = vadd.f32 %v1477_v13, %v1460_v60  ;;  %v1480_v1 = vadd.f32 %v1475_v20, %v1459_v58  ;;  %v1813_v60 = vmul.f32 %v3215_v8, %v1811_v45  ;;  %v1814_v58 = vmul.f32 %v3254_v18, %v1811_v45 }
 0x189   : > { %v1502_v41 = vadd.f32 %v1498_v12, %v1481_v7  ;;  %v1501_v49 = vadd.f32 %v1496_v42, %v1480_v1 }
 0x18a   : > { %v1557_v4 = vpop.permute.xlu1 %1556 }
 0x18b   : > { %v1555_v44 = vpop.permute.xlu0 %1554  ;;  %v1523_v56 = vadd.f32 %v1519_v33, %v1502_v41  ;;  %v1522_v35 = vadd.f32 %v1517_v57, %v1501_v49  ;;  %v1671_v33 = vmul.f32 %v3254_v18, %v1668_v28  ;;  %v1669_v57 = vmul.f32 %v3223_v62, %v1668_v28 }
 0x18c   : > { %v1819_v41 = vrot.slane %v1813_v60, 5  ;;  %v1821_v49 = vrot.slane %v1814_v58, 5 }
 0x18d   : > { %v1540_v30 = vadd.f32 %v1536_v21, %v1523_v56  ;;  %v1539_v37 = vadd.f32 %v1534_v48, %v1522_v35  ;;  %v1678_v34 = vrot.slane %v1671_v33, 4  ;;  %v1675_v46 = vrot.slane %v1669_v57, 4 }
 0x18e   : > { %v1578_v27 = vpop.permute.xlu1 %1577 }
 0x18f   : > { %v1576_v10 = vpop.permute.xlu0 %1575  ;;  %v1561_v5 = vadd.f32 %v1557_v4, %v1540_v30  ;;  %v1560_v25 = vadd.f32 %v1555_v44, %v1539_v37  ;;  %v1677_v26 = vsel %vm724_vm3, %v1675_v46, %v1676_v51 }
 0x191   : > { %v1582_v12 = vadd.f32 %v1578_v27, %v1561_v5  ;;  %v1581_v42 = vadd.f32 %v1576_v10, %v1560_v25  ;;  %v1679_v10 = vsel %vm724_vm3, %v1676_v51, %v1678_v34 }
 0x192   : > { %v1599_v38 = vpop.permute.xlu1 %1598 }
 0x193   : > { %v1597_v17 = vpop.permute.xlu0 %1596  ;;  %v1603_v47 = vadd.f32 %v1599_v38, %v1582_v12 }
 0x194   : > { %v1602_v15 = vadd.f32 %v1597_v17, %v1581_v42 }
 0x196   : > { %v1620_v31 = vpop.permute.xlu1 %1619 }
 0x197   : > { %v1618_v63 = vpop.permute.xlu0 %1617  ;;  %v1624_v3 = vadd.f32 %v1620_v31, %v1603_v47  ;;  %v1956_v47 = vmul.f32 %v3215_v8, %v1954_v2 }
 0x198   : > { %v1623_v36 = vadd.f32 %v1618_v63, %v1602_v15  ;;  %v1957_v15 = vmul.f32 %v3254_v18, %v1954_v2 }
 0x19a   : > { %v1641_v6 = vpop.permute.xlu1 %1640 }
 0x19b   : > { %v1639_v22 = vpop.permute.xlu0 %1638  ;;  %v1645_v23 = vadd.f32 %v1641_v6, %v1624_v3  ;;  %v1812_v6 = vmul.f32 %v3223_v62, %v1811_v45  ;;  %v1955_v3 = vmul.f32 %v3223_v62, %v1954_v2 }
 0x19c   : > { %v1644_v16 = vadd.f32 %v1639_v22, %v1623_v36 }
 0x19e   : > { %v1662_v50 = vpop.permute.xlu1 %1661 }
 0x19f   : > { %v1660_v0 = vpop.permute.xlu0 %1659  ;;  %v1666_v9 = vadd.f32 %v1662_v50, %v1645_v23  ;;  %v1818_v50 = vrot.slane %v1812_v6, 5 }
 0x1a0   : > { %v1665_v27 = vadd.f32 %v1660_v0, %v1644_v16  ;;  %v1961_v16 = vrot.slane %v1955_v3, 6 }
 0x1a1   : > { %v1683_v38 = vadd.f32 %v1679_v10, %v1666_v9  ;;  %v1820_v30 = vsel %vm868_vm4, %v1818_v50, %v1819_v41 }
 0x1a2   : > { %v1700_v11 = vpop.permute.xlu1 %1699  ;;  %v1682_v17 = vadd.f32 %v1677_v26, %v1665_v27 }
 0x1a3   : > { %v1698_v40 = vpop.permute.xlu0 %1697  ;;  %v1704_v31 = vadd.f32 %v1700_v11, %v1683_v38 }
 0x1a4   : > { %v1703_v63 = vadd.f32 %v1698_v40, %v1682_v17  ;;  %v1822_v40 = vsel %vm868_vm4, %v1819_v41, %v1821_v49 }
 0x1a6   : > { %v1721_v13 = vpop.permute.xlu1 %1720 }
 0x1a7   : > { %v1719_v20 = vpop.permute.xlu0 %1718  ;;  %v1725_v61 = vadd.f32 %v1721_v13, %v1704_v31 }
 0x1a8   : > { %v1724_v59 = vadd.f32 %v1719_v20, %v1703_v63 }
 0x1aa   : > { %v1742_v32 = vpop.permute.xlu1 %1741 }
 0x1ab   : > { %v1740_v55 = vpop.permute.xlu0 %1739  ;;  %v1746_v22 = vadd.f32 %v1742_v32, %v1725_v61 }
 0x1ac   : > { %v1745_v7 = vadd.f32 %v1740_v55, %v1724_v59 }
 0x1ae   : > { %v1763_v4 = vpop.permute.xlu1 %1762 }
 0x1af   : > { %v1761_v44 = vpop.permute.xlu0 %1760  ;;  %v1767_v52 = vadd.f32 %v1763_v4, %v1746_v22  ;;  %v1962_v4 = vrot.slane %v1956_v47, 6 }
 0x1b0   : > { %v1766_v53 = vadd.f32 %v1761_v44, %v1745_v7  ;;  %v1964_v44 = vrot.slane %v1957_v15, 6 }
 0x1b1   : > { %v1963_v8 = vsel %vm1012_vm5, %v1961_v16, %v1962_v4 }
 0x1b2   : > { %v1784_v29 = vpop.permute.xlu1 %1783 }
 0x1b3   : > { %v1782_v39 = vpop.permute.xlu0 %1781  ;;  %v1788_v0 = vadd.f32 %v1784_v29, %v1767_v52 }
 0x1b4   : > { %v1787_v56 = vadd.f32 %v1782_v39, %v1766_v53  ;;  %v1965_v39 = vsel %vm1012_vm5, %v1962_v4, %v1964_v44 }
 0x1b6   : > { %v1805_v54 = vpop.permute.xlu1 %1804 }
 0x1b7   : > { %v1803_v14 = vpop.permute.xlu0 %1802  ;;  %v1809_v48 = vadd.f32 %v1805_v54, %v1788_v0 }
 0x1b8   : > { %v1808_v11 = vadd.f32 %v1803_v14, %v1787_v56 }
 0x1b9   : > { %v1826_v20 = vadd.f32 %v1822_v40, %v1809_v48 }
 0x1ba   : > { %v1843_v19 = vpop.permute.xlu1 %1842  ;;  %v1825_v5 = vadd.f32 %v1820_v30, %v1808_v11 }
 0x1bb   : > { %v1841_v43 = vpop.permute.xlu0 %1840  ;;  %v1847_v12 = vadd.f32 %v1843_v19, %v1826_v20 }
 0x1bc   : > { %v1846_v42 = vadd.f32 %v1841_v43, %v1825_v5 }
 0x1be   : > { %v1864_v1 = vpop.permute.xlu1 %1863 }
 0x1bf   : > { %v1862_v24 = vpop.permute.xlu0 %1861  ;;  %v1868_v33 = vadd.f32 %v1864_v1, %v1847_v12 }
 0x1c0   : > { %v1867_v57 = vadd.f32 %v1862_v24, %v1846_v42 }
 0x1c2   : > { %v1885_v35 = vpop.permute.xlu1 %1884 }
 0x1c3   : > { %v1883_v21 = vpop.permute.xlu0 %1882  ;;  %v1889_v36 = vadd.f32 %v1885_v35, %v1868_v33 }
 0x1c4   : > { %v1888_v51 = vadd.f32 %v1883_v21, %v1867_v57 }
 0x1c6   : > { %v1906_v37 = vpop.permute.xlu1 %1905 }
 0x1c7   : > { %v1904_v13 = vpop.permute.xlu0 %1903  ;;  %v1910_v34 = vadd.f32 %v1906_v37, %v1889_v36 }
 0x1c8   : > { %v1909_v46 = vadd.f32 %v1904_v13, %v1888_v51 }
 0x1ca   : > { %v1927_v25 = vpop.permute.xlu1 %1926 }
 0x1cb   : > { %v1925_v28 = vpop.permute.xlu0 %1924  ;;  %v1931_v27 = vadd.f32 %v1927_v25, %v1910_v34 }
 0x1cc   : > { %v1930_v10 = vadd.f32 %v1925_v28, %v1909_v46 }
 0x1ce   : > { %v1948_v32 = vpop.permute.xlu1 %1947 }
 0x1cf   : > { %v1946_v55 = vpop.permute.xlu0 %1945  ;;  %v1952_v26 = vadd.f32 %v1948_v32, %v1931_v27 }
 0x1d0   : > { %v1951_v29 = vadd.f32 %v1946_v55, %v1930_v10 }
 0x1d1   : > { %v1969_v62 = vadd.f32 %v1965_v39, %v1952_v26 }
 0x1d2   : > { %v1986_v23 = vpop.permute.xlu1 %1985  ;;  %v1968_v17 = vadd.f32 %v1963_v8, %v1951_v29 }
 0x1d3   : > { %v1984_v9 = vpop.permute.xlu0 %1983  ;;  %v1990_v31 = vadd.f32 %v1986_v23, %v1969_v62 }
 0x1d4   : > { %v1989_v63 = vadd.f32 %v1984_v9, %v1968_v17 }
 0x1d6   : > { %v2007_v18 = vpop.permute.xlu1 %2006 }
 0x1d7   : > { %v2005_v38 = vpop.permute.xlu0 %2004  ;;  %v2011_v43 = vadd.f32 %v2007_v18, %v1990_v31 }
 0x1d8   : > { %v2010_v61 = vadd.f32 %v2005_v38, %v1989_v63 }
 0x1da   : > { %v2028_v54 = vpop.permute.xlu1 %2027 }
 0x1db   : > { %v2026_v14 = vpop.permute.xlu0 %2025  ;;  %v2032_v59 = vadd.f32 %v2028_v54, %v2011_v43 }
 0x1dc   : > { %v2031_v60 = vadd.f32 %v2026_v14, %v2010_v61 }
 0x1de   : > { %v2049_v45 = vpop.permute.xlu1 %2048 }
 0x1df   : > { %v2047_v19 = vpop.permute.xlu0 %2046  ;;  %v2053_v22 = vadd.f32 %v2049_v45, %v2032_v59 }
 0x1e0   : > { %v2052_v7 = vadd.f32 %v2047_v19, %v2031_v60 }
 0x1e2   : > { %v2070_v58 = vpop.permute.xlu1 %2069 }
 0x1e3   : > { %v2068_v6 = vpop.permute.xlu0 %2067  ;;  %v2074_v1 = vadd.f32 %v2070_v58, %v2053_v22 }
 0x1e4   : > { %v2073_v24 = vadd.f32 %v2068_v6, %v2052_v7 }
 0x1e6   : > { %v2091_v52 = vpop.permute.xlu1 %2090 }
 0x1e7   : > { %v2089_v53 = vpop.permute.xlu0 %2088  ;;  %v2095_v41 = vadd.f32 %v2091_v52, %v2074_v1 }
 0x1e8   : > { %v2094_v49 = vadd.f32 %v2089_v53, %v2073_v24 }
 0x1e9   : > { %v2286_v50 = vmul.f32 -1.442695, %v2095_v41 }
 0x1ea   : > { %v2285_v0 = vmul.f32 -1.442695, %v2094_v49 }
 0x1eb   : > { %2316 = vpow2.f32 %v2286_v50 }
 0x1ec   : > { %2318 = vpow2.f32 %v2285_v0 }
 0x1f5   : > { %v2317_v56 = vpop.eup %2316 }
 0x1f6   : > { %v2319_v35 = vpop.eup %2318  ;;  %v2103_v21 = vadd.f32 1.0, %v2317_v56 }
 0x1f7   : > { %v2102_v48 = vadd.f32 1.0, %v2319_v35 }
 0x1f8   : > { %2320 = vrcp.f32 %v2103_v21 }
 0x1f9   : > { %2322 = vrcp.f32 %v2102_v48 }
 0x202   : > { %v2321_v11 = vpop.eup %2320 }
 0x203   : > { %v2323_v40 = vpop.eup %2322  ;;  %2110 = vst.msk [vmem:[%s185_s24 + $0x8] sm:$0xff] %vm2108_vm6, %v2321_v11 }
 0x204   : > { %2109 = vst.msk [vmem:[%s185_s24] sm:$0xff] %vm2108_vm6, %v2323_v40 }
 0x205 PF: > { %s15_s14 = sadd.s32 1, %s2355_s14  }
 0x206   : > { %p12_p1 = scmp.ge.s32.totalorder %s15_s14, 4  }
 0x208   :  { %14 = sbr.rel (!%p12_p1) target bundleno = 3 (0x3), region = 67 }
 0x20f   :  { %2132 = vsyncpa [#allocation4], 1 }
 0x210   :  { %2134 = vsyncpa [#allocation4 + $0x1], 1 }

</bundles_post_ra>
